<compile_context>
chip_gen: v6e
topology: v6e:2x2x1
jax: 0.10.0
libtpu: 0.0.40
codegen_flags: <defaults>
</compile_context>

<pallas_src>
import functools

import jax
import jax.numpy as jnp
from jax.experimental import pallas as pl
from jax.experimental.pallas import tpu as pltpu


NEG_INF = -1000000000.0  # same constant torch's masked_fill uses


def _multi_head_attention(q2, k2, v2, key_mask, num_head):
    """Single-example multi-head attention.

    q2: (Lq, D), k2/v2: (Lk, D), key_mask: (1, Lk) with 1.0 = keep.
    Returns (Lq, D).
    """
    _, D = q2.shape
    dh = D // num_head
    scale = 1.0 / (dh ** 0.5)
    k2t = k2.T  # (D, Lk): transpose once; per-head slices become sublane slices
    outs = []
    for h in range(num_head):
        lo = h * dh
        qh = q2[:, lo:lo + dh]            # (Lq, dh)
        kht = k2t[lo:lo + dh, :]          # (dh, Lk)
        vh = v2[:, lo:lo + dh]            # (Lk, dh)
        s = jnp.dot(qh, kht, preferred_element_type=jnp.float32)   # (Lq, Lk)
        # torch: masked_fill(mask==0, -1e9) then divide by sqrt(dh)
        s = jnp.where(key_mask > 0.0, s, NEG_INF) * scale
        m = jnp.max(s, axis=-1, keepdims=True)
        e = jnp.exp(s - m)
        p = e / jnp.sum(e, axis=-1, keepdims=True)
        outs.append(jnp.dot(p, vh, preferred_element_type=jnp.float32))
    return jnp.concatenate(outs, axis=-1)


def dyintra_kernel(
    # per-batch data
    v_ref, q_ref, c_ref,
    vmr_ref, qmr_ref, cmr_ref,       # row masks:  (1, L, 1)
    vmk_ref, qmk_ref, cmk_ref,       # key masks:  (1, 1, Lk)
    # parameters (broadcast across the grid)
    wv4q_ref, bv4q_ref, wq4v_ref, bq4v_ref,
    wv_ref, bv_ref, wq_ref, bq_ref, wc_ref, bc_ref,   # pre-split (3, Din, D) / (3, 1, D)
    mv_ref, mc_ref,                                   # pre-scaled memory tokens (2, 1, D)
    wvo_ref, bvo_ref, wqo_ref, bqo_ref, wco_ref, bco_ref,
    # outputs
    vo_ref, qo_ref, co_ref,
    *, num_head,
):
    v = v_ref[0]          # (N, Dv)
    q = q_ref[0]          # (Lq, Dq)
    c = c_ref[0]          # (Lc, Dc)
    vm_r = vmr_ref[0]     # (N, 1)
    qm_r = qmr_ref[0]     # (Lq, 1)
    cm_r = cmr_ref[0]     # (Lc, 1)
    vm_k = vmk_ref[0]     # (1, N + 1)
    qm_k = qmk_ref[0]     # (1, Lq)
    cm_k = cmk_ref[0]     # (1, Lc + 1)

    # ---- gates from masked means ----
    v_mean = jnp.sum(v * vm_r, axis=0, keepdims=True) / jnp.sum(vm_r)   # (1, Dv)
    q_mean = jnp.sum(q * qm_r, axis=0, keepdims=True) / jnp.sum(qm_r)   # (1, Dq)
    v4q_gate = jax.nn.sigmoid(
        jnp.dot(jnp.maximum(v_mean, 0.0), wv4q_ref[...],
                preferred_element_type=jnp.float32) + bv4q_ref[...])    # (1, D)
    q4v_gate = jax.nn.sigmoid(
        jnp.dot(jnp.maximum(q_mean, 0.0), wq4v_ref[...],
                preferred_element_type=jnp.float32) + bq4v_ref[...])    # (1, D)
    gv = 1.0 + q4v_gate   # gates the visual stream
    gq = 1.0 + v4q_gate   # gates the question stream

    # ---- K/Q/V projections (weights pre-split on host; no lane slicing here) ----
    def kqv(x, mask_rows, w_ref, b_ref):
        xr = jnp.maximum(x, 0.0)
        k = (jnp.dot(xr, w_ref[0], preferred_element_type=jnp.float32) + b_ref[0]) * mask_rows
        qy = (jnp.dot(xr, w_ref[1], preferred_element_type=jnp.float32) + b_ref[1]) * mask_rows
        vl = (jnp.dot(xr, w_ref[2], preferred_element_type=jnp.float32) + b_ref[2]) * mask_rows
        return k, qy, vl

    v_k, v_q, v_v = kqv(v, vm_r, wv_ref, bv_ref)
    q_k, q_q, q_v = kqv(q, qm_r, wq_ref, bq_ref)
    c_k, c_q, c_v = kqv(c, cm_r, wc_ref, bc_ref)

    # prepend pre-scaled memory tokens (sublane-axis concat, lane-dense rows)
    v_k = jnp.concatenate([mv_ref[0], v_k], axis=0)   # (N + 1, D)
    v_v = jnp.concatenate([mv_ref[1], v_v], axis=0)
    c_k = jnp.concatenate([mc_ref[0], c_k], axis=0)   # (Lc + 1, D)
    c_v = jnp.concatenate([mc_ref[1], c_v], axis=0)

    # ---- dynamic intra-modality attention ----
    v_update = _multi_head_attention(gv * v_q, gv * v_k, v_v, vm_k, num_head)
    q_update = _multi_head_attention(gq * q_q, gq * q_k, q_v, qm_k, num_head)
    c_update = _multi_head_attention(c_q, c_k, c_v, cm_k, num_head)

    # ---- output projections ----
    vo_ref[0] = jnp.dot(v + v_update, wvo_ref[...],
                        preferred_element_type=jnp.float32) + bvo_ref[...]
    qo_ref[0] = jnp.dot(q + q_update, wqo_ref[...],
                        preferred_element_type=jnp.float32) + bqo_ref[...]
    co_ref[0] = jnp.dot(c + c_update, wco_ref[...],
                        preferred_element_type=jnp.float32) + bco_ref[...]


def dy_intra_modality_update(v, q, c, v_mask, q_mask, c_mask, p, num_head):
    """Host wrapper: preprocess params/masks (torch layout -> kernel layout) and
    launch one fused Pallas kernel over the batch."""
    f32 = jnp.float32
    B, N, Dv = v.shape
    _, Lq, Dq = q.shape
    _, Lc, Dc = c.shape
    D = p["m_v_k"].shape[-1]

    def t(w):  # torch Linear weight (out, in) -> (in, out)
        return jnp.transpose(w).astype(f32)

    def kqv_pack(w, b):  # (3D, Din), (3D,) -> (3, Din, D), (3, 1, D)
        wt = t(w)                                   # (Din, 3D)
        wt = wt.reshape(wt.shape[0], 3, D)          # (Din, 3, D)
        wt = jnp.transpose(wt, (1, 0, 2))           # (3, Din, D)
        bt = b.astype(f32).reshape(3, 1, D)
        return wt, bt

    wv_kqv, bv_kqv = kqv_pack(p["w_v_lin"], p["b_v_lin"])
    wq_kqv, bq_kqv = kqv_pack(p["w_q_lin"], p["b_q_lin"])
    wc_kqv, bc_kqv = kqv_pack(p["w_c_lin"], p["b_c_lin"])

    # memory tokens, pre-scaled on host: k * sqrt(output_size), v * sqrt(m) (m = 1)
    mv_kv = jnp.stack([(D ** 0.5) * p["m_v_k"].reshape(1, D),
                       p["m_v_v"].reshape(1, D)], axis=0).astype(f32)   # (2, 1, D)
    mc_kv = jnp.stack([(D ** 0.5) * p["m_c_k"].reshape(1, D),
                       p["m_c_v"].reshape(1, D)], axis=0).astype(f32)

    wv4q, bv4q = t(p["w_v4q"]), p["b_v4q"].astype(f32).reshape(1, D)
    wq4v, bq4v = t(p["w_q4v"]), p["b_q4v"].astype(f32).reshape(1, D)
    wvo, bvo = t(p["w_v_out"]), p["b_v_out"].astype(f32).reshape(1, D)
    wqo, bqo = t(p["w_q_out"]), p["b_q_out"].astype(f32).reshape(1, D)
    wco, bco = t(p["w_c_out"]), p["b_c_out"].astype(f32).reshape(1, D)

    # masks: row orientation (L, 1) for the projections/means, key orientation
    # (1, Lk) -- with the prepended always-on memory slot -- for the scores.
    vm = v_mask.astype(f32)
    qm = q_mask.astype(f32)
    cm = c_mask.astype(f32)
    ones1 = jnp.ones((B, 1), f32)
    vm_r, qm_r, cm_r = vm[..., None], qm[..., None], cm[..., None]
    vm_k = jnp.concatenate([ones1, vm], axis=1)[:, None, :]   # (B, 1, N + 1)
    qm_k = qm[:, None, :]                                     # (B, 1, Lq)
    cm_k = jnp.concatenate([ones1, cm], axis=1)[:, None, :]   # (B, 1, Lc + 1)

    def batch_spec(shape):
        return pl.BlockSpec((1,) + shape, lambda b: (b, 0, 0))

    def const_spec(shape):
        nd = len(shape)
        return pl.BlockSpec(shape, lambda b, _nd=nd: (0,) * _nd)

    grid_spec = pltpu.PrefetchScalarGridSpec(
        num_scalar_prefetch=0,
        grid=(B,),
        in_specs=[
            batch_spec((N, Dv)), batch_spec((Lq, Dq)), batch_spec((Lc, Dc)),
            batch_spec((N, 1)), batch_spec((Lq, 1)), batch_spec((Lc, 1)),
            batch_spec((1, N + 1)), batch_spec((1, Lq)), batch_spec((1, Lc + 1)),
            const_spec((Dv, D)), const_spec((1, D)),
            const_spec((Dq, D)), const_spec((1, D)),
            const_spec((3, Dv, D)), const_spec((3, 1, D)),
            const_spec((3, Dq, D)), const_spec((3, 1, D)),
            const_spec((3, Dc, D)), const_spec((3, 1, D)),
            const_spec((2, 1, D)), const_spec((2, 1, D)),
            const_spec((D, D)), const_spec((1, D)),
            const_spec((D, D)), const_spec((1, D)),
            const_spec((D, D)), const_spec((1, D)),
        ],
        out_specs=[
            batch_spec((N, D)), batch_spec((Lq, D)), batch_spec((Lc, D)),
        ],
    )

    out_shape = (
        jax.ShapeDtypeStruct((B, N, D), f32),
        jax.ShapeDtypeStruct((B, Lq, D), f32),
        jax.ShapeDtypeStruct((B, Lc, D), f32),
    )

    return pl.pallas_call(
        functools.partial(dyintra_kernel, num_head=num_head),
        out_shape=out_shape,
        grid_spec=grid_spec,
        compiler_params=pltpu.CompilerParams(dimension_semantics=("parallel",)),
    )(v.astype(f32), q.astype(f32), c.astype(f32),
      vm_r, qm_r, cm_r, vm_k, qm_k, cm_k,
      wv4q, bv4q, wq4v, bq4v,
      wv_kqv, bv_kqv, wq_kqv, bq_kqv, wc_kqv, bc_kqv,
      mv_kv, mc_kv,
      wvo, bvo, wqo, bqo, wco, bco)


def dy_intra_modality_update_ref(v, q, c, v_mask, q_mask, c_mask, p, num_head):
    """Pure-JAX reference mirroring the PyTorch forward exactly (torch param layout)."""
    B, N, _ = v.shape
    D = p["m_v_k"].shape[-1]
    relu, sig = jax.nn.relu, jax.nn.sigmoid

    def lin(x, w, b):   # torch Linear: w (out, in), b (out,)
        return x @ w.T + b

    v_mean = (v * v_mask[..., None]).sum(1) / v_mask.sum(1, keepdims=True)
    q_mean = (q * q_mask[..., None]).sum(1) / q_mask.sum(1, keepdims=True)
    v4q_gate = sig(lin(relu(v_mean), p["w_v4q"], p["b_v4q"]))[:, None, :]
    q4v_gate = sig(lin(relu(q_mean), p["w_q4v"], p["b_q4v"]))[:, None, :]

    v_trans = lin(relu(v), p["w_v_lin"], p["b_v_lin"]) * v_mask[..., None]
    q_trans = lin(relu(q), p["w_q_lin"], p["b_q_lin"]) * q_mask[..., None]
    c_trans = lin(relu(c), p["w_c_lin"], p["b_c_lin"]) * c_mask[..., None]
    v_k, v_q, v_v = jnp.split(v_trans, 3, axis=2)
    q_k, q_q, q_v = jnp.split(q_trans, 3, axis=2)
    c_k, c_q, c_v = jnp.split(c_trans, 3, axis=2)

    mv = p["m_v_k"].shape[1]
    mc = p["m_c_k"].shape[1]
    m_v_k = (D ** 0.5) * jnp.broadcast_to(p["m_v_k"], (B, mv, D))
    m_v_v = (mv ** 0.5) * jnp.broadcast_to(p["m_v_v"], (B, mv, D))
    v_k = jnp.concatenate([m_v_k, v_k], axis=1)
    v_v = jnp.concatenate([m_v_v, v_v], axis=1)
    v_mask_f = jnp.concatenate([jnp.ones((B, mv), v_mask.dtype), v_mask], axis=1)
    m_c_k = (D ** 0.5) * jnp.broadcast_to(p["m_c_k"], (B, mc, D))
    m_c_v = (mc ** 0.5) * jnp.broadcast_to(p["m_c_v"], (B, mc, D))
    c_k = jnp.concatenate([m_c_k, c_k], axis=1)
    c_v = jnp.concatenate([m_c_v, c_v], axis=1)
    c_mask_f = jnp.concatenate([jnp.ones((B, mc), c_mask.dtype), c_mask], axis=1)

    new_vq = (1 + q4v_gate) * v_q
    new_vk = (1 + q4v_gate) * v_k
    new_qq = (1 + v4q_gate) * q_q
    new_qk = (1 + v4q_gate) * q_k

    dh = D // num_head

    def mha(qq, kk, vv, mask):
        outs = []
        for i in range(num_head):
            sl = slice(i * dh, (i + 1) * dh)
            s = qq[..., sl] @ jnp.swapaxes(kk[..., sl], 1, 2)
            s = jnp.where(mask[:, None, :] == 0, NEG_INF, s) / (dh ** 0.5)
            a = jax.nn.softmax(s, axis=2)
            outs.append(a @ vv[..., sl])
        return jnp.concatenate(outs, axis=2)

    v_update = mha(new_vq, new_vk, v_v, v_mask_f)
    q_update = mha(new_qq, new_qk, q_v, q_mask)
    c_update = mha(c_q, c_k, c_v, c_mask_f)

    upd_v = lin(v + v_update, p["w_v_out"], p["b_v_out"])
    upd_q = lin(q + q_update, p["w_q_out"], p["b_q_out"])
    upd_c = lin(c + c_update, p["w_c_out"], p["b_c_out"])
    return upd_v, upd_q, upd_c


if __name__ == "__main__":
    B = 2
    num_obj, max_len, max_len_c = 8, 8, 8
    v_size = q_size = c_size = output_size = 32   # residual add requires equal sizes
    num_head = 4
    D = output_size

    key = jax.random.PRNGKey(0)
    kit = iter(jax.random.split(key, 40))

    v = jax.random.normal(next(kit), (B, num_obj, v_size), jnp.float32)
    q = jax.random.normal(next(kit), (B, max_len, q_size), jnp.float32)
    c = jax.random.normal(next(kit), (B, max_len_c, c_size), jnp.float32)
    v_mask = (jax.random.uniform(next(kit), (B, num_obj)) > 0.25).astype(jnp.float32)
    q_mask = (jax.random.uniform(next(kit), (B, max_len)) > 0.25).astype(jnp.float32)
    c_mask = (jax.random.uniform(next(kit), (B, max_len_c)) > 0.25).astype(jnp.float32)
    # guarantee at least one valid position per row (avoids 0/0 in the means)
    v_mask = v_mask.at[:, 0].set(1.0)
    q_mask = q_mask.at[:, 0].set(1.0)
    c_mask = c_mask.at[:, 0].set(1.0)

    def nrm(shape, scale=0.1):
        return scale * jax.random.normal(next(kit), shape, dtype=jnp.float32)

    # torch-style parameter layout: Linear weight (out, in), bias (out,)
    p = {
        "w_v4q": nrm((D, v_size)), "b_v4q": nrm((D,)),
        "w_q4v": nrm((D, q_size)), "b_q4v": nrm((D,)),
        "w_v_lin": nrm((3 * D, v_size)), "b_v_lin": nrm((3 * D,)),
        "w_q_lin": nrm((3 * D, q_size)), "b_q_lin": nrm((3 * D,)),
        "w_c_lin": nrm((3 * D, c_size)), "b_c_lin": nrm((3 * D,)),
        "m_v_k": nrm((1, 1, D)), "m_v_v": nrm((1, 1, D)),
        "m_c_k": nrm((1, 1, D)), "m_c_v": nrm((1, 1, D)),
        "w_v_out": nrm((D, D)), "b_v_out": nrm((D,)),
        "w_q_out": nrm((D, D)), "b_q_out": nrm((D,)),
        "w_c_out": nrm((D, D)), "b_c_out": nrm((D,)),
    }

    out_v, out_q, out_c = dy_intra_modality_update(
        v, q, c, v_mask, q_mask, c_mask, p, num_head)
    out_v = jax.block_until_ready(out_v)

    ref_v, ref_q, ref_c = dy_intra_modality_update_ref(
        v, q, c, v_mask, q_mask, c_mask, p, num_head)

    for name, o, r in (("v", out_v, ref_v), ("q", out_q, ref_q), ("c", out_c, ref_c)):
        assert o.shape == r.shape, (name, o.shape, r.shape)
        err = float(jnp.max(jnp.abs(o - r)))
        assert err < 2e-3, (name, err)

    print("KERNEL_OK")
</pallas_src>

<mosaic_0001>
module attributes {stable_mosaic.version = 11 : i64} {
  func.func @dyintra_kernel(%arg0: i32, %arg1: memref<1x8x32xf32, #tpu.memory_space<vmem>>, %arg2: memref<1x8x32xf32, #tpu.memory_space<vmem>>, %arg3: memref<1x8x32xf32, #tpu.memory_space<vmem>>, %arg4: memref<1x8x1xf32, #tpu.memory_space<vmem>>, %arg5: memref<1x8x1xf32, #tpu.memory_space<vmem>>, %arg6: memref<1x8x1xf32, #tpu.memory_space<vmem>>, %arg7: memref<1x1x9xf32, #tpu.memory_space<vmem>>, %arg8: memref<1x1x8xf32, #tpu.memory_space<vmem>>, %arg9: memref<1x1x9xf32, #tpu.memory_space<vmem>>, %arg10: memref<32x32xf32, #tpu.memory_space<vmem>>, %arg11: memref<1x32xf32, #tpu.memory_space<vmem>>, %arg12: memref<32x32xf32, #tpu.memory_space<vmem>>, %arg13: memref<1x32xf32, #tpu.memory_space<vmem>>, %arg14: memref<3x32x32xf32, #tpu.memory_space<vmem>>, %arg15: memref<3x1x32xf32, #tpu.memory_space<vmem>>, %arg16: memref<3x32x32xf32, #tpu.memory_space<vmem>>, %arg17: memref<3x1x32xf32, #tpu.memory_space<vmem>>, %arg18: memref<3x32x32xf32, #tpu.memory_space<vmem>>, %arg19: memref<3x1x32xf32, #tpu.memory_space<vmem>>, %arg20: memref<2x1x32xf32, #tpu.memory_space<vmem>>, %arg21: memref<2x1x32xf32, #tpu.memory_space<vmem>>, %arg22: memref<32x32xf32, #tpu.memory_space<vmem>>, %arg23: memref<1x32xf32, #tpu.memory_space<vmem>>, %arg24: memref<32x32xf32, #tpu.memory_space<vmem>>, %arg25: memref<1x32xf32, #tpu.memory_space<vmem>>, %arg26: memref<32x32xf32, #tpu.memory_space<vmem>>, %arg27: memref<1x32xf32, #tpu.memory_space<vmem>>, %arg28: memref<1x8x32xf32, #tpu.memory_space<vmem>>, %arg29: memref<1x8x32xf32, #tpu.memory_space<vmem>>, %arg30: memref<1x8x32xf32, #tpu.memory_space<vmem>>) attributes {dimension_semantics = [#tpu.dimension_semantics<parallel>], iteration_bounds = array<i64: 2>, scalar_prefetch = 0 : i64, scratch_operands = 0 : i64, tpu.core_type = #tpu.core_type<tc>, window_params = [{transform_indices = @transform_0, window_bounds = array<i64: 1, 8, 32>}, {transform_indices = @transform_1, window_bounds = array<i64: 1, 8, 32>}, {transform_indices = @transform_2, window_bounds = array<i64: 1, 8, 32>}, {transform_indices = @transform_3, window_bounds = array<i64: 1, 8, 1>}, {transform_indices = @transform_4, window_bounds = array<i64: 1, 8, 1>}, {transform_indices = @transform_5, window_bounds = array<i64: 1, 8, 1>}, {transform_indices = @transform_6, window_bounds = array<i64: 1, 1, 9>}, {transform_indices = @transform_7, window_bounds = array<i64: 1, 1, 8>}, {transform_indices = @transform_8, window_bounds = array<i64: 1, 1, 9>}, {pipeline_mode = #tpu.pipeline_mode<synchronous>, transform_indices = @transform_9, window_bounds = array<i64: 32, 32>}, {pipeline_mode = #tpu.pipeline_mode<synchronous>, transform_indices = @transform_10, window_bounds = array<i64: 1, 32>}, {pipeline_mode = #tpu.pipeline_mode<synchronous>, transform_indices = @transform_11, window_bounds = array<i64: 32, 32>}, {pipeline_mode = #tpu.pipeline_mode<synchronous>, transform_indices = @transform_12, window_bounds = array<i64: 1, 32>}, {pipeline_mode = #tpu.pipeline_mode<synchronous>, transform_indices = @transform_13, window_bounds = array<i64: 3, 32, 32>}, {pipeline_mode = #tpu.pipeline_mode<synchronous>, transform_indices = @transform_14, window_bounds = array<i64: 3, 1, 32>}, {pipeline_mode = #tpu.pipeline_mode<synchronous>, transform_indices = @transform_15, window_bounds = array<i64: 3, 32, 32>}, {pipeline_mode = #tpu.pipeline_mode<synchronous>, transform_indices = @transform_16, window_bounds = array<i64: 3, 1, 32>}, {pipeline_mode = #tpu.pipeline_mode<synchronous>, transform_indices = @transform_17, window_bounds = array<i64: 3, 32, 32>}, {pipeline_mode = #tpu.pipeline_mode<synchronous>, transform_indices = @transform_18, window_bounds = array<i64: 3, 1, 32>}, {pipeline_mode = #tpu.pipeline_mode<synchronous>, transform_indices = @transform_19, window_bounds = array<i64: 2, 1, 32>}, {pipeline_mode = #tpu.pipeline_mode<synchronous>, transform_indices = @transform_20, window_bounds = array<i64: 2, 1, 32>}, {pipeline_mode = #tpu.pipeline_mode<synchronous>, transform_indices = @transform_21, window_bounds = array<i64: 32, 32>}, {pipeline_mode = #tpu.pipeline_mode<synchronous>, transform_indices = @transform_22, window_bounds = array<i64: 1, 32>}, {pipeline_mode = #tpu.pipeline_mode<synchronous>, transform_indices = @transform_23, window_bounds = array<i64: 32, 32>}, {pipeline_mode = #tpu.pipeline_mode<synchronous>, transform_indices = @transform_24, window_bounds = array<i64: 1, 32>}, {pipeline_mode = #tpu.pipeline_mode<synchronous>, transform_indices = @transform_25, window_bounds = array<i64: 32, 32>}, {pipeline_mode = #tpu.pipeline_mode<synchronous>, transform_indices = @transform_26, window_bounds = array<i64: 1, 32>}, {transform_indices = @transform_27, window_bounds = array<i64: 1, 8, 32>}, {transform_indices = @transform_28, window_bounds = array<i64: 1, 8, 32>}, {transform_indices = @transform_29, window_bounds = array<i64: 1, 8, 32>}]} {
    %c0 = arith.constant 0 : index
    %c0_0 = arith.constant 0 : index
    %c0_1 = arith.constant 0 : index
    %0 = vector.load %arg1[%c0, %c0_0, %c0_1] : memref<1x8x32xf32, #tpu.memory_space<vmem>>, vector<1x8x32xf32>
    %1 = vector.shape_cast %0 : vector<1x8x32xf32> to vector<8x32xf32>
    %c0_2 = arith.constant 0 : index
    %c0_3 = arith.constant 0 : index
    %c0_4 = arith.constant 0 : index
    %2 = vector.load %arg2[%c0_2, %c0_3, %c0_4] : memref<1x8x32xf32, #tpu.memory_space<vmem>>, vector<1x8x32xf32>
    %3 = vector.shape_cast %2 : vector<1x8x32xf32> to vector<8x32xf32>
    %c0_5 = arith.constant 0 : index
    %c0_6 = arith.constant 0 : index
    %c0_7 = arith.constant 0 : index
    %4 = vector.load %arg3[%c0_5, %c0_6, %c0_7] : memref<1x8x32xf32, #tpu.memory_space<vmem>>, vector<1x8x32xf32>
    %5 = vector.shape_cast %4 : vector<1x8x32xf32> to vector<8x32xf32>
    %c0_8 = arith.constant 0 : index
    %c0_9 = arith.constant 0 : index
    %c0_10 = arith.constant 0 : index
    %6 = vector.load %arg4[%c0_8, %c0_9, %c0_10] : memref<1x8x1xf32, #tpu.memory_space<vmem>>, vector<1x8x1xf32>
    %7 = vector.shape_cast %6 : vector<1x8x1xf32> to vector<8x1xf32>
    %c0_11 = arith.constant 0 : index
    %c0_12 = arith.constant 0 : index
    %c0_13 = arith.constant 0 : index
    %8 = vector.load %arg5[%c0_11, %c0_12, %c0_13] : memref<1x8x1xf32, #tpu.memory_space<vmem>>, vector<1x8x1xf32>
    %9 = vector.shape_cast %8 : vector<1x8x1xf32> to vector<8x1xf32>
    %c0_14 = arith.constant 0 : index
    %c0_15 = arith.constant 0 : index
    %c0_16 = arith.constant 0 : index
    %10 = vector.load %arg6[%c0_14, %c0_15, %c0_16] : memref<1x8x1xf32, #tpu.memory_space<vmem>>, vector<1x8x1xf32>
    %11 = vector.shape_cast %10 : vector<1x8x1xf32> to vector<8x1xf32>
    %c0_17 = arith.constant 0 : index
    %c0_18 = arith.constant 0 : index
    %c0_19 = arith.constant 0 : index
    %12 = vector.load %arg7[%c0_17, %c0_18, %c0_19] : memref<1x1x9xf32, #tpu.memory_space<vmem>>, vector<1x1x9xf32>
    %13 = vector.shape_cast %12 : vector<1x1x9xf32> to vector<1x9xf32>
    %c0_20 = arith.constant 0 : index
    %c0_21 = arith.constant 0 : index
    %c0_22 = arith.constant 0 : index
    %14 = vector.load %arg8[%c0_20, %c0_21, %c0_22] : memref<1x1x8xf32, #tpu.memory_space<vmem>>, vector<1x1x8xf32>
    %15 = vector.shape_cast %14 : vector<1x1x8xf32> to vector<1x8xf32>
    %c0_23 = arith.constant 0 : index
    %c0_24 = arith.constant 0 : index
    %c0_25 = arith.constant 0 : index
    %16 = vector.load %arg9[%c0_23, %c0_24, %c0_25] : memref<1x1x9xf32, #tpu.memory_space<vmem>>, vector<1x1x9xf32>
    %17 = vector.shape_cast %16 : vector<1x1x9xf32> to vector<1x9xf32>
    %18 = vector.broadcast %7 : vector<8x1xf32> to vector<8x32xf32>
    %19 = arith.mulf %1, %18 : vector<8x32xf32>
    %cst = arith.constant dense<0.000000e+00> : vector<32xf32>
    %20 = vector.multi_reduction <add>, %19, %cst [0] : vector<8x32xf32> to vector<32xf32>
    %21 = vector.shape_cast %20 : vector<32xf32> to vector<1x32xf32>
    %22 = vector.shape_cast %7 : vector<8x1xf32> to vector<1x8x1xf32>
    %cst_26 = arith.constant dense<0.000000e+00> : vector<1xf32>
    %23 = vector.multi_reduction <add>, %22, %cst_26 [1, 2] : vector<1x8x1xf32> to vector<1xf32>
    %24 = vector.shape_cast %23 : vector<1xf32> to vector<1x1x1xf32>
    %25 = vector.extract %24[0, 0, 0] : f32 from vector<1x1x1xf32>
    %26 = vector.broadcast %25 : f32 to vector<1x32xf32>
    %27 = arith.divf %21, %26 : vector<1x32xf32>
    %28 = vector.broadcast %9 : vector<8x1xf32> to vector<8x32xf32>
    %29 = arith.mulf %3, %28 : vector<8x32xf32>
    %cst_27 = arith.constant dense<0.000000e+00> : vector<32xf32>
    %30 = vector.multi_reduction <add>, %29, %cst_27 [0] : vector<8x32xf32> to vector<32xf32>
    %31 = vector.shape_cast %30 : vector<32xf32> to vector<1x32xf32>
    %32 = vector.shape_cast %9 : vector<8x1xf32> to vector<1x8x1xf32>
    %cst_28 = arith.constant dense<0.000000e+00> : vector<1xf32>
    %33 = vector.multi_reduction <add>, %32, %cst_28 [1, 2] : vector<1x8x1xf32> to vector<1xf32>
    %34 = vector.shape_cast %33 : vector<1xf32> to vector<1x1x1xf32>
    %35 = vector.extract %34[0, 0, 0] : f32 from vector<1x1x1xf32>
    %36 = vector.broadcast %35 : f32 to vector<1x32xf32>
    %37 = arith.divf %31, %36 : vector<1x32xf32>
    %cst_29 = arith.constant 0.000000e+00 : f32
    %38 = vector.broadcast %cst_29 : f32 to vector<1x32xf32>
    %39 = arith.maximumf %27, %38 : vector<1x32xf32>
    %c0_30 = arith.constant 0 : index
    %c0_31 = arith.constant 0 : index
    %40 = vector.load %arg10[%c0_30, %c0_31] : memref<32x32xf32, #tpu.memory_space<vmem>>, vector<32x32xf32>
    %cst_32 = arith.constant dense<0.000000e+00> : vector<1x32xf32>
    %41 = tpu.matmul %39, %40, %cst_32 {dimension_numbers = #tpu.dot_dimension_numbers<[1], [0], [0], [1], [0, 0, 1, 1], [], []>} : vector<1x32xf32>, vector<32x32xf32>, vector<1x32xf32> -> vector<1x32xf32>
    %c0_33 = arith.constant 0 : index
    %c0_34 = arith.constant 0 : index
    %42 = vector.load %arg11[%c0_33, %c0_34] : memref<1x32xf32, #tpu.memory_space<vmem>>, vector<1x32xf32>
    %43 = arith.addf %41, %42 : vector<1x32xf32>
    %44 = arith.negf %43 : vector<1x32xf32>
    %45 = math.exp %44 : vector<1x32xf32>
    %cst_35 = arith.constant 1.000000e+00 : f32
    %46 = vector.broadcast %cst_35 : f32 to vector<1x32xf32>
    %47 = arith.addf %46, %45 : vector<1x32xf32>
    %48 = arith.divf %46, %47 : vector<1x32xf32>
    %cst_36 = arith.constant 0.000000e+00 : f32
    %49 = vector.broadcast %cst_36 : f32 to vector<1x32xf32>
    %50 = arith.maximumf %37, %49 : vector<1x32xf32>
    %c0_37 = arith.constant 0 : index
    %c0_38 = arith.constant 0 : index
    %51 = vector.load %arg12[%c0_37, %c0_38] : memref<32x32xf32, #tpu.memory_space<vmem>>, vector<32x32xf32>
    %cst_39 = arith.constant dense<0.000000e+00> : vector<1x32xf32>
    %52 = tpu.matmul %50, %51, %cst_39 {dimension_numbers = #tpu.dot_dimension_numbers<[1], [0], [0], [1], [0, 0, 1, 1], [], []>} : vector<1x32xf32>, vector<32x32xf32>, vector<1x32xf32> -> vector<1x32xf32>
    %c0_40 = arith.constant 0 : index
    %c0_41 = arith.constant 0 : index
    %53 = vector.load %arg13[%c0_40, %c0_41] : memref<1x32xf32, #tpu.memory_space<vmem>>, vector<1x32xf32>
    %54 = arith.addf %52, %53 : vector<1x32xf32>
    %55 = arith.negf %54 : vector<1x32xf32>
    %56 = math.exp %55 : vector<1x32xf32>
    %cst_42 = arith.constant 1.000000e+00 : f32
    %57 = vector.broadcast %cst_42 : f32 to vector<1x32xf32>
    %58 = arith.addf %57, %56 : vector<1x32xf32>
    %59 = arith.divf %57, %58 : vector<1x32xf32>
    %cst_43 = arith.constant 1.000000e+00 : f32
    %60 = vector.broadcast %cst_43 : f32 to vector<1x32xf32>
    %61 = arith.addf %60, %59 : vector<1x32xf32>
    %cst_44 = arith.constant 1.000000e+00 : f32
    %62 = vector.broadcast %cst_44 : f32 to vector<1x32xf32>
    %63 = arith.addf %62, %48 : vector<1x32xf32>
    %cst_45 = arith.constant 0.000000e+00 : f32
    %64 = vector.broadcast %cst_45 : f32 to vector<8x32xf32>
    %65 = arith.maximumf %1, %64 : vector<8x32xf32>
    %c0_46 = arith.constant 0 : index
    %c0_47 = arith.constant 0 : index
    %c0_48 = arith.constant 0 : index
    %66 = vector.load %arg14[%c0_46, %c0_47, %c0_48] : memref<3x32x32xf32, #tpu.memory_space<vmem>>, vector<1x32x32xf32>
    %67 = vector.shape_cast %66 : vector<1x32x32xf32> to vector<32x32xf32>
    %cst_49 = arith.constant dense<0.000000e+00> : vector<8x32xf32>
    %68 = tpu.matmul %65, %67, %cst_49 {dimension_numbers = #tpu.dot_dimension_numbers<[1], [0], [0], [1], [0, 0, 1, 1], [], []>} : vector<8x32xf32>, vector<32x32xf32>, vector<8x32xf32> -> vector<8x32xf32>
    %c0_50 = arith.constant 0 : index
    %c0_51 = arith.constant 0 : index
    %c0_52 = arith.constant 0 : index
    %69 = vector.load %arg15[%c0_50, %c0_51, %c0_52] : memref<3x1x32xf32, #tpu.memory_space<vmem>>, vector<1x1x32xf32>
    %70 = vector.shape_cast %69 : vector<1x1x32xf32> to vector<1x32xf32>
    %71 = vector.broadcast %70 : vector<1x32xf32> to vector<8x32xf32>
    %72 = arith.addf %68, %71 : vector<8x32xf32>
    %73 = vector.broadcast %7 : vector<8x1xf32> to vector<8x32xf32>
    %74 = arith.mulf %72, %73 : vector<8x32xf32>
    %c1 = arith.constant 1 : index
    %c0_53 = arith.constant 0 : index
    %c0_54 = arith.constant 0 : index
    %75 = vector.load %arg14[%c1, %c0_53, %c0_54] : memref<3x32x32xf32, #tpu.memory_space<vmem>>, vector<1x32x32xf32>
    %76 = vector.shape_cast %75 : vector<1x32x32xf32> to vector<32x32xf32>
    %cst_55 = arith.constant dense<0.000000e+00> : vector<8x32xf32>
    %77 = tpu.matmul %65, %76, %cst_55 {dimension_numbers = #tpu.dot_dimension_numbers<[1], [0], [0], [1], [0, 0, 1, 1], [], []>} : vector<8x32xf32>, vector<32x32xf32>, vector<8x32xf32> -> vector<8x32xf32>
    %c1_56 = arith.constant 1 : index
    %c0_57 = arith.constant 0 : index
    %c0_58 = arith.constant 0 : index
    %78 = vector.load %arg15[%c1_56, %c0_57, %c0_58] : memref<3x1x32xf32, #tpu.memory_space<vmem>>, vector<1x1x32xf32>
    %79 = vector.shape_cast %78 : vector<1x1x32xf32> to vector<1x32xf32>
    %80 = vector.broadcast %79 : vector<1x32xf32> to vector<8x32xf32>
    %81 = arith.addf %77, %80 : vector<8x32xf32>
    %82 = vector.broadcast %7 : vector<8x1xf32> to vector<8x32xf32>
    %83 = arith.mulf %81, %82 : vector<8x32xf32>
    %c2 = arith.constant 2 : index
    %c0_59 = arith.constant 0 : index
    %c0_60 = arith.constant 0 : index
    %84 = vector.load %arg14[%c2, %c0_59, %c0_60] : memref<3x32x32xf32, #tpu.memory_space<vmem>>, vector<1x32x32xf32>
    %85 = vector.shape_cast %84 : vector<1x32x32xf32> to vector<32x32xf32>
    %cst_61 = arith.constant dense<0.000000e+00> : vector<8x32xf32>
    %86 = tpu.matmul %65, %85, %cst_61 {dimension_numbers = #tpu.dot_dimension_numbers<[1], [0], [0], [1], [0, 0, 1, 1], [], []>} : vector<8x32xf32>, vector<32x32xf32>, vector<8x32xf32> -> vector<8x32xf32>
    %c2_62 = arith.constant 2 : index
    %c0_63 = arith.constant 0 : index
    %c0_64 = arith.constant 0 : index
    %87 = vector.load %arg15[%c2_62, %c0_63, %c0_64] : memref<3x1x32xf32, #tpu.memory_space<vmem>>, vector<1x1x32xf32>
    %88 = vector.shape_cast %87 : vector<1x1x32xf32> to vector<1x32xf32>
    %89 = vector.broadcast %88 : vector<1x32xf32> to vector<8x32xf32>
    %90 = arith.addf %86, %89 : vector<8x32xf32>
    %91 = vector.broadcast %7 : vector<8x1xf32> to vector<8x32xf32>
    %92 = arith.mulf %90, %91 : vector<8x32xf32>
    %cst_65 = arith.constant 0.000000e+00 : f32
    %93 = vector.broadcast %cst_65 : f32 to vector<8x32xf32>
    %94 = arith.maximumf %3, %93 : vector<8x32xf32>
    %c0_66 = arith.constant 0 : index
    %c0_67 = arith.constant 0 : index
    %c0_68 = arith.constant 0 : index
    %95 = vector.load %arg16[%c0_66, %c0_67, %c0_68] : memref<3x32x32xf32, #tpu.memory_space<vmem>>, vector<1x32x32xf32>
    %96 = vector.shape_cast %95 : vector<1x32x32xf32> to vector<32x32xf32>
    %cst_69 = arith.constant dense<0.000000e+00> : vector<8x32xf32>
    %97 = tpu.matmul %94, %96, %cst_69 {dimension_numbers = #tpu.dot_dimension_numbers<[1], [0], [0], [1], [0, 0, 1, 1], [], []>} : vector<8x32xf32>, vector<32x32xf32>, vector<8x32xf32> -> vector<8x32xf32>
    %c0_70 = arith.constant 0 : index
    %c0_71 = arith.constant 0 : index
    %c0_72 = arith.constant 0 : index
    %98 = vector.load %arg17[%c0_70, %c0_71, %c0_72] : memref<3x1x32xf32, #tpu.memory_space<vmem>>, vector<1x1x32xf32>
    %99 = vector.shape_cast %98 : vector<1x1x32xf32> to vector<1x32xf32>
    %100 = vector.broadcast %99 : vector<1x32xf32> to vector<8x32xf32>
    %101 = arith.addf %97, %100 : vector<8x32xf32>
    %102 = vector.broadcast %9 : vector<8x1xf32> to vector<8x32xf32>
    %103 = arith.mulf %101, %102 : vector<8x32xf32>
    %c1_73 = arith.constant 1 : index
    %c0_74 = arith.constant 0 : index
    %c0_75 = arith.constant 0 : index
    %104 = vector.load %arg16[%c1_73, %c0_74, %c0_75] : memref<3x32x32xf32, #tpu.memory_space<vmem>>, vector<1x32x32xf32>
    %105 = vector.shape_cast %104 : vector<1x32x32xf32> to vector<32x32xf32>
    %cst_76 = arith.constant dense<0.000000e+00> : vector<8x32xf32>
    %106 = tpu.matmul %94, %105, %cst_76 {dimension_numbers = #tpu.dot_dimension_numbers<[1], [0], [0], [1], [0, 0, 1, 1], [], []>} : vector<8x32xf32>, vector<32x32xf32>, vector<8x32xf32> -> vector<8x32xf32>
    %c1_77 = arith.constant 1 : index
    %c0_78 = arith.constant 0 : index
    %c0_79 = arith.constant 0 : index
    %107 = vector.load %arg17[%c1_77, %c0_78, %c0_79] : memref<3x1x32xf32, #tpu.memory_space<vmem>>, vector<1x1x32xf32>
    %108 = vector.shape_cast %107 : vector<1x1x32xf32> to vector<1x32xf32>
    %109 = vector.broadcast %108 : vector<1x32xf32> to vector<8x32xf32>
    %110 = arith.addf %106, %109 : vector<8x32xf32>
    %111 = vector.broadcast %9 : vector<8x1xf32> to vector<8x32xf32>
    %112 = arith.mulf %110, %111 : vector<8x32xf32>
    %c2_80 = arith.constant 2 : index
    %c0_81 = arith.constant 0 : index
    %c0_82 = arith.constant 0 : index
    %113 = vector.load %arg16[%c2_80, %c0_81, %c0_82] : memref<3x32x32xf32, #tpu.memory_space<vmem>>, vector<1x32x32xf32>
    %114 = vector.shape_cast %113 : vector<1x32x32xf32> to vector<32x32xf32>
    %cst_83 = arith.constant dense<0.000000e+00> : vector<8x32xf32>
    %115 = tpu.matmul %94, %114, %cst_83 {dimension_numbers = #tpu.dot_dimension_numbers<[1], [0], [0], [1], [0, 0, 1, 1], [], []>} : vector<8x32xf32>, vector<32x32xf32>, vector<8x32xf32> -> vector<8x32xf32>
    %c2_84 = arith.constant 2 : index
    %c0_85 = arith.constant 0 : index
    %c0_86 = arith.constant 0 : index
    %116 = vector.load %arg17[%c2_84, %c0_85, %c0_86] : memref<3x1x32xf32, #tpu.memory_space<vmem>>, vector<1x1x32xf32>
    %117 = vector.shape_cast %116 : vector<1x1x32xf32> to vector<1x32xf32>
    %118 = vector.broadcast %117 : vector<1x32xf32> to vector<8x32xf32>
    %119 = arith.addf %115, %118 : vector<8x32xf32>
    %120 = vector.broadcast %9 : vector<8x1xf32> to vector<8x32xf32>
    %121 = arith.mulf %119, %120 : vector<8x32xf32>
    %cst_87 = arith.constant 0.000000e+00 : f32
    %122 = vector.broadcast %cst_87 : f32 to vector<8x32xf32>
    %123 = arith.maximumf %5, %122 : vector<8x32xf32>
    %c0_88 = arith.constant 0 : index
    %c0_89 = arith.constant 0 : index
    %c0_90 = arith.constant 0 : index
    %124 = vector.load %arg18[%c0_88, %c0_89, %c0_90] : memref<3x32x32xf32, #tpu.memory_space<vmem>>, vector<1x32x32xf32>
    %125 = vector.shape_cast %124 : vector<1x32x32xf32> to vector<32x32xf32>
    %cst_91 = arith.constant dense<0.000000e+00> : vector<8x32xf32>
    %126 = tpu.matmul %123, %125, %cst_91 {dimension_numbers = #tpu.dot_dimension_numbers<[1], [0], [0], [1], [0, 0, 1, 1], [], []>} : vector<8x32xf32>, vector<32x32xf32>, vector<8x32xf32> -> vector<8x32xf32>
    %c0_92 = arith.constant 0 : index
    %c0_93 = arith.constant 0 : index
    %c0_94 = arith.constant 0 : index
    %127 = vector.load %arg19[%c0_92, %c0_93, %c0_94] : memref<3x1x32xf32, #tpu.memory_space<vmem>>, vector<1x1x32xf32>
    %128 = vector.shape_cast %127 : vector<1x1x32xf32> to vector<1x32xf32>
    %129 = vector.broadcast %128 : vector<1x32xf32> to vector<8x32xf32>
    %130 = arith.addf %126, %129 : vector<8x32xf32>
    %131 = vector.broadcast %11 : vector<8x1xf32> to vector<8x32xf32>
    %132 = arith.mulf %130, %131 : vector<8x32xf32>
    %c1_95 = arith.constant 1 : index
    %c0_96 = arith.constant 0 : index
    %c0_97 = arith.constant 0 : index
    %133 = vector.load %arg18[%c1_95, %c0_96, %c0_97] : memref<3x32x32xf32, #tpu.memory_space<vmem>>, vector<1x32x32xf32>
    %134 = vector.shape_cast %133 : vector<1x32x32xf32> to vector<32x32xf32>
    %cst_98 = arith.constant dense<0.000000e+00> : vector<8x32xf32>
    %135 = tpu.matmul %123, %134, %cst_98 {dimension_numbers = #tpu.dot_dimension_numbers<[1], [0], [0], [1], [0, 0, 1, 1], [], []>} : vector<8x32xf32>, vector<32x32xf32>, vector<8x32xf32> -> vector<8x32xf32>
    %c1_99 = arith.constant 1 : index
    %c0_100 = arith.constant 0 : index
    %c0_101 = arith.constant 0 : index
    %136 = vector.load %arg19[%c1_99, %c0_100, %c0_101] : memref<3x1x32xf32, #tpu.memory_space<vmem>>, vector<1x1x32xf32>
    %137 = vector.shape_cast %136 : vector<1x1x32xf32> to vector<1x32xf32>
    %138 = vector.broadcast %137 : vector<1x32xf32> to vector<8x32xf32>
    %139 = arith.addf %135, %138 : vector<8x32xf32>
    %140 = vector.broadcast %11 : vector<8x1xf32> to vector<8x32xf32>
    %141 = arith.mulf %139, %140 : vector<8x32xf32>
    %c2_102 = arith.constant 2 : index
    %c0_103 = arith.constant 0 : index
    %c0_104 = arith.constant 0 : index
    %142 = vector.load %arg18[%c2_102, %c0_103, %c0_104] : memref<3x32x32xf32, #tpu.memory_space<vmem>>, vector<1x32x32xf32>
    %143 = vector.shape_cast %142 : vector<1x32x32xf32> to vector<32x32xf32>
    %cst_105 = arith.constant dense<0.000000e+00> : vector<8x32xf32>
    %144 = tpu.matmul %123, %143, %cst_105 {dimension_numbers = #tpu.dot_dimension_numbers<[1], [0], [0], [1], [0, 0, 1, 1], [], []>} : vector<8x32xf32>, vector<32x32xf32>, vector<8x32xf32> -> vector<8x32xf32>
    %c2_106 = arith.constant 2 : index
    %c0_107 = arith.constant 0 : index
    %c0_108 = arith.constant 0 : index
    %145 = vector.load %arg19[%c2_106, %c0_107, %c0_108] : memref<3x1x32xf32, #tpu.memory_space<vmem>>, vector<1x1x32xf32>
    %146 = vector.shape_cast %145 : vector<1x1x32xf32> to vector<1x32xf32>
    %147 = vector.broadcast %146 : vector<1x32xf32> to vector<8x32xf32>
    %148 = arith.addf %144, %147 : vector<8x32xf32>
    %149 = vector.broadcast %11 : vector<8x1xf32> to vector<8x32xf32>
    %150 = arith.mulf %148, %149 : vector<8x32xf32>
    %c0_109 = arith.constant 0 : index
    %c0_110 = arith.constant 0 : index
    %c0_111 = arith.constant 0 : index
    %151 = vector.load %arg20[%c0_109, %c0_110, %c0_111] : memref<2x1x32xf32, #tpu.memory_space<vmem>>, vector<1x1x32xf32>
    %152 = vector.shape_cast %151 : vector<1x1x32xf32> to vector<1x32xf32>
    %153 = tpu.concatenate %152, %74 in 0 : vector<1x32xf32>, vector<8x32xf32> -> vector<9x32xf32>
    %c1_112 = arith.constant 1 : index
    %c0_113 = arith.constant 0 : index
    %c0_114 = arith.constant 0 : index
    %154 = vector.load %arg20[%c1_112, %c0_113, %c0_114] : memref<2x1x32xf32, #tpu.memory_space<vmem>>, vector<1x1x32xf32>
    %155 = vector.shape_cast %154 : vector<1x1x32xf32> to vector<1x32xf32>
    %156 = tpu.concatenate %155, %92 in 0 : vector<1x32xf32>, vector<8x32xf32> -> vector<9x32xf32>
    %c0_115 = arith.constant 0 : index
    %c0_116 = arith.constant 0 : index
    %c0_117 = arith.constant 0 : index
    %157 = vector.load %arg21[%c0_115, %c0_116, %c0_117] : memref<2x1x32xf32, #tpu.memory_space<vmem>>, vector<1x1x32xf32>
    %158 = vector.shape_cast %157 : vector<1x1x32xf32> to vector<1x32xf32>
    %159 = tpu.concatenate %158, %132 in 0 : vector<1x32xf32>, vector<8x32xf32> -> vector<9x32xf32>
    %c1_118 = arith.constant 1 : index
    %c0_119 = arith.constant 0 : index
    %c0_120 = arith.constant 0 : index
    %160 = vector.load %arg21[%c1_118, %c0_119, %c0_120] : memref<2x1x32xf32, #tpu.memory_space<vmem>>, vector<1x1x32xf32>
    %161 = vector.shape_cast %160 : vector<1x1x32xf32> to vector<1x32xf32>
    %162 = tpu.concatenate %161, %150 in 0 : vector<1x32xf32>, vector<8x32xf32> -> vector<9x32xf32>
    %163 = vector.broadcast %61 : vector<1x32xf32> to vector<8x32xf32>
    %164 = arith.mulf %163, %83 : vector<8x32xf32>
    %165 = vector.broadcast %61 : vector<1x32xf32> to vector<9x32xf32>
    %166 = arith.mulf %165, %153 : vector<9x32xf32>
    %167 = tpu.transpose %166, [1, 0] : vector<9x32xf32> -> vector<32x9xf32>
    %168 = vector.extract_strided_slice %164 {offsets = [0, 0], sizes = [8, 8], strides = [1, 1]} : vector<8x32xf32> to vector<8x8xf32>
    %169 = vector.extract_strided_slice %167 {offsets = [0, 0], sizes = [8, 9], strides = [1, 1]} : vector<32x9xf32> to vector<8x9xf32>
    %170 = vector.extract_strided_slice %156 {offsets = [0, 0], sizes = [9, 8], strides = [1, 1]} : vector<9x32xf32> to vector<9x8xf32>
    %cst_121 = arith.constant dense<0.000000e+00> : vector<8x9xf32>
    %171 = tpu.matmul %168, %169, %cst_121 {dimension_numbers = #tpu.dot_dimension_numbers<[1], [0], [0], [1], [0, 0, 1, 1], [], []>} : vector<8x8xf32>, vector<8x9xf32>, vector<8x9xf32> -> vector<8x9xf32>
    %cst_122 = arith.constant 0.000000e+00 : f32
    %172 = vector.broadcast %cst_122 : f32 to vector<1x9xf32>
    %173 = arith.cmpf ogt, %13, %172 : vector<1x9xf32>
    %cst_123 = arith.constant -1.000000e+09 : f32
    %174 = vector.shape_cast %173 : vector<1x9xi1> to vector<1x9xi1>
    %175 = vector.broadcast %174 : vector<1x9xi1> to vector<8x9xi1>
    %176 = vector.broadcast %cst_123 : f32 to vector<8x9xf32>
    %177 = arith.select %175, %171, %176 : vector<8x9xi1>, vector<8x9xf32>
    %cst_124 = arith.constant 0.353553385 : f32
    %178 = vector.broadcast %cst_124 : f32 to vector<8x9xf32>
    %179 = arith.mulf %177, %178 : vector<8x9xf32>
    %cst_125 = arith.constant dense<0xFF800000> : vector<8xf32>
    %180 = vector.multi_reduction <maximumf>, %179, %cst_125 [1] : vector<8x9xf32> to vector<8xf32>
    %181 = vector.shape_cast %180 : vector<8xf32> to vector<8x1xf32>
    %182 = vector.broadcast %181 : vector<8x1xf32> to vector<8x9xf32>
    %183 = arith.subf %179, %182 : vector<8x9xf32>
    %184 = math.exp %183 : vector<8x9xf32>
    %cst_126 = arith.constant dense<0.000000e+00> : vector<8xf32>
    %185 = vector.multi_reduction <add>, %184, %cst_126 [1] : vector<8x9xf32> to vector<8xf32>
    %186 = vector.shape_cast %185 : vector<8xf32> to vector<8x1xf32>
    %187 = vector.broadcast %186 : vector<8x1xf32> to vector<8x9xf32>
    %188 = arith.divf %184, %187 : vector<8x9xf32>
    %cst_127 = arith.constant dense<0.000000e+00> : vector<8x8xf32>
    %189 = tpu.matmul %188, %170, %cst_127 {dimension_numbers = #tpu.dot_dimension_numbers<[1], [0], [0], [1], [0, 0, 1, 1], [], []>} : vector<8x9xf32>, vector<9x8xf32>, vector<8x8xf32> -> vector<8x8xf32>
    %190 = vector.extract_strided_slice %164 {offsets = [0, 8], sizes = [8, 8], strides = [1, 1]} : vector<8x32xf32> to vector<8x8xf32>
    %191 = vector.extract_strided_slice %167 {offsets = [8, 0], sizes = [8, 9], strides = [1, 1]} : vector<32x9xf32> to vector<8x9xf32>
    %192 = vector.extract_strided_slice %156 {offsets = [0, 8], sizes = [9, 8], strides = [1, 1]} : vector<9x32xf32> to vector<9x8xf32>
    %cst_128 = arith.constant dense<0.000000e+00> : vector<8x9xf32>
    %193 = tpu.matmul %190, %191, %cst_128 {dimension_numbers = #tpu.dot_dimension_numbers<[1], [0], [0], [1], [0, 0, 1, 1], [], []>} : vector<8x8xf32>, vector<8x9xf32>, vector<8x9xf32> -> vector<8x9xf32>
    %cst_129 = arith.constant 0.000000e+00 : f32
    %194 = vector.broadcast %cst_129 : f32 to vector<1x9xf32>
    %195 = arith.cmpf ogt, %13, %194 : vector<1x9xf32>
    %cst_130 = arith.constant -1.000000e+09 : f32
    %196 = vector.shape_cast %195 : vector<1x9xi1> to vector<1x9xi1>
    %197 = vector.broadcast %196 : vector<1x9xi1> to vector<8x9xi1>
    %198 = vector.broadcast %cst_130 : f32 to vector<8x9xf32>
    %199 = arith.select %197, %193, %198 : vector<8x9xi1>, vector<8x9xf32>
    %cst_131 = arith.constant 0.353553385 : f32
    %200 = vector.broadcast %cst_131 : f32 to vector<8x9xf32>
    %201 = arith.mulf %199, %200 : vector<8x9xf32>
    %cst_132 = arith.constant dense<0xFF800000> : vector<8xf32>
    %202 = vector.multi_reduction <maximumf>, %201, %cst_132 [1] : vector<8x9xf32> to vector<8xf32>
    %203 = vector.shape_cast %202 : vector<8xf32> to vector<8x1xf32>
    %204 = vector.broadcast %203 : vector<8x1xf32> to vector<8x9xf32>
    %205 = arith.subf %201, %204 : vector<8x9xf32>
    %206 = math.exp %205 : vector<8x9xf32>
    %cst_133 = arith.constant dense<0.000000e+00> : vector<8xf32>
    %207 = vector.multi_reduction <add>, %206, %cst_133 [1] : vector<8x9xf32> to vector<8xf32>
    %208 = vector.shape_cast %207 : vector<8xf32> to vector<8x1xf32>
    %209 = vector.broadcast %208 : vector<8x1xf32> to vector<8x9xf32>
    %210 = arith.divf %206, %209 : vector<8x9xf32>
    %cst_134 = arith.constant dense<0.000000e+00> : vector<8x8xf32>
    %211 = tpu.matmul %210, %192, %cst_134 {dimension_numbers = #tpu.dot_dimension_numbers<[1], [0], [0], [1], [0, 0, 1, 1], [], []>} : vector<8x9xf32>, vector<9x8xf32>, vector<8x8xf32> -> vector<8x8xf32>
    %212 = vector.extract_strided_slice %164 {offsets = [0, 16], sizes = [8, 8], strides = [1, 1]} : vector<8x32xf32> to vector<8x8xf32>
    %213 = vector.extract_strided_slice %167 {offsets = [16, 0], sizes = [8, 9], strides = [1, 1]} : vector<32x9xf32> to vector<8x9xf32>
    %214 = vector.extract_strided_slice %156 {offsets = [0, 16], sizes = [9, 8], strides = [1, 1]} : vector<9x32xf32> to vector<9x8xf32>
    %cst_135 = arith.constant dense<0.000000e+00> : vector<8x9xf32>
    %215 = tpu.matmul %212, %213, %cst_135 {dimension_numbers = #tpu.dot_dimension_numbers<[1], [0], [0], [1], [0, 0, 1, 1], [], []>} : vector<8x8xf32>, vector<8x9xf32>, vector<8x9xf32> -> vector<8x9xf32>
    %cst_136 = arith.constant 0.000000e+00 : f32
    %216 = vector.broadcast %cst_136 : f32 to vector<1x9xf32>
    %217 = arith.cmpf ogt, %13, %216 : vector<1x9xf32>
    %cst_137 = arith.constant -1.000000e+09 : f32
    %218 = vector.shape_cast %217 : vector<1x9xi1> to vector<1x9xi1>
    %219 = vector.broadcast %218 : vector<1x9xi1> to vector<8x9xi1>
    %220 = vector.broadcast %cst_137 : f32 to vector<8x9xf32>
    %221 = arith.select %219, %215, %220 : vector<8x9xi1>, vector<8x9xf32>
    %cst_138 = arith.constant 0.353553385 : f32
    %222 = vector.broadcast %cst_138 : f32 to vector<8x9xf32>
    %223 = arith.mulf %221, %222 : vector<8x9xf32>
    %cst_139 = arith.constant dense<0xFF800000> : vector<8xf32>
    %224 = vector.multi_reduction <maximumf>, %223, %cst_139 [1] : vector<8x9xf32> to vector<8xf32>
    %225 = vector.shape_cast %224 : vector<8xf32> to vector<8x1xf32>
    %226 = vector.broadcast %225 : vector<8x1xf32> to vector<8x9xf32>
    %227 = arith.subf %223, %226 : vector<8x9xf32>
    %228 = math.exp %227 : vector<8x9xf32>
    %cst_140 = arith.constant dense<0.000000e+00> : vector<8xf32>
    %229 = vector.multi_reduction <add>, %228, %cst_140 [1] : vector<8x9xf32> to vector<8xf32>
    %230 = vector.shape_cast %229 : vector<8xf32> to vector<8x1xf32>
    %231 = vector.broadcast %230 : vector<8x1xf32> to vector<8x9xf32>
    %232 = arith.divf %228, %231 : vector<8x9xf32>
    %cst_141 = arith.constant dense<0.000000e+00> : vector<8x8xf32>
    %233 = tpu.matmul %232, %214, %cst_141 {dimension_numbers = #tpu.dot_dimension_numbers<[1], [0], [0], [1], [0, 0, 1, 1], [], []>} : vector<8x9xf32>, vector<9x8xf32>, vector<8x8xf32> -> vector<8x8xf32>
    %234 = vector.extract_strided_slice %164 {offsets = [0, 24], sizes = [8, 8], strides = [1, 1]} : vector<8x32xf32> to vector<8x8xf32>
    %235 = vector.extract_strided_slice %167 {offsets = [24, 0], sizes = [8, 9], strides = [1, 1]} : vector<32x9xf32> to vector<8x9xf32>
    %236 = vector.extract_strided_slice %156 {offsets = [0, 24], sizes = [9, 8], strides = [1, 1]} : vector<9x32xf32> to vector<9x8xf32>
    %cst_142 = arith.constant dense<0.000000e+00> : vector<8x9xf32>
    %237 = tpu.matmul %234, %235, %cst_142 {dimension_numbers = #tpu.dot_dimension_numbers<[1], [0], [0], [1], [0, 0, 1, 1], [], []>} : vector<8x8xf32>, vector<8x9xf32>, vector<8x9xf32> -> vector<8x9xf32>
    %cst_143 = arith.constant 0.000000e+00 : f32
    %238 = vector.broadcast %cst_143 : f32 to vector<1x9xf32>
    %239 = arith.cmpf ogt, %13, %238 : vector<1x9xf32>
    %cst_144 = arith.constant -1.000000e+09 : f32
    %240 = vector.shape_cast %239 : vector<1x9xi1> to vector<1x9xi1>
    %241 = vector.broadcast %240 : vector<1x9xi1> to vector<8x9xi1>
    %242 = vector.broadcast %cst_144 : f32 to vector<8x9xf32>
    %243 = arith.select %241, %237, %242 : vector<8x9xi1>, vector<8x9xf32>
    %cst_145 = arith.constant 0.353553385 : f32
    %244 = vector.broadcast %cst_145 : f32 to vector<8x9xf32>
    %245 = arith.mulf %243, %244 : vector<8x9xf32>
    %cst_146 = arith.constant dense<0xFF800000> : vector<8xf32>
    %246 = vector.multi_reduction <maximumf>, %245, %cst_146 [1] : vector<8x9xf32> to vector<8xf32>
    %247 = vector.shape_cast %246 : vector<8xf32> to vector<8x1xf32>
    %248 = vector.broadcast %247 : vector<8x1xf32> to vector<8x9xf32>
    %249 = arith.subf %245, %248 : vector<8x9xf32>
    %250 = math.exp %249 : vector<8x9xf32>
    %cst_147 = arith.constant dense<0.000000e+00> : vector<8xf32>
    %251 = vector.multi_reduction <add>, %250, %cst_147 [1] : vector<8x9xf32> to vector<8xf32>
    %252 = vector.shape_cast %251 : vector<8xf32> to vector<8x1xf32>
    %253 = vector.broadcast %252 : vector<8x1xf32> to vector<8x9xf32>
    %254 = arith.divf %250, %253 : vector<8x9xf32>
    %cst_148 = arith.constant dense<0.000000e+00> : vector<8x8xf32>
    %255 = tpu.matmul %254, %236, %cst_148 {dimension_numbers = #tpu.dot_dimension_numbers<[1], [0], [0], [1], [0, 0, 1, 1], [], []>} : vector<8x9xf32>, vector<9x8xf32>, vector<8x8xf32> -> vector<8x8xf32>
    %256 = tpu.concatenate %189, %211, %233, %255 in 1 : vector<8x8xf32>, vector<8x8xf32>, vector<8x8xf32>, vector<8x8xf32> -> vector<8x32xf32>
    %257 = vector.broadcast %63 : vector<1x32xf32> to vector<8x32xf32>
    %258 = arith.mulf %257, %112 : vector<8x32xf32>
    %259 = vector.broadcast %63 : vector<1x32xf32> to vector<8x32xf32>
    %260 = arith.mulf %259, %103 : vector<8x32xf32>
    %261 = tpu.transpose %260, [1, 0] : vector<8x32xf32> -> vector<32x8xf32>
    %262 = vector.extract_strided_slice %258 {offsets = [0, 0], sizes = [8, 8], strides = [1, 1]} : vector<8x32xf32> to vector<8x8xf32>
    %263 = vector.extract_strided_slice %261 {offsets = [0, 0], sizes = [8, 8], strides = [1, 1]} : vector<32x8xf32> to vector<8x8xf32>
    %264 = vector.extract_strided_slice %121 {offsets = [0, 0], sizes = [8, 8], strides = [1, 1]} : vector<8x32xf32> to vector<8x8xf32>
    %cst_149 = arith.constant dense<0.000000e+00> : vector<8x8xf32>
    %265 = tpu.matmul %262, %263, %cst_149 {dimension_numbers = #tpu.dot_dimension_numbers<[1], [0], [0], [1], [0, 0, 1, 1], [], []>} : vector<8x8xf32>, vector<8x8xf32>, vector<8x8xf32> -> vector<8x8xf32>
    %cst_150 = arith.constant 0.000000e+00 : f32
    %266 = vector.broadcast %cst_150 : f32 to vector<1x8xf32>
    %267 = arith.cmpf ogt, %15, %266 : vector<1x8xf32>
    %cst_151 = arith.constant -1.000000e+09 : f32
    %268 = vector.shape_cast %267 : vector<1x8xi1> to vector<1x8xi1>
    %269 = vector.broadcast %268 : vector<1x8xi1> to vector<8x8xi1>
    %270 = vector.broadcast %cst_151 : f32 to vector<8x8xf32>
    %271 = arith.select %269, %265, %270 : vector<8x8xi1>, vector<8x8xf32>
    %cst_152 = arith.constant 0.353553385 : f32
    %272 = vector.broadcast %cst_152 : f32 to vector<8x8xf32>
    %273 = arith.mulf %271, %272 : vector<8x8xf32>
    %cst_153 = arith.constant dense<0xFF800000> : vector<8xf32>
    %274 = vector.multi_reduction <maximumf>, %273, %cst_153 [1] : vector<8x8xf32> to vector<8xf32>
    %275 = vector.shape_cast %274 : vector<8xf32> to vector<8x1xf32>
    %276 = vector.broadcast %275 : vector<8x1xf32> to vector<8x8xf32>
    %277 = arith.subf %273, %276 : vector<8x8xf32>
    %278 = math.exp %277 : vector<8x8xf32>
    %cst_154 = arith.constant dense<0.000000e+00> : vector<8xf32>
    %279 = vector.multi_reduction <add>, %278, %cst_154 [1] : vector<8x8xf32> to vector<8xf32>
    %280 = vector.shape_cast %279 : vector<8xf32> to vector<8x1xf32>
    %281 = vector.broadcast %280 : vector<8x1xf32> to vector<8x8xf32>
    %282 = arith.divf %278, %281 : vector<8x8xf32>
    %cst_155 = arith.constant dense<0.000000e+00> : vector<8x8xf32>
    %283 = tpu.matmul %282, %264, %cst_155 {dimension_numbers = #tpu.dot_dimension_numbers<[1], [0], [0], [1], [0, 0, 1, 1], [], []>} : vector<8x8xf32>, vector<8x8xf32>, vector<8x8xf32> -> vector<8x8xf32>
    %284 = vector.extract_strided_slice %258 {offsets = [0, 8], sizes = [8, 8], strides = [1, 1]} : vector<8x32xf32> to vector<8x8xf32>
    %285 = vector.extract_strided_slice %261 {offsets = [8, 0], sizes = [8, 8], strides = [1, 1]} : vector<32x8xf32> to vector<8x8xf32>
    %286 = vector.extract_strided_slice %121 {offsets = [0, 8], sizes = [8, 8], strides = [1, 1]} : vector<8x32xf32> to vector<8x8xf32>
    %cst_156 = arith.constant dense<0.000000e+00> : vector<8x8xf32>
    %287 = tpu.matmul %284, %285, %cst_156 {dimension_numbers = #tpu.dot_dimension_numbers<[1], [0], [0], [1], [0, 0, 1, 1], [], []>} : vector<8x8xf32>, vector<8x8xf32>, vector<8x8xf32> -> vector<8x8xf32>
    %cst_157 = arith.constant 0.000000e+00 : f32
    %288 = vector.broadcast %cst_157 : f32 to vector<1x8xf32>
    %289 = arith.cmpf ogt, %15, %288 : vector<1x8xf32>
    %cst_158 = arith.constant -1.000000e+09 : f32
    %290 = vector.shape_cast %289 : vector<1x8xi1> to vector<1x8xi1>
    %291 = vector.broadcast %290 : vector<1x8xi1> to vector<8x8xi1>
    %292 = vector.broadcast %cst_158 : f32 to vector<8x8xf32>
    %293 = arith.select %291, %287, %292 : vector<8x8xi1>, vector<8x8xf32>
    %cst_159 = arith.constant 0.353553385 : f32
    %294 = vector.broadcast %cst_159 : f32 to vector<8x8xf32>
    %295 = arith.mulf %293, %294 : vector<8x8xf32>
    %cst_160 = arith.constant dense<0xFF800000> : vector<8xf32>
    %296 = vector.multi_reduction <maximumf>, %295, %cst_160 [1] : vector<8x8xf32> to vector<8xf32>
    %297 = vector.shape_cast %296 : vector<8xf32> to vector<8x1xf32>
    %298 = vector.broadcast %297 : vector<8x1xf32> to vector<8x8xf32>
    %299 = arith.subf %295, %298 : vector<8x8xf32>
    %300 = math.exp %299 : vector<8x8xf32>
    %cst_161 = arith.constant dense<0.000000e+00> : vector<8xf32>
    %301 = vector.multi_reduction <add>, %300, %cst_161 [1] : vector<8x8xf32> to vector<8xf32>
    %302 = vector.shape_cast %301 : vector<8xf32> to vector<8x1xf32>
    %303 = vector.broadcast %302 : vector<8x1xf32> to vector<8x8xf32>
    %304 = arith.divf %300, %303 : vector<8x8xf32>
    %cst_162 = arith.constant dense<0.000000e+00> : vector<8x8xf32>
    %305 = tpu.matmul %304, %286, %cst_162 {dimension_numbers = #tpu.dot_dimension_numbers<[1], [0], [0], [1], [0, 0, 1, 1], [], []>} : vector<8x8xf32>, vector<8x8xf32>, vector<8x8xf32> -> vector<8x8xf32>
    %306 = vector.extract_strided_slice %258 {offsets = [0, 16], sizes = [8, 8], strides = [1, 1]} : vector<8x32xf32> to vector<8x8xf32>
    %307 = vector.extract_strided_slice %261 {offsets = [16, 0], sizes = [8, 8], strides = [1, 1]} : vector<32x8xf32> to vector<8x8xf32>
    %308 = vector.extract_strided_slice %121 {offsets = [0, 16], sizes = [8, 8], strides = [1, 1]} : vector<8x32xf32> to vector<8x8xf32>
    %cst_163 = arith.constant dense<0.000000e+00> : vector<8x8xf32>
    %309 = tpu.matmul %306, %307, %cst_163 {dimension_numbers = #tpu.dot_dimension_numbers<[1], [0], [0], [1], [0, 0, 1, 1], [], []>} : vector<8x8xf32>, vector<8x8xf32>, vector<8x8xf32> -> vector<8x8xf32>
    %cst_164 = arith.constant 0.000000e+00 : f32
    %310 = vector.broadcast %cst_164 : f32 to vector<1x8xf32>
    %311 = arith.cmpf ogt, %15, %310 : vector<1x8xf32>
    %cst_165 = arith.constant -1.000000e+09 : f32
    %312 = vector.shape_cast %311 : vector<1x8xi1> to vector<1x8xi1>
    %313 = vector.broadcast %312 : vector<1x8xi1> to vector<8x8xi1>
    %314 = vector.broadcast %cst_165 : f32 to vector<8x8xf32>
    %315 = arith.select %313, %309, %314 : vector<8x8xi1>, vector<8x8xf32>
    %cst_166 = arith.constant 0.353553385 : f32
    %316 = vector.broadcast %cst_166 : f32 to vector<8x8xf32>
    %317 = arith.mulf %315, %316 : vector<8x8xf32>
    %cst_167 = arith.constant dense<0xFF800000> : vector<8xf32>
    %318 = vector.multi_reduction <maximumf>, %317, %cst_167 [1] : vector<8x8xf32> to vector<8xf32>
    %319 = vector.shape_cast %318 : vector<8xf32> to vector<8x1xf32>
    %320 = vector.broadcast %319 : vector<8x1xf32> to vector<8x8xf32>
    %321 = arith.subf %317, %320 : vector<8x8xf32>
    %322 = math.exp %321 : vector<8x8xf32>
    %cst_168 = arith.constant dense<0.000000e+00> : vector<8xf32>
    %323 = vector.multi_reduction <add>, %322, %cst_168 [1] : vector<8x8xf32> to vector<8xf32>
    %324 = vector.shape_cast %323 : vector<8xf32> to vector<8x1xf32>
    %325 = vector.broadcast %324 : vector<8x1xf32> to vector<8x8xf32>
    %326 = arith.divf %322, %325 : vector<8x8xf32>
    %cst_169 = arith.constant dense<0.000000e+00> : vector<8x8xf32>
    %327 = tpu.matmul %326, %308, %cst_169 {dimension_numbers = #tpu.dot_dimension_numbers<[1], [0], [0], [1], [0, 0, 1, 1], [], []>} : vector<8x8xf32>, vector<8x8xf32>, vector<8x8xf32> -> vector<8x8xf32>
    %328 = vector.extract_strided_slice %258 {offsets = [0, 24], sizes = [8, 8], strides = [1, 1]} : vector<8x32xf32> to vector<8x8xf32>
    %329 = vector.extract_strided_slice %261 {offsets = [24, 0], sizes = [8, 8], strides = [1, 1]} : vector<32x8xf32> to vector<8x8xf32>
    %330 = vector.extract_strided_slice %121 {offsets = [0, 24], sizes = [8, 8], strides = [1, 1]} : vector<8x32xf32> to vector<8x8xf32>
    %cst_170 = arith.constant dense<0.000000e+00> : vector<8x8xf32>
    %331 = tpu.matmul %328, %329, %cst_170 {dimension_numbers = #tpu.dot_dimension_numbers<[1], [0], [0], [1], [0, 0, 1, 1], [], []>} : vector<8x8xf32>, vector<8x8xf32>, vector<8x8xf32> -> vector<8x8xf32>
    %cst_171 = arith.constant 0.000000e+00 : f32
    %332 = vector.broadcast %cst_171 : f32 to vector<1x8xf32>
    %333 = arith.cmpf ogt, %15, %332 : vector<1x8xf32>
    %cst_172 = arith.constant -1.000000e+09 : f32
    %334 = vector.shape_cast %333 : vector<1x8xi1> to vector<1x8xi1>
    %335 = vector.broadcast %334 : vector<1x8xi1> to vector<8x8xi1>
    %336 = vector.broadcast %cst_172 : f32 to vector<8x8xf32>
    %337 = arith.select %335, %331, %336 : vector<8x8xi1>, vector<8x8xf32>
    %cst_173 = arith.constant 0.353553385 : f32
    %338 = vector.broadcast %cst_173 : f32 to vector<8x8xf32>
    %339 = arith.mulf %337, %338 : vector<8x8xf32>
    %cst_174 = arith.constant dense<0xFF800000> : vector<8xf32>
    %340 = vector.multi_reduction <maximumf>, %339, %cst_174 [1] : vector<8x8xf32> to vector<8xf32>
    %341 = vector.shape_cast %340 : vector<8xf32> to vector<8x1xf32>
    %342 = vector.broadcast %341 : vector<8x1xf32> to vector<8x8xf32>
    %343 = arith.subf %339, %342 : vector<8x8xf32>
    %344 = math.exp %343 : vector<8x8xf32>
    %cst_175 = arith.constant dense<0.000000e+00> : vector<8xf32>
    %345 = vector.multi_reduction <add>, %344, %cst_175 [1] : vector<8x8xf32> to vector<8xf32>
    %346 = vector.shape_cast %345 : vector<8xf32> to vector<8x1xf32>
    %347 = vector.broadcast %346 : vector<8x1xf32> to vector<8x8xf32>
    %348 = arith.divf %344, %347 : vector<8x8xf32>
    %cst_176 = arith.constant dense<0.000000e+00> : vector<8x8xf32>
    %349 = tpu.matmul %348, %330, %cst_176 {dimension_numbers = #tpu.dot_dimension_numbers<[1], [0], [0], [1], [0, 0, 1, 1], [], []>} : vector<8x8xf32>, vector<8x8xf32>, vector<8x8xf32> -> vector<8x8xf32>
    %350 = tpu.concatenate %283, %305, %327, %349 in 1 : vector<8x8xf32>, vector<8x8xf32>, vector<8x8xf32>, vector<8x8xf32> -> vector<8x32xf32>
    %351 = tpu.transpose %159, [1, 0] : vector<9x32xf32> -> vector<32x9xf32>
    %352 = vector.extract_strided_slice %141 {offsets = [0, 0], sizes = [8, 8], strides = [1, 1]} : vector<8x32xf32> to vector<8x8xf32>
    %353 = vector.extract_strided_slice %351 {offsets = [0, 0], sizes = [8, 9], strides = [1, 1]} : vector<32x9xf32> to vector<8x9xf32>
    %354 = vector.extract_strided_slice %162 {offsets = [0, 0], sizes = [9, 8], strides = [1, 1]} : vector<9x32xf32> to vector<9x8xf32>
    %cst_177 = arith.constant dense<0.000000e+00> : vector<8x9xf32>
    %355 = tpu.matmul %352, %353, %cst_177 {dimension_numbers = #tpu.dot_dimension_numbers<[1], [0], [0], [1], [0, 0, 1, 1], [], []>} : vector<8x8xf32>, vector<8x9xf32>, vector<8x9xf32> -> vector<8x9xf32>
    %cst_178 = arith.constant 0.000000e+00 : f32
    %356 = vector.broadcast %cst_178 : f32 to vector<1x9xf32>
    %357 = arith.cmpf ogt, %17, %356 : vector<1x9xf32>
    %cst_179 = arith.constant -1.000000e+09 : f32
    %358 = vector.shape_cast %357 : vector<1x9xi1> to vector<1x9xi1>
    %359 = vector.broadcast %358 : vector<1x9xi1> to vector<8x9xi1>
    %360 = vector.broadcast %cst_179 : f32 to vector<8x9xf32>
    %361 = arith.select %359, %355, %360 : vector<8x9xi1>, vector<8x9xf32>
    %cst_180 = arith.constant 0.353553385 : f32
    %362 = vector.broadcast %cst_180 : f32 to vector<8x9xf32>
    %363 = arith.mulf %361, %362 : vector<8x9xf32>
    %cst_181 = arith.constant dense<0xFF800000> : vector<8xf32>
    %364 = vector.multi_reduction <maximumf>, %363, %cst_181 [1] : vector<8x9xf32> to vector<8xf32>
    %365 = vector.shape_cast %364 : vector<8xf32> to vector<8x1xf32>
    %366 = vector.broadcast %365 : vector<8x1xf32> to vector<8x9xf32>
    %367 = arith.subf %363, %366 : vector<8x9xf32>
    %368 = math.exp %367 : vector<8x9xf32>
    %cst_182 = arith.constant dense<0.000000e+00> : vector<8xf32>
    %369 = vector.multi_reduction <add>, %368, %cst_182 [1] : vector<8x9xf32> to vector<8xf32>
    %370 = vector.shape_cast %369 : vector<8xf32> to vector<8x1xf32>
    %371 = vector.broadcast %370 : vector<8x1xf32> to vector<8x9xf32>
    %372 = arith.divf %368, %371 : vector<8x9xf32>
    %cst_183 = arith.constant dense<0.000000e+00> : vector<8x8xf32>
    %373 = tpu.matmul %372, %354, %cst_183 {dimension_numbers = #tpu.dot_dimension_numbers<[1], [0], [0], [1], [0, 0, 1, 1], [], []>} : vector<8x9xf32>, vector<9x8xf32>, vector<8x8xf32> -> vector<8x8xf32>
    %374 = vector.extract_strided_slice %141 {offsets = [0, 8], sizes = [8, 8], strides = [1, 1]} : vector<8x32xf32> to vector<8x8xf32>
    %375 = vector.extract_strided_slice %351 {offsets = [8, 0], sizes = [8, 9], strides = [1, 1]} : vector<32x9xf32> to vector<8x9xf32>
    %376 = vector.extract_strided_slice %162 {offsets = [0, 8], sizes = [9, 8], strides = [1, 1]} : vector<9x32xf32> to vector<9x8xf32>
    %cst_184 = arith.constant dense<0.000000e+00> : vector<8x9xf32>
    %377 = tpu.matmul %374, %375, %cst_184 {dimension_numbers = #tpu.dot_dimension_numbers<[1], [0], [0], [1], [0, 0, 1, 1], [], []>} : vector<8x8xf32>, vector<8x9xf32>, vector<8x9xf32> -> vector<8x9xf32>
    %cst_185 = arith.constant 0.000000e+00 : f32
    %378 = vector.broadcast %cst_185 : f32 to vector<1x9xf32>
    %379 = arith.cmpf ogt, %17, %378 : vector<1x9xf32>
    %cst_186 = arith.constant -1.000000e+09 : f32
    %380 = vector.shape_cast %379 : vector<1x9xi1> to vector<1x9xi1>
    %381 = vector.broadcast %380 : vector<1x9xi1> to vector<8x9xi1>
    %382 = vector.broadcast %cst_186 : f32 to vector<8x9xf32>
    %383 = arith.select %381, %377, %382 : vector<8x9xi1>, vector<8x9xf32>
    %cst_187 = arith.constant 0.353553385 : f32
    %384 = vector.broadcast %cst_187 : f32 to vector<8x9xf32>
    %385 = arith.mulf %383, %384 : vector<8x9xf32>
    %cst_188 = arith.constant dense<0xFF800000> : vector<8xf32>
    %386 = vector.multi_reduction <maximumf>, %385, %cst_188 [1] : vector<8x9xf32> to vector<8xf32>
    %387 = vector.shape_cast %386 : vector<8xf32> to vector<8x1xf32>
    %388 = vector.broadcast %387 : vector<8x1xf32> to vector<8x9xf32>
    %389 = arith.subf %385, %388 : vector<8x9xf32>
    %390 = math.exp %389 : vector<8x9xf32>
    %cst_189 = arith.constant dense<0.000000e+00> : vector<8xf32>
    %391 = vector.multi_reduction <add>, %390, %cst_189 [1] : vector<8x9xf32> to vector<8xf32>
    %392 = vector.shape_cast %391 : vector<8xf32> to vector<8x1xf32>
    %393 = vector.broadcast %392 : vector<8x1xf32> to vector<8x9xf32>
    %394 = arith.divf %390, %393 : vector<8x9xf32>
    %cst_190 = arith.constant dense<0.000000e+00> : vector<8x8xf32>
    %395 = tpu.matmul %394, %376, %cst_190 {dimension_numbers = #tpu.dot_dimension_numbers<[1], [0], [0], [1], [0, 0, 1, 1], [], []>} : vector<8x9xf32>, vector<9x8xf32>, vector<8x8xf32> -> vector<8x8xf32>
    %396 = vector.extract_strided_slice %141 {offsets = [0, 16], sizes = [8, 8], strides = [1, 1]} : vector<8x32xf32> to vector<8x8xf32>
    %397 = vector.extract_strided_slice %351 {offsets = [16, 0], sizes = [8, 9], strides = [1, 1]} : vector<32x9xf32> to vector<8x9xf32>
    %398 = vector.extract_strided_slice %162 {offsets = [0, 16], sizes = [9, 8], strides = [1, 1]} : vector<9x32xf32> to vector<9x8xf32>
    %cst_191 = arith.constant dense<0.000000e+00> : vector<8x9xf32>
    %399 = tpu.matmul %396, %397, %cst_191 {dimension_numbers = #tpu.dot_dimension_numbers<[1], [0], [0], [1], [0, 0, 1, 1], [], []>} : vector<8x8xf32>, vector<8x9xf32>, vector<8x9xf32> -> vector<8x9xf32>
    %cst_192 = arith.constant 0.000000e+00 : f32
    %400 = vector.broadcast %cst_192 : f32 to vector<1x9xf32>
    %401 = arith.cmpf ogt, %17, %400 : vector<1x9xf32>
    %cst_193 = arith.constant -1.000000e+09 : f32
    %402 = vector.shape_cast %401 : vector<1x9xi1> to vector<1x9xi1>
    %403 = vector.broadcast %402 : vector<1x9xi1> to vector<8x9xi1>
    %404 = vector.broadcast %cst_193 : f32 to vector<8x9xf32>
    %405 = arith.select %403, %399, %404 : vector<8x9xi1>, vector<8x9xf32>
    %cst_194 = arith.constant 0.353553385 : f32
    %406 = vector.broadcast %cst_194 : f32 to vector<8x9xf32>
    %407 = arith.mulf %405, %406 : vector<8x9xf32>
    %cst_195 = arith.constant dense<0xFF800000> : vector<8xf32>
    %408 = vector.multi_reduction <maximumf>, %407, %cst_195 [1] : vector<8x9xf32> to vector<8xf32>
    %409 = vector.shape_cast %408 : vector<8xf32> to vector<8x1xf32>
    %410 = vector.broadcast %409 : vector<8x1xf32> to vector<8x9xf32>
    %411 = arith.subf %407, %410 : vector<8x9xf32>
    %412 = math.exp %411 : vector<8x9xf32>
    %cst_196 = arith.constant dense<0.000000e+00> : vector<8xf32>
    %413 = vector.multi_reduction <add>, %412, %cst_196 [1] : vector<8x9xf32> to vector<8xf32>
    %414 = vector.shape_cast %413 : vector<8xf32> to vector<8x1xf32>
    %415 = vector.broadcast %414 : vector<8x1xf32> to vector<8x9xf32>
    %416 = arith.divf %412, %415 : vector<8x9xf32>
    %cst_197 = arith.constant dense<0.000000e+00> : vector<8x8xf32>
    %417 = tpu.matmul %416, %398, %cst_197 {dimension_numbers = #tpu.dot_dimension_numbers<[1], [0], [0], [1], [0, 0, 1, 1], [], []>} : vector<8x9xf32>, vector<9x8xf32>, vector<8x8xf32> -> vector<8x8xf32>
    %418 = vector.extract_strided_slice %141 {offsets = [0, 24], sizes = [8, 8], strides = [1, 1]} : vector<8x32xf32> to vector<8x8xf32>
    %419 = vector.extract_strided_slice %351 {offsets = [24, 0], sizes = [8, 9], strides = [1, 1]} : vector<32x9xf32> to vector<8x9xf32>
    %420 = vector.extract_strided_slice %162 {offsets = [0, 24], sizes = [9, 8], strides = [1, 1]} : vector<9x32xf32> to vector<9x8xf32>
    %cst_198 = arith.constant dense<0.000000e+00> : vector<8x9xf32>
    %421 = tpu.matmul %418, %419, %cst_198 {dimension_numbers = #tpu.dot_dimension_numbers<[1], [0], [0], [1], [0, 0, 1, 1], [], []>} : vector<8x8xf32>, vector<8x9xf32>, vector<8x9xf32> -> vector<8x9xf32>
    %cst_199 = arith.constant 0.000000e+00 : f32
    %422 = vector.broadcast %cst_199 : f32 to vector<1x9xf32>
    %423 = arith.cmpf ogt, %17, %422 : vector<1x9xf32>
    %cst_200 = arith.constant -1.000000e+09 : f32
    %424 = vector.shape_cast %423 : vector<1x9xi1> to vector<1x9xi1>
    %425 = vector.broadcast %424 : vector<1x9xi1> to vector<8x9xi1>
    %426 = vector.broadcast %cst_200 : f32 to vector<8x9xf32>
    %427 = arith.select %425, %421, %426 : vector<8x9xi1>, vector<8x9xf32>
    %cst_201 = arith.constant 0.353553385 : f32
    %428 = vector.broadcast %cst_201 : f32 to vector<8x9xf32>
    %429 = arith.mulf %427, %428 : vector<8x9xf32>
    %cst_202 = arith.constant dense<0xFF800000> : vector<8xf32>
    %430 = vector.multi_reduction <maximumf>, %429, %cst_202 [1] : vector<8x9xf32> to vector<8xf32>
    %431 = vector.shape_cast %430 : vector<8xf32> to vector<8x1xf32>
    %432 = vector.broadcast %431 : vector<8x1xf32> to vector<8x9xf32>
    %433 = arith.subf %429, %432 : vector<8x9xf32>
    %434 = math.exp %433 : vector<8x9xf32>
    %cst_203 = arith.constant dense<0.000000e+00> : vector<8xf32>
    %435 = vector.multi_reduction <add>, %434, %cst_203 [1] : vector<8x9xf32> to vector<8xf32>
    %436 = vector.shape_cast %435 : vector<8xf32> to vector<8x1xf32>
    %437 = vector.broadcast %436 : vector<8x1xf32> to vector<8x9xf32>
    %438 = arith.divf %434, %437 : vector<8x9xf32>
    %cst_204 = arith.constant dense<0.000000e+00> : vector<8x8xf32>
    %439 = tpu.matmul %438, %420, %cst_204 {dimension_numbers = #tpu.dot_dimension_numbers<[1], [0], [0], [1], [0, 0, 1, 1], [], []>} : vector<8x9xf32>, vector<9x8xf32>, vector<8x8xf32> -> vector<8x8xf32>
    %440 = tpu.concatenate %373, %395, %417, %439 in 1 : vector<8x8xf32>, vector<8x8xf32>, vector<8x8xf32>, vector<8x8xf32> -> vector<8x32xf32>
    %441 = arith.addf %1, %256 : vector<8x32xf32>
    %c0_205 = arith.constant 0 : index
    %c0_206 = arith.constant 0 : index
    %442 = vector.load %arg22[%c0_205, %c0_206] : memref<32x32xf32, #tpu.memory_space<vmem>>, vector<32x32xf32>
    %cst_207 = arith.constant dense<0.000000e+00> : vector<8x32xf32>
    %443 = tpu.matmul %441, %442, %cst_207 {dimension_numbers = #tpu.dot_dimension_numbers<[1], [0], [0], [1], [0, 0, 1, 1], [], []>} : vector<8x32xf32>, vector<32x32xf32>, vector<8x32xf32> -> vector<8x32xf32>
    %c0_208 = arith.constant 0 : index
    %c0_209 = arith.constant 0 : index
    %444 = vector.load %arg23[%c0_208, %c0_209] : memref<1x32xf32, #tpu.memory_space<vmem>>, vector<1x32xf32>
    %445 = vector.broadcast %444 : vector<1x32xf32> to vector<8x32xf32>
    %446 = arith.addf %443, %445 : vector<8x32xf32>
    %c0_210 = arith.constant 0 : index
    %c0_211 = arith.constant 0 : index
    %c0_212 = arith.constant 0 : index
    %447 = vector.load %arg28[%c0_210, %c0_211, %c0_212] : memref<1x8x32xf32, #tpu.memory_space<vmem>>, vector<1x8x32xf32>
    %448 = vector.shape_cast %447 : vector<1x8x32xf32> to vector<8x32xf32>
    %449 = vector.shape_cast %446 : vector<8x32xf32> to vector<1x8x32xf32>
    tpu.vector_store %arg28[%c0_210, %c0_211, %c0_212], %449 {strides = array<i32>} : memref<1x8x32xf32, #tpu.memory_space<vmem>>, vector<1x8x32xf32>,
    %450 = arith.addf %3, %350 : vector<8x32xf32>
    %c0_213 = arith.constant 0 : index
    %c0_214 = arith.constant 0 : index
    %451 = vector.load %arg24[%c0_213, %c0_214] : memref<32x32xf32, #tpu.memory_space<vmem>>, vector<32x32xf32>
    %cst_215 = arith.constant dense<0.000000e+00> : vector<8x32xf32>
    %452 = tpu.matmul %450, %451, %cst_215 {dimension_numbers = #tpu.dot_dimension_numbers<[1], [0], [0], [1], [0, 0, 1, 1], [], []>} : vector<8x32xf32>, vector<32x32xf32>, vector<8x32xf32> -> vector<8x32xf32>
    %c0_216 = arith.constant 0 : index
    %c0_217 = arith.constant 0 : index
    %453 = vector.load %arg25[%c0_216, %c0_217] : memref<1x32xf32, #tpu.memory_space<vmem>>, vector<1x32xf32>
    %454 = vector.broadcast %453 : vector<1x32xf32> to vector<8x32xf32>
    %455 = arith.addf %452, %454 : vector<8x32xf32>
    %c0_218 = arith.constant 0 : index
    %c0_219 = arith.constant 0 : index
    %c0_220 = arith.constant 0 : index
    %456 = vector.load %arg29[%c0_218, %c0_219, %c0_220] : memref<1x8x32xf32, #tpu.memory_space<vmem>>, vector<1x8x32xf32>
    %457 = vector.shape_cast %456 : vector<1x8x32xf32> to vector<8x32xf32>
    %458 = vector.shape_cast %455 : vector<8x32xf32> to vector<1x8x32xf32>
    tpu.vector_store %arg29[%c0_218, %c0_219, %c0_220], %458 {strides = array<i32>} : memref<1x8x32xf32, #tpu.memory_space<vmem>>, vector<1x8x32xf32>,
    %459 = arith.addf %5, %440 : vector<8x32xf32>
    %c0_221 = arith.constant 0 : index
    %c0_222 = arith.constant 0 : index
    %460 = vector.load %arg26[%c0_221, %c0_222] : memref<32x32xf32, #tpu.memory_space<vmem>>, vector<32x32xf32>
    %cst_223 = arith.constant dense<0.000000e+00> : vector<8x32xf32>
    %461 = tpu.matmul %459, %460, %cst_223 {dimension_numbers = #tpu.dot_dimension_numbers<[1], [0], [0], [1], [0, 0, 1, 1], [], []>} : vector<8x32xf32>, vector<32x32xf32>, vector<8x32xf32> -> vector<8x32xf32>
    %c0_224 = arith.constant 0 : index
    %c0_225 = arith.constant 0 : index
    %462 = vector.load %arg27[%c0_224, %c0_225] : memref<1x32xf32, #tpu.memory_space<vmem>>, vector<1x32xf32>
    %463 = vector.broadcast %462 : vector<1x32xf32> to vector<8x32xf32>
    %464 = arith.addf %461, %463 : vector<8x32xf32>
    %c0_226 = arith.constant 0 : index
    %c0_227 = arith.constant 0 : index
    %c0_228 = arith.constant 0 : index
    %465 = vector.load %arg30[%c0_226, %c0_227, %c0_228] : memref<1x8x32xf32, #tpu.memory_space<vmem>>, vector<1x8x32xf32>
    %466 = vector.shape_cast %465 : vector<1x8x32xf32> to vector<8x32xf32>
    %467 = vector.shape_cast %464 : vector<8x32xf32> to vector<1x8x32xf32>
    tpu.vector_store %arg30[%c0_226, %c0_227, %c0_228], %467 {strides = array<i32>} : memref<1x8x32xf32, #tpu.memory_space<vmem>>, vector<1x8x32xf32>,
    return
  }
  func.func @transform_0(%arg0: i32) -> (i32, i32, i32) {
    %c0_i32 = arith.constant 0 : i32
    %c0_i32_0 = arith.constant 0 : i32
    %c0_i32_1 = arith.constant 0 : i32
    return %arg0, %c0_i32, %c0_i32_0 : i32, i32, i32
  }
  func.func @transform_1(%arg0: i32) -> (i32, i32, i32) {
    %c0_i32 = arith.constant 0 : i32
    %c0_i32_0 = arith.constant 0 : i32
    %c0_i32_1 = arith.constant 0 : i32
    return %arg0, %c0_i32, %c0_i32_0 : i32, i32, i32
  }
  func.func @transform_2(%arg0: i32) -> (i32, i32, i32) {
    %c0_i32 = arith.constant 0 : i32
    %c0_i32_0 = arith.constant 0 : i32
    %c0_i32_1 = arith.constant 0 : i32
    return %arg0, %c0_i32, %c0_i32_0 : i32, i32, i32
  }
  func.func @transform_3(%arg0: i32) -> (i32, i32, i32) {
    %c0_i32 = arith.constant 0 : i32
    %c0_i32_0 = arith.constant 0 : i32
    %c0_i32_1 = arith.constant 0 : i32
    return %arg0, %c0_i32, %c0_i32_0 : i32, i32, i32
  }
  func.func @transform_4(%arg0: i32) -> (i32, i32, i32) {
    %c0_i32 = arith.constant 0 : i32
    %c0_i32_0 = arith.constant 0 : i32
    %c0_i32_1 = arith.constant 0 : i32
    return %arg0, %c0_i32, %c0_i32_0 : i32, i32, i32
  }
  func.func @transform_5(%arg0: i32) -> (i32, i32, i32) {
    %c0_i32 = arith.constant 0 : i32
    %c0_i32_0 = arith.constant 0 : i32
    %c0_i32_1 = arith.constant 0 : i32
    return %arg0, %c0_i32, %c0_i32_0 : i32, i32, i32
  }
  func.func @transform_6(%arg0: i32) -> (i32, i32, i32) {
    %c0_i32 = arith.constant 0 : i32
    %c0_i32_0 = arith.constant 0 : i32
    %c0_i32_1 = arith.constant 0 : i32
    return %arg0, %c0_i32, %c0_i32_0 : i32, i32, i32
  }
  func.func @transform_7(%arg0: i32) -> (i32, i32, i32) {
    %c0_i32 = arith.constant 0 : i32
    %c0_i32_0 = arith.constant 0 : i32
    %c0_i32_1 = arith.constant 0 : i32
    return %arg0, %c0_i32, %c0_i32_0 : i32, i32, i32
  }
  func.func @transform_8(%arg0: i32) -> (i32, i32, i32) {
    %c0_i32 = arith.constant 0 : i32
    %c0_i32_0 = arith.constant 0 : i32
    %c0_i32_1 = arith.constant 0 : i32
    return %arg0, %c0_i32, %c0_i32_0 : i32, i32, i32
  }
  func.func @transform_9(%arg0: i32) -> (i32, i32) {
    %c0_i32 = arith.constant 0 : i32
    %c0_i32_0 = arith.constant 0 : i32
    %c0_i32_1 = arith.constant 0 : i32
    return %c0_i32, %c0_i32_0 : i32, i32
  }
  func.func @transform_10(%arg0: i32) -> (i32, i32) {
    %c0_i32 = arith.constant 0 : i32
    %c0_i32_0 = arith.constant 0 : i32
    %c0_i32_1 = arith.constant 0 : i32
    return %c0_i32, %c0_i32_0 : i32, i32
  }
  func.func @transform_11(%arg0: i32) -> (i32, i32) {
    %c0_i32 = arith.constant 0 : i32
    %c0_i32_0 = arith.constant 0 : i32
    %c0_i32_1 = arith.constant 0 : i32
    return %c0_i32, %c0_i32_0 : i32, i32
  }
  func.func @transform_12(%arg0: i32) -> (i32, i32) {
    %c0_i32 = arith.constant 0 : i32
    %c0_i32_0 = arith.constant 0 : i32
    %c0_i32_1 = arith.constant 0 : i32
    return %c0_i32, %c0_i32_0 : i32, i32
  }
  func.func @transform_13(%arg0: i32) -> (i32, i32, i32) {
    %c0_i32 = arith.constant 0 : i32
    %c0_i32_0 = arith.constant 0 : i32
    %c0_i32_1 = arith.constant 0 : i32
    %c0_i32_2 = arith.constant 0 : i32
    return %c0_i32, %c0_i32_0, %c0_i32_1 : i32, i32, i32
  }
  func.func @transform_14(%arg0: i32) -> (i32, i32, i32) {
    %c0_i32 = arith.constant 0 : i32
    %c0_i32_0 = arith.constant 0 : i32
    %c0_i32_1 = arith.constant 0 : i32
    %c0_i32_2 = arith.constant 0 : i32
    return %c0_i32, %c0_i32_0, %c0_i32_1 : i32, i32, i32
  }
  func.func @transform_15(%arg0: i32) -> (i32, i32, i32) {
    %c0_i32 = arith.constant 0 : i32
    %c0_i32_0 = arith.constant 0 : i32
    %c0_i32_1 = arith.constant 0 : i32
    %c0_i32_2 = arith.constant 0 : i32
    return %c0_i32, %c0_i32_0, %c0_i32_1 : i32, i32, i32
  }
  func.func @transform_16(%arg0: i32) -> (i32, i32, i32) {
    %c0_i32 = arith.constant 0 : i32
    %c0_i32_0 = arith.constant 0 : i32
    %c0_i32_1 = arith.constant 0 : i32
    %c0_i32_2 = arith.constant 0 : i32
    return %c0_i32, %c0_i32_0, %c0_i32_1 : i32, i32, i32
  }
  func.func @transform_17(%arg0: i32) -> (i32, i32, i32) {
    %c0_i32 = arith.constant 0 : i32
    %c0_i32_0 = arith.constant 0 : i32
    %c0_i32_1 = arith.constant 0 : i32
    %c0_i32_2 = arith.constant 0 : i32
    return %c0_i32, %c0_i32_0, %c0_i32_1 : i32, i32, i32
  }
  func.func @transform_18(%arg0: i32) -> (i32, i32, i32) {
    %c0_i32 = arith.constant 0 : i32
    %c0_i32_0 = arith.constant 0 : i32
    %c0_i32_1 = arith.constant 0 : i32
    %c0_i32_2 = arith.constant 0 : i32
    return %c0_i32, %c0_i32_0, %c0_i32_1 : i32, i32, i32
  }
  func.func @transform_19(%arg0: i32) -> (i32, i32, i32) {
    %c0_i32 = arith.constant 0 : i32
    %c0_i32_0 = arith.constant 0 : i32
    %c0_i32_1 = arith.constant 0 : i32
    %c0_i32_2 = arith.constant 0 : i32
    return %c0_i32, %c0_i32_0, %c0_i32_1 : i32, i32, i32
  }
  func.func @transform_20(%arg0: i32) -> (i32, i32, i32) {
    %c0_i32 = arith.constant 0 : i32
    %c0_i32_0 = arith.constant 0 : i32
    %c0_i32_1 = arith.constant 0 : i32
    %c0_i32_2 = arith.constant 0 : i32
    return %c0_i32, %c0_i32_0, %c0_i32_1 : i32, i32, i32
  }
  func.func @transform_21(%arg0: i32) -> (i32, i32) {
    %c0_i32 = arith.constant 0 : i32
    %c0_i32_0 = arith.constant 0 : i32
    %c0_i32_1 = arith.constant 0 : i32
    return %c0_i32, %c0_i32_0 : i32, i32
  }
  func.func @transform_22(%arg0: i32) -> (i32, i32) {
    %c0_i32 = arith.constant 0 : i32
    %c0_i32_0 = arith.constant 0 : i32
    %c0_i32_1 = arith.constant 0 : i32
    return %c0_i32, %c0_i32_0 : i32, i32
  }
  func.func @transform_23(%arg0: i32) -> (i32, i32) {
    %c0_i32 = arith.constant 0 : i32
    %c0_i32_0 = arith.constant 0 : i32
    %c0_i32_1 = arith.constant 0 : i32
    return %c0_i32, %c0_i32_0 : i32, i32
  }
  func.func @transform_24(%arg0: i32) -> (i32, i32) {
    %c0_i32 = arith.constant 0 : i32
    %c0_i32_0 = arith.constant 0 : i32
    %c0_i32_1 = arith.constant 0 : i32
    return %c0_i32, %c0_i32_0 : i32, i32
  }
  func.func @transform_25(%arg0: i32) -> (i32, i32) {
    %c0_i32 = arith.constant 0 : i32
    %c0_i32_0 = arith.constant 0 : i32
    %c0_i32_1 = arith.constant 0 : i32
    return %c0_i32, %c0_i32_0 : i32, i32
  }
  func.func @transform_26(%arg0: i32) -> (i32, i32) {
    %c0_i32 = arith.constant 0 : i32
    %c0_i32_0 = arith.constant 0 : i32
    %c0_i32_1 = arith.constant 0 : i32
    return %c0_i32, %c0_i32_0 : i32, i32
  }
  func.func @transform_27(%arg0: i32) -> (i32, i32, i32) {
    %c0_i32 = arith.constant 0 : i32
    %c0_i32_0 = arith.constant 0 : i32
    %c0_i32_1 = arith.constant 0 : i32
    return %arg0, %c0_i32, %c0_i32_0 : i32, i32, i32
  }
  func.func @transform_28(%arg0: i32) -> (i32, i32, i32) {
    %c0_i32 = arith.constant 0 : i32
    %c0_i32_0 = arith.constant 0 : i32
    %c0_i32_1 = arith.constant 0 : i32
    return %arg0, %c0_i32, %c0_i32_0 : i32, i32, i32
  }
  func.func @transform_29(%arg0: i32) -> (i32, i32, i32) {
    %c0_i32 = arith.constant 0 : i32
    %c0_i32_0 = arith.constant 0 : i32
    %c0_i32_1 = arith.constant 0 : i32
    return %arg0, %c0_i32, %c0_i32_0 : i32, i32, i32
  }
}

</mosaic_0001>

<bundles_post_ra>
// kernel: tpu_custom_call.1
= control target key start
LH: loop header
LB: loop body
LE: loop exit
PB: predicated region body
PF: predicated region fallthrough
CT: control target
= control target key end

     0   :  { %s6790_s6 = smov 1   ;;  %s6791_s10 = smov 2   ;;  %s8019_s0 = inlined_call_operand.smem [shape: u32[30], index: -1, kind: input, shape index: {}] }
   0x1   :  { %s6862_s5 = sld [smem:[%s8019_s0]]   ;;  %s6792_s14 = smov 3  }
   0x2   :  { %s6867_s9 = sld [smem:[%s8019_s0 + %s6790_s6]]   ;;  %s6793_s18 = smov 4  }
   0x3   :  { %s6872_s13 = sld [smem:[%s8019_s0 + %s6791_s10]]   ;;  %s6794_s22 = smov 5  }
   0x4   :  { %s6877_s17 = sld [smem:[%s8019_s0 + %s6792_s14]]   ;;  %s6795_s26 = smov 6  }
   0x5   :  { %s6882_s21 = sld [smem:[%s8019_s0 + %s6793_s18]]   ;;  %s6796_s30 = smov 7  }
   0x6   :  { %s6887_s25 = sld [smem:[%s8019_s0 + %s6794_s22]]   ;;  %s6797_s4 = smov 8  }
   0x7   :  { %8052 = sst [smem:[#allocation49_spill]] %s6862_s5  ;;  %s6798_s10 = smov 9  }
   0x8   :  { %8053 = sst [smem:[#allocation50_spill]] %s6867_s9  ;;  %s6799_s15 = smov 10  }
   0x9   :  { %8054 = sst [smem:[#allocation51_spill]] %s6872_s13  ;;  %s6800_s20 = smov 11  }
   0xa   :  { %8055 = sst [smem:[#allocation52_spill]] %s6877_s17  ;;  %s6802_s1 = smov 13  }
   0xb   :  { %8056 = sst [smem:[#allocation53_spill]] %s6882_s21  ;;  %s6803_s7 = smov 14  }
   0xc   :  { %8057 = sst [smem:[#allocation54_spill]] %s6887_s25  ;;  %s6805_s22 = smov 16  }
   0xd   :  { %s6892_s29 = sld [smem:[%s8019_s0 + %s6795_s26]]   ;;  %s6801_s26 = smov 12  }
   0xe   :  { %s6897_s3 = sld [smem:[%s8019_s0 + %s6796_s30]]   ;;  %s6806_s28 = smov 17  }
   0xf   :  { %s6902_s8 = sld [smem:[%s8019_s0 + %s6797_s4]]  }
  0x10   :  { %s6907_s14 = sld [smem:[%s8019_s0 + %s6798_s10]]  }
  0x11   :  { %s6912_s19 = sld [smem:[%s8019_s0 + %s6799_s15]]   ;;  %s6804_s15 = smov 15  }
  0x12   :  { %s6917_s24 = sld [smem:[%s8019_s0 + %s6800_s20]]  }
  0x13   :  { %8058 = sst [smem:[#allocation55_spill]] %s6892_s29 }
  0x14   :  { %8059 = sst [smem:[#allocation56_spill]] %s6897_s3 }
  0x15   :  { %8060 = sst [smem:[#allocation57_spill]] %s6902_s8 }
  0x16   :  { %8061 = sst [smem:[#allocation58_spill]] %s6907_s14 }
  0x17   :  { %8062 = sst [smem:[#allocation59_spill]] %s6912_s19 }
  0x18   :  { %8063 = sst [smem:[#allocation60_spill]] %s6917_s24 }
  0x19   :  { %s6922_s30 = sld [smem:[%s8019_s0 + %s6801_s26]]  }
  0x1a   :  { %s6927_s6 = sld [smem:[%s8019_s0 + %s6802_s1]]  }
  0x1b   :  { %s6932_s12 = sld [smem:[%s8019_s0 + %s6803_s7]]   ;;  %s6807_s7 = smov 18  }
  0x1c   :  { %s6937_s20 = sld [smem:[%s8019_s0 + %s6804_s15]]   ;;  %s6808_s15 = smov 19  }
  0x1d   :  { %s6942_s27 = sld [smem:[%s8019_s0 + %s6805_s22]]   ;;  %s6809_s22 = smov 20  }
  0x1e   :  { %s6947_s4 = sld [smem:[%s8019_s0 + %s6806_s28]]   ;;  %s6810_s28 = smov 21  }
  0x1f   :  { %8064 = sst [smem:[#allocation61_spill]] %s6922_s30 }
  0x20   :  { %8065 = sst [smem:[#allocation62_spill]] %s6927_s6 }
  0x21   :  { %8066 = sst [smem:[#allocation63_spill]] %s6932_s12 }
  0x22   :  { %s6952_s25 = sld [smem:[%s8019_s0 + %s6807_s7]]   ;;  %s6811_s7 = smov 22  }
  0x23   :  { %8067 = sst [smem:[#allocation64_spill]] %s6942_s27 }
  0x24   :  { %8068 = sst [smem:[#allocation65_spill]] %s6947_s4 }
  0x25   :  { %s6957_s24 = sld [smem:[%s8019_s0 + %s6808_s15]]   ;;  %s6812_s15 = smov 23  }
  0x26   :  { %s6962_s14 = sld [smem:[%s8019_s0 + %s6809_s22]]   ;;  %s6813_s22 = smov 24  }
  0x27   :  { %s6967_s21 = sld [smem:[%s8019_s0 + %s6810_s28]]   ;;  %s6814_s28 = smov 25  }
  0x28   :  { %8069 = sst [smem:[#allocation66_spill]] %s6952_s25 }
  0x29   :  { %s6972_s17 = sld [smem:[%s8019_s0 + %s6811_s7]]   ;;  %s6815_s7 = smov 26  }
  0x2a   :  { %s6977_s8 = sld [smem:[%s8019_s0 + %s6812_s15]]   ;;  %s6816_s15 = smov 27  }
  0x2b   :  { %s6982_s3 = sld [smem:[%s8019_s0 + %s6813_s22]]   ;;  %s6817_s22 = smov 28  }
  0x2c   :  { %8070 = sst [smem:[#allocation67_spill]] %s6962_s14 }
  0x2d   :  { %s6987_s13 = sld [smem:[%s8019_s0 + %s6814_s28]]   ;;  %s6818_s28 = smov 29  }
  0x2e   :  { %s6992_s5 = sld [smem:[%s8019_s0 + %s6815_s7]]  }
  0x2f   :  { %8071 = sst [smem:[#allocation68_spill]] %s6972_s17 }
  0x30   :  { %8072 = sst [smem:[#allocation69_spill]] %s6977_s8 }
  0x31   :  { %8073 = sst [smem:[#allocation70_spill]] %s6982_s3 }
  0x32   :  { %s6997_s8 = sld [smem:[%s8019_s0 + %s6816_s15]]  }
  0x33   :  { %8074 = sst [smem:[#allocation71_spill]] %s6987_s13 }
  0x34   :  { %8075 = sst [smem:[#allocation72_spill]] %s6992_s5 }
  0x35   :  { %s7002_s3 = sld [smem:[%s8019_s0 + %s6817_s22]]  }
  0x36   :  { %s7007_s13 = sld [smem:[%s8019_s0 + %s6818_s28]]  }
  0x38   :  { %8076 = sst [smem:[#allocation73_spill]] %s6997_s8 }
  0x3c   :  { %8077 = sst [smem:[#allocation74_spill]] %s7007_s13 }
  0x3d   :  { %65 = vsyncpa [#allocation3], 0 }
  0x3e   :  { %67 = vsyncpa [#allocation3 + $0x1], 0 }
  0x3f   :  { %68 = vsyncpa [#allocation6], 0 }
  0x40   :  { %70 = vsyncpa [#allocation6 + $0x1], 0 }
  0x41   :  { %71 = vsyncpa [#allocation9], 0 }
  0x42   :  { %73 = vsyncpa [#allocation9 + $0x1], 0 }
  0x43   :  { %74 = vsyncpa [#allocation12], 0 }
  0x44   :  { %76 = vsyncpa [#allocation12 + $0x1], 0 }
  0x45   :  { %77 = vsyncpa [#allocation15], 0 }
  0x46   :  { %78 = vsyncpa [#allocation18], 0 }
  0x47   :  { %79 = vsyncpa [#allocation21], 0 }
  0x48   :  { %80 = vsyncpa [#allocation24], 0 }
  0x49   :  { %81 = vsyncpa [#allocation27], 0 }
  0x4a   :  { %82 = vsyncpa [#allocation30], 0 }
  0x4b   :  { %83 = vsyncpa [#allocation4], 0 }
  0x4c   :  { %85 = vsyncpa [#allocation4 + $0x1], 0 }
  0x4d   :  { %86 = vsyncpa [#allocation34], 0 }
  0x4e   :  { %88 = vsyncpa [#allocation34 + $0x1], 0  ;;  %s7009_s0 = smov 0   ;;  %s7011_s7 = smov 0  }
  0x4f   :  { %s7013_s10 = smov 0   ;;  %s7015_s11 = smov 0  }
  0x50 LB: > { %s8078_s29 = sld [smem:[#allocation55_spill]]  ;;  %s6819_s15 = smov [#allocation13]   ;;  %s6780_s7 = sphi %s7011_s7, %s8159_s7   ;;  %s6776_s0 = sphi %s7009_s0, %s8158_s0   ;;  %s6788_s11 = sphi %s7015_s11, %s8155_s11   ;;  %s6784_s10 = sphi %s7013_s10, %s8157_s10  }
  0x51   : > { %s8079_s9 = sld [smem:[#allocation50_spill]]  ;;  %s805_s16 = sshll.u32 %s6819_s15, 4  ;;  %s806_s16 = int_to_ptr.vmem [resolvable:$true] %s805_s16 }
  0x52   : > { %8080 = sst [smem:[#allocation75_spill]] %s6776_s0  ;;  %s7030_s18 = sadd.s32 4294967295, %s6788_s11  }
  0x53   : > { %8081 = sst [smem:[#allocation76_spill]] %s6784_s10  ;;  %p5224_p0 = scmp.ge.s32.totalorder %s6788_s11, 1 }
  0x54   : > { %p8028_p1 = scmp.eq.s32.totalorder %s7030_s18, 0  ;;  %p789_p2 = scmp.lt.s32.totalorder %s6788_s11, 3 }
  0x55   : > { %s6820_s23 = smov [#allocation14]   ;;  %s6821_s28 = smov [#allocation17]  }
  0x56   : > { %p7035_p3 = pnand %p5224_p0, %p789_p2  ;;  %s819_s26 = sshll.u32 %s6820_s23, 4  ;;  %s820_s26 = int_to_ptr.vmem [resolvable:$true] %s819_s26 }
  0x57   : > { %s842_s1 = sshll.u32 %s6821_s28, 4  ;;  %s6133_s13 = scalar_lea.vmem %s806_s16, 16  ;;  %s7048_s1 = int_to_ptr.vmem [resolvable:$true] %s842_s1 }
  0x58   : > { %s8082_s22 = scalar_select %p7035_p3, 1, 0 }
  0x59   : > { %p5873_p5 = pneg %p7035_p3  ;;  %p6134_p8 = scmp.ne.s32.totalorder %s806_s16, %s6133_s13 }
  0x5a   : > { %s6140_s23 = scalar_lea.vmem %s806_s16, 32  ;;  %p6141_p11 = scmp.lt.s32.totalorder %s806_s16, %s806_s16 }
  0x5b   : > { %p7044_p6 = pnand %p5873_p5, %p8028_p1  ;;  %p6142_p12 = scmp.lt.s32.totalorder %s6140_s23, %s6133_s13 }
  0x5d   : > { %s8083_s2 = scalar_select %p7044_p6, 1, 0 }
  0x5e   : > { %p7052_p7 = pneg %p7044_p6  ;;  %p6143_p13 = por %p6142_p12, %p6141_p11 }
  0x60   : > { %s8084_s15 = scalar_select %p7052_p7, 1, 0 }
  0x61   : > { %p6136_p9 = pnand %p6134_p8, %p7052_p7 }
  0x63   : > { %p6137_p10 = pneg %p6136_p9 }
  0x65   : > { %p6144_p0 = pnand %p6143_p13, %p6137_p10 }
  0x67   : > { %6147 = shalt.err (!%p6144_p0)
}
  0x68   : > { %s8085_s19 = sld [smem:[#allocation59_spill]]  ;;  %s6159_s28 = scalar_lea.vmem %s820_s26, 16 }
  0x69   : > { %p6160_p2 = scmp.ne.s32.totalorder %s820_s26, %s6159_s28  ;;  %s6166_s5 = scalar_lea.vmem %s820_s26, 32 }
  0x6a   : > { %p6167_p1 = scmp.lt.s32.totalorder %s820_s26, %s820_s26  ;;  %p6168_p8 = scmp.lt.s32.totalorder %s6166_s5, %s6159_s28 }
  0x6b   : > { %p6162_p5 = pnand %p6160_p2, %p7052_p7 }
  0x6c   : > { %p6169_p9 = por %p6168_p8, %p6167_p1 }
  0x6d   : > { %p6163_p4 = pneg %p6162_p5 }
  0x6e   : > { %5876 = dma.hbm_to_vmem [thread:$0]  (!%p7044_p6), %s8085_s19, 16, %s806_s16, [#allocation12]  }
  0x6f   : > { %p6170_p3 = pnand %p6169_p9, %p6163_p4 }
  0x71   : > { %6173 = shalt.err (!%p6170_p3)
}
  0x72   : > { %s8086_s30 = sld [smem:[#allocation61_spill]]  ;;  %s6185_s13 = scalar_lea.vmem %s7048_s1, 48 }
  0x73   : > { %p6186_p10 = scmp.ne.s32.totalorder %s7048_s1, %s6185_s13  ;;  %s6192_s16 = scalar_lea.vmem %s7048_s1, 64 }
  0x74   : > { %p6193_p13 = scmp.lt.s32.totalorder %s7048_s1, %s7048_s1  ;;  %p6194_p1 = scmp.lt.s32.totalorder %s6192_s16, %s6185_s13 }
  0x75   : > { %p6188_p11 = pnand %p6186_p10, %p7052_p7 }
  0x76   : > { %p6195_p4 = por %p6194_p1, %p6193_p13 }
  0x77   : > { %p6189_p12 = pneg %p6188_p11 }
  0x78   : > { %5879 = dma.hbm_to_vmem [thread:$0]  (!%p7044_p6), %s8086_s30, 16, %s820_s26, [#allocation15]  }
  0x79   : > { %p6196_p3 = pnand %p6195_p4, %p6189_p12 }
  0x7b   : > { %6199 = shalt.err (!%p6196_p3)
}
  0x7c   : > { %s8030_s5 = smov 16   ;;  %s8087_s12 = sld [smem:[#allocation63_spill]] }
  0x7d   : > { %s8031_s23 = smov 1   ;;  %s6824_s26 = smov [#allocation20]  }
  0x7e   : > { %s868_s28 = sshll.u32 %s6824_s26, 4  ;;  %s6825_s19 = smov [#allocation23]   ;;  %s869_s28 = int_to_ptr.vmem [resolvable:$true] %s868_s28 }
  0x7f   : > { %s894_s30 = sshll.u32 %s6825_s19, 4  ;;  %s6211_s13 = scalar_lea.vmem %s869_s28, 48  ;;  %s895_s30 = int_to_ptr.vmem [resolvable:$true] %s894_s30 }
  0x80   : > { %p6212_p0 = scmp.ne.s32.totalorder %s869_s28, %s6211_s13  ;;  %s6218_s16 = scalar_lea.vmem %s869_s28, 64 }
  0x81   : > { %p6219_p8 = scmp.lt.s32.totalorder %s869_s28, %s869_s28  ;;  %p6220_p9 = scmp.lt.s32.totalorder %s6218_s16, %s6211_s13 }
  0x82   : > { %5885 = dma.hbm_to_vmem [thread:$0]  (!%p7044_p6), %s8087_s12, 48, %s7048_s1, [#allocation18], %s8030_s5, %s8030_s5, %s8031_s23  }
  0x83   : > { %p6214_p2 = pnand %p6212_p0, %p7052_p7  ;;  %p6221_p10 = por %p6220_p9, %p6219_p8 }
  0x85   : > { %p6215_p5 = pneg %p6214_p2 }
  0x87   : > { %p6222_p11 = pnand %p6221_p10, %p6215_p5 }
  0x89   : > { %6225 = shalt.err (!%p6222_p11)
}
  0x8a   : > { %s8088_s27 = sld [smem:[#allocation64_spill]]  ;;  %s6237_s19 = scalar_lea.vmem %s895_s30, 48 }
  0x8b   : > { %p6238_p12 = scmp.ne.s32.totalorder %s895_s30, %s6237_s19  ;;  %s6244_s1 = scalar_lea.vmem %s895_s30, 64 }
  0x8c   : > { %p6245_p4 = scmp.lt.s32.totalorder %s895_s30, %s895_s30  ;;  %p6246_p3 = scmp.lt.s32.totalorder %s6244_s1, %s6237_s19 }
  0x8d   : > { %p6240_p13 = pnand %p6238_p12, %p7052_p7 }
  0x8e   : > { %p6247_p0 = por %p6246_p3, %p6245_p4 }
  0x8f   : > { %p6241_p1 = pneg %p6240_p13 }
  0x90   : > { %5891 = dma.hbm_to_vmem [thread:$0]  (!%p7044_p6), %s8088_s27, 48, %s869_s28, [#allocation21], %s8030_s5, %s8030_s5, %s8031_s23  }
  0x91   : > { %p6248_p2 = pnand %p6247_p0, %p6241_p1 }
  0x93   : > { %6251 = shalt.err (!%p6248_p2)
}
  0x94   : > { %s8089_s25 = sld [smem:[#allocation66_spill]]  ;;  %s6826_s26 = smov [#allocation26]  }
  0x95   : > { %s920_s28 = sshll.u32 %s6826_s26, 4  ;;  %s6827_s13 = smov [#allocation29]   ;;  %s921_s28 = int_to_ptr.vmem [resolvable:$true] %s920_s28 }
  0x96   : > { %s947_s16 = sshll.u32 %s6827_s13, 4  ;;  %s6263_s12 = scalar_lea.vmem %s921_s28, 32  ;;  %s948_s16 = int_to_ptr.vmem [resolvable:$true] %s947_s16 }
  0x97   : > { %p6264_p5 = scmp.ne.s32.totalorder %s921_s28, %s6263_s12  ;;  %p6271_p10 = scmp.lt.s32.totalorder %s921_s28, %s921_s28 }
  0x98   : > { %p6272_p11 = scmp.lt.s32.totalorder %s6263_s12, %s6263_s12 }
  0x99   : > { %p6266_p8 = pnand %p6264_p5, %p7052_p7 }
  0x9a   : > { %5897 = dma.hbm_to_vmem [thread:$0]  (!%p7044_p6), %s8089_s25, 48, %s895_s30, [#allocation24], %s8030_s5, %s8030_s5, %s8031_s23  }
  0x9b   : > { %p6267_p9 = pneg %p6266_p8  ;;  %p6273_p12 = por %p6272_p11, %p6271_p10 }
  0x9d   : > { %p6274_p13 = pnand %p6273_p12, %p6267_p9 }
  0x9f   : > { %6277 = shalt.err (!%p6274_p13)
}
  0xa0   : > { %s8090_s14 = sld [smem:[#allocation67_spill]]  ;;  %s6289_s30 = scalar_lea.vmem %s948_s16, 16 }
  0xa1   : > { %p6290_p1 = scmp.ne.s32.totalorder %s948_s16, %s6289_s30  ;;  %s6296_s19 = scalar_lea.vmem %s948_s16, 32 }
  0xa2   : > { %p6297_p0 = scmp.lt.s32.totalorder %s948_s16, %s948_s16  ;;  %p6298_p2 = scmp.lt.s32.totalorder %s6296_s19, %s6289_s30 }
  0xa3   : > { %p6292_p4 = pnand %p6290_p1, %p7052_p7 }
  0xa4   : > { %p6299_p5 = por %p6298_p2, %p6297_p0 }
  0xa5   : > { %p6293_p3 = pneg %p6292_p4 }
  0xa6   : > { %5903 = dma.hbm_to_vmem [thread:$0]  (!%p7044_p6), %s8090_s14, 32, %s921_s28, [#allocation27], %s8030_s5, %s8030_s5, %s8031_s23  }
  0xa7   : > { %p6300_p8 = pnand %p6299_p5, %p6293_p3 }
  0xa9   : > { %6303 = shalt.err (!%p6300_p8)
}
  0xaa   : > { %s8091_s17 = sld [smem:[#allocation68_spill]]  ;;  %s8032_s12 = sadd.s32 4294967294, %s6788_s11  }
  0xab   : > { %s7111_s1 = sadd.s32 1, %s6788_s11   ;;  %s101_s26 = sadd.s32 1, %s6784_s10 }
  0xac   : > { %8092 = sst [smem:[#allocation77_spill]] %s7111_s1  ;;  %s98_s28 = ssub.s32 %s6788_s11, %s7111_s1 }
  0xad   : > { %p108_p9 = scmp.ne.s32.totalorder %s6784_s10, %s6780_s7  ;;  %p99_p10 = scmp.eq.s32.totalorder %s98_s28, 0 }
  0xae   : > { %p109_p11 = scmp.eq.s32.totalorder %s6788_s11, 0  ;;  %p114_p12 = scmp.ne.s32.totalorder %s6780_s7, %s6776_s0 }
  0xaf   : > { %p724_p13 = scmp.eq.s32.totalorder %s7030_s18, 1  ;;  %p8094_p4 = scmp.eq.s32.totalorder %s7030_s18, 0 }
  0xb0   : > { %5909 = dma.hbm_to_vmem [thread:$0]  (!%p7044_p6), %s8091_s17, 16, %s948_s16, [#allocation30]  }
  0xb1   : > { %s7123_s13 = scalar_select %p99_p10, %s6784_s10, %s101_s26  }
  0xb2   : > { %p110_p1 = por %p109_p11, %p108_p9  ;;  %p7127_p3 = por %p8094_p4, %p114_p12 }
  0xb3   : > { %8093 = sst [smem:[#allocation78_spill]] %s7123_s13  ;;  %p7131_p0 = por %p724_p13, %p108_p9 }
  0xb4   : > { %s8095_s16 = scalar_select %p7127_p3, 1, 0 }
  0xb5   : > { %s8096_s30 = scalar_select %p7131_p0, 1, 0 }
  0xb6   : > { %p730_p2 = scmp.eq.s32.totalorder %s8032_s12, 1  ;;  %p5955_p5 = scmp.lt.s32.totalorder %s6788_s11, 2 }
  0xb7   : > { %s7139_s19 = sand.u32 1, %s6784_s10   ;;  %s7149_s5 = sshll.u32 %s6788_s11, 7 }
  0xb8   : > { %p7141_p8 = por %p730_p2, %p114_p12  ;;  %s7146_s28 = sshll.u32 %s7139_s19, 3 }
  0xb9   : > { %p7151_p9 = pnand %p5955_p5, %p110_p1  ;;  %s7156_s12 = sand.u32 1, %s6788_s11  }
  0xba   : > { %s8097_s26 = scalar_select %p7141_p8, 1, 0 }
  0xbb   : > { %s8099_s23 = scalar_select %p7151_p9, 1, 0 }
  0xbc   : > { %8098 = sst [smem:[#allocation79_spill]] %s8097_s26  ;;  %s7160_s14 = scalar_lea.hbm %s8079_s9, %s7149_s5 }
  0xbd   : > { %s1002_s17 = scalar_lea.vmem [#allocation5], %s7146_s28  ;;  %s6304_s13 = scalar_lea.hbm %s7160_s14, 128 }
  0xbe   : > { %s1009_s25 = sshll.u32 %s1002_s17, 4  ;;  %p6305_p10 = scmp.ne.s32.totalorder %s7160_s14, %s6304_s13  ;;  %s1010_s25 = int_to_ptr.vmem [resolvable:$true] %s1009_s25 }
  0xbf   : > { %p7168_p11 = pneg %p7151_p9  ;;  %s6309_s1 = scalar_lea.hbm %s8079_s9, 256 }
  0xc0   : > { %p6310_p1 = scmp.lt.s32.totalorder %s7160_s14, %s8079_s9  ;;  %p6311_p4 = scmp.lt.s32.totalorder %s6309_s1, %s6304_s13 }
  0xc1   : > { %s8100_s10 = scalar_select %p7168_p11, 1, 0 }
  0xc2   : > { %p6307_p12 = pnand %p7168_p11, %p6305_p10  ;;  %p6312_p2 = por %p6311_p4, %p6310_p1 }
  0xc4   : > { %p6308_p13 = pneg %p6307_p12 }
  0xc6   : > { %p6313_p5 = pnand %p6312_p2, %p6308_p13 }
  0xc8   : > { %6316 = shalt.err (!%p6313_p5)
}
  0xc9   : > { %s6317_s17 = scalar_lea.vmem %s1010_s25, 128  ;;  %s6828_s27 = smov [#allocation5]  }
  0xca   : > { %p6318_p8 = scmp.ne.s32.totalorder %s1010_s25, %s6317_s17  ;;  %s6322_s26 = sshll.u32 %s6828_s27, 4  ;;  %s6323_s26 = int_to_ptr.vmem [resolvable:$false] %s6322_s26 }
  0xcb   : > { %s6324_s0 = scalar_lea.vmem %s6323_s26, 256  ;;  %p6325_p6 = scmp.lt.s32.totalorder %s1010_s25, %s6323_s26 }
  0xcc   : > { %p6320_p0 = pnand %p6318_p8, %p7168_p11  ;;  %p6326_p7 = scmp.lt.s32.totalorder %s6324_s0, %s6317_s17 }
  0xce   : > { %p6321_p3 = pneg %p6320_p0  ;;  %p6327_p10 = por %p6326_p7, %p6325_p6 }
  0xd0   : > { %p6328_p12 = pnand %p6327_p10, %p6321_p3 }
  0xd2   : > { %6331 = shalt.err (!%p6328_p12)
}
  0xd3   : > { %s8101_s1 = scalar_lea.sflag [#allocation6], %s7156_s12  ;;  %s7185_s27 = sshll.u32 %s6788_s11, 4 }
  0xd4   : > { %5919 = dma.hbm_to_vmem [thread:$0]  (!%p7151_p9), %s7160_s14, 128, %s1010_s25, %s8101_s1  }
  0xd5   : > { %s7189_s0 = scalar_lea.hbm %s8078_s29, %s7185_s27  ;;  %s1058_s13 = scalar_lea.vmem [#allocation8], %s7139_s19 }
  0xd6   : > { %s1065_s26 = sshll.u32 %s1058_s13, 4  ;;  %s8051_s17 = scalar_lea.sflag [#allocation9], %s7156_s12  ;;  %s1066_s26 = int_to_ptr.vmem [resolvable:$true] %s1065_s26 }
  0xd7   : > { %s6332_s9 = scalar_lea.hbm %s7189_s0, 16  ;;  %s6337_s8 = scalar_lea.hbm %s8078_s29, 32 }
  0xd8   : > { %p6333_p6 = scmp.ne.s32.totalorder %s7189_s0, %s6332_s9  ;;  %p6338_p0 = scmp.lt.s32.totalorder %s7189_s0, %s8078_s29 }
  0xd9   : > { %p6339_p8 = scmp.lt.s32.totalorder %s6337_s8, %s6332_s9 }
  0xda   : > { %p6335_p7 = pnand %p6333_p6, %p7168_p11 }
  0xdb   : > { %p6340_p13 = por %p6339_p8, %p6338_p0 }
  0xdc   : > { %p6336_p3 = pneg %p6335_p7 }
  0xde   : > { %p6341_p1 = pnand %p6340_p13, %p6336_p3 }
  0xe0   : > { %6344 = shalt.err (!%p6341_p1)
}
  0xe1   : > { %s6345_s25 = scalar_lea.vmem %s1066_s26, 16  ;;  %s6829_s14 = smov [#allocation8]  }
  0xe2   : > { %p6346_p4 = scmp.ne.s32.totalorder %s1066_s26, %s6345_s25  ;;  %s6350_s1 = sshll.u32 %s6829_s14, 4  ;;  %s6351_s1 = int_to_ptr.vmem [resolvable:$false] %s6350_s1 }
  0xe3   : > { %s6352_s13 = scalar_lea.vmem %s6351_s1, 32  ;;  %p6353_p10 = scmp.lt.s32.totalorder %s1066_s26, %s6351_s1 }
  0xe4   : > { %p6348_p2 = pnand %p6346_p4, %p7168_p11  ;;  %p6354_p12 = scmp.lt.s32.totalorder %s6352_s13, %s6345_s25 }
  0xe6   : > { %p6349_p5 = pneg %p6348_p2  ;;  %p6355_p6 = por %p6354_p12, %p6353_p10 }
  0xe8   : > { %p6356_p7 = pnand %p6355_p6, %p6349_p5 }
  0xea   : > { %6359 = shalt.err (!%p6356_p7)
}
  0xeb   : > { %5925 = dma.hbm_to_vmem [thread:$0]  (!%p7151_p9), %s7189_s0, 16, %s1066_s26, %s8051_s17  }
  0xec   : > { %s6830_s9 = smov [#allocation16]   ;;  %p8102_p0 = scmp.ne.s32.totalorder %s8084_s15, 0 }
  0xed   : > { %s829_s8 = sshll.u32 %s6830_s9, 4  ;;  %s830_s8 = int_to_ptr.vmem [resolvable:$true] %s829_s8 }
  0xee   : > { %s6371_s29 = scalar_lea.vmem %s830_s8, 1536  ;;  %p6379_p1 = scmp.lt.s32.totalorder %s830_s8, %s830_s8 }
  0xef   : > { %p6372_p3 = scmp.ne.s32.totalorder %s830_s8, %s6371_s29  ;;  %p6380_p4 = scmp.lt.s32.totalorder %s6371_s29, %s6371_s29 }
  0xf1   : > { %p6374_p8 = pnand %p6372_p3, %p8102_p0  ;;  %p6381_p2 = por %p6380_p4, %p6379_p1 }
  0xf3   : > { %p6375_p13 = pneg %p6374_p8 }
  0xf5   : > { %p6382_p5 = pnand %p6381_p2, %p6375_p13 }
  0xf7   : > { %6385 = shalt.err (!%p6382_p5)
}
  0xf8   : > { %s6831_s25 = smov 128   ;;  %s8103_s6 = sld [smem:[#allocation62_spill]] }
  0xf9   : > { %s6832_s14 = smov 8   ;;  %p8104_p10 = scmp.ne.s32.totalorder %s8083_s2, 0 }
  0xfa   : > { %s6833_s0 = smov [#allocation19]   ;;  %s6834_s1 = smov [#allocation22]  }
  0xfb   : > { %s855_s26 = sshll.u32 %s6833_s0, 4  ;;  %s881_s13 = sshll.u32 %s6834_s1, 4  ;;  %s856_s26 = int_to_ptr.vmem [resolvable:$true] %s855_s26  ;;  %s882_s13 = int_to_ptr.vmem [resolvable:$true] %s881_s13 }
  0xfc   : > { %s6397_s29 = scalar_lea.vmem %s856_s26, 1536  ;;  %p6405_p3 = scmp.lt.s32.totalorder %s856_s26, %s856_s26 }
  0xfd   : > { %p6398_p12 = scmp.ne.s32.totalorder %s856_s26, %s6397_s29  ;;  %p6406_p8 = scmp.lt.s32.totalorder %s6397_s29, %s6397_s29 }
  0xfe   : > { %5882 = dma.hbm_to_vmem [thread:$0]  (!%p8104_p10), %s8103_s6, 1536, %s830_s8, [#allocation15], %s6831_s25, %s6831_s25, %s6832_s14  }
  0xff   : > { %p6400_p6 = pnand %p6398_p12, %p8102_p0  ;;  %p6407_p13 = por %p6406_p8, %p6405_p3 }
 0x101   : > { %p6401_p7 = pneg %p6400_p6 }
 0x103   : > { %p6408_p1 = pnand %p6407_p13, %p6401_p7 }
 0x105   : > { %6411 = shalt.err (!%p6408_p1)
}
 0x106   : > { %5888 = dma.hbm_to_vmem [thread:$0]  (!%p8104_p10), %s6937_s20, 1536, %s856_s26, [#allocation18], %s6831_s25, %s6831_s25, %s6832_s14  }
 0x107   : > { %s6423_s9 = scalar_lea.vmem %s882_s13, 1536  ;;  %p6431_p12 = scmp.lt.s32.totalorder %s882_s13, %s882_s13 }
 0x108   : > { %p6424_p4 = scmp.ne.s32.totalorder %s882_s13, %s6423_s9  ;;  %p6432_p6 = scmp.lt.s32.totalorder %s6423_s9, %s6423_s9 }
 0x10a   : > { %p6426_p2 = pnand %p6424_p4, %p8102_p0  ;;  %p6433_p9 = por %p6432_p6, %p6431_p12 }
 0x10c   : > { %p6427_p5 = pneg %p6426_p2 }
 0x10e   : > { %p6434_p11 = pnand %p6433_p9, %p6427_p5 }
 0x110   : > { %6437 = shalt.err (!%p6434_p11)
}
 0x111   : > { %s8105_s4 = sld [smem:[#allocation65_spill]]  ;;  %s6835_s8 = smov [#allocation25]  }
 0x112   : > { %s907_s0 = sshll.u32 %s6835_s8, 4  ;;  %s6836_s26 = smov [#allocation28]   ;;  %s908_s0 = int_to_ptr.vmem [resolvable:$true] %s907_s0 }
 0x113   : > { %s933_s1 = sshll.u32 %s6836_s26, 4  ;;  %s6449_s29 = scalar_lea.vmem %s908_s0, 32  ;;  %s934_s1 = int_to_ptr.vmem [resolvable:$true] %s933_s1 }
 0x114   : > { %p6450_p7 = scmp.ne.s32.totalorder %s908_s0, %s6449_s29  ;;  %p6457_p11 = scmp.lt.s32.totalorder %s908_s0, %s908_s0 }
 0x115   : > { %p6458_p8 = scmp.lt.s32.totalorder %s6449_s29, %s6449_s29 }
 0x116   : > { %p6452_p3 = pnand %p6450_p7, %p8102_p0 }
 0x117   : > { %5894 = dma.hbm_to_vmem [thread:$0]  (!%p8104_p10), %s8105_s4, 1536, %s882_s13, [#allocation21], %s6831_s25, %s6831_s25, %s6832_s14  }
 0x118   : > { %p6453_p9 = pneg %p6452_p3  ;;  %p6459_p13 = por %p6458_p8, %p6457_p11 }
 0x11a   : > { %p6460_p1 = pnand %p6459_p13, %p6453_p9 }
 0x11c   : > { %6463 = shalt.err (!%p6460_p1)
}
 0x11d   : > { %s8106_s9 = smov 1   ;;  %s8107_s13 = smov 16  }
 0x11e   : > { %5900 = dma.hbm_to_vmem [thread:$0]  (!%p8104_p10), %s6957_s24, 32, %s908_s0, [#allocation24], %s8107_s13, %s8107_s13, %s8106_s9  }
 0x11f   : > { %s6475_s8 = scalar_lea.vmem %s934_s1, 512  ;;  %p6483_p12 = scmp.lt.s32.totalorder %s934_s1, %s934_s1 }
 0x120   : > { %p6476_p4 = scmp.ne.s32.totalorder %s934_s1, %s6475_s8  ;;  %p6484_p6 = scmp.lt.s32.totalorder %s6475_s8, %s6475_s8 }
 0x122   : > { %p6478_p2 = pnand %p6476_p4, %p8102_p0  ;;  %p6485_p7 = por %p6484_p6, %p6483_p12 }
 0x124   : > { %p6479_p5 = pneg %p6478_p2 }
 0x126   : > { %p6486_p3 = pnand %p6485_p7, %p6479_p5 }
 0x128   : > { %6489 = shalt.err (!%p6486_p3)
}
 0x129   : > { %s8108_s26 = sld [smem:[#allocation49_spill]]  ;;  %s6837_s0 = smov [#allocation31]  }
 0x12a   : > { %5906 = dma.hbm_to_vmem [thread:$0]  (!%p8104_p10), %s6967_s21, 512, %s934_s1, [#allocation27], %s6831_s25, %s6831_s25, %s6832_s14  }
 0x12b   : > { %s963_s29 = sshll.u32 %s6837_s0, 4  ;;  %s964_s29 = int_to_ptr.vmem [resolvable:$true] %s963_s29 }
 0x12c   : > { %s6501_s13 = scalar_lea.vmem %s964_s29, 512  ;;  %p6509_p13 = scmp.lt.s32.totalorder %s964_s29, %s964_s29 }
 0x12d   : > { %p6502_p9 = scmp.ne.s32.totalorder %s964_s29, %s6501_s13  ;;  %p6510_p1 = scmp.lt.s32.totalorder %s6501_s13, %s6501_s13 }
 0x12f   : > { %s7249_s9 = scalar_lea.hbm %s8108_s26, %s7149_s5  ;;  %p6504_p11 = pnand %p6502_p9, %p8102_p0 }
 0x130   : > { %p6511_p4 = por %p6510_p1, %p6509_p13 }
 0x131   : > { %p6505_p8 = pneg %p6504_p11 }
 0x133   : > { %p6512_p2 = pnand %p6511_p4, %p6505_p8 }
 0x135   : > { %6515 = shalt.err (!%p6512_p2)
}
 0x136   : > { %s8109_s1 = sld [smem:[#allocation71_spill]]  ;;  %s984_s15 = scalar_lea.vmem [#allocation2], %s7146_s28 }
 0x137   : > { %s8110_s8 = sld [smem:[#allocation51_spill]]  ;;  %s991_s0 = sshll.u32 %s984_s15, 4  ;;  %s992_s0 = int_to_ptr.vmem [resolvable:$true] %s991_s0 }
 0x138   : > { %s981_s2 = scalar_lea.sflag [#allocation3], %s7139_s19  ;;  %s6516_s17 = scalar_lea.hbm %s7249_s9, 128 }
 0x139   : > { %p6517_p0 = scmp.ne.s32.totalorder %s7249_s9, %s6516_s17  ;;  %p8111_p5 = scmp.ne.s32.totalorder %s8100_s10, 0 }
 0x13a   : > { %s6521_s4 = scalar_lea.hbm %s8108_s26, 256  ;;  %p6522_p7 = scmp.lt.s32.totalorder %s7249_s9, %s8108_s26 }
 0x13b   : > { %p6519_p12 = pnand %p6517_p0, %p8111_p5  ;;  %p6523_p3 = scmp.lt.s32.totalorder %s6521_s4, %s6516_s17 }
 0x13c   : > { %5912 = dma.hbm_to_vmem [thread:$0]  (!%p8104_p10), %s8109_s1, 512, %s964_s29, [#allocation30], %s6831_s25, %s6831_s25, %s6832_s14  }
 0x13d   : > { %s7262_s13 = scalar_lea.hbm %s8110_s8, %s7149_s5  ;;  %p6520_p6 = pneg %p6519_p12 }
 0x13e   : > { %p6524_p9 = por %p6523_p3, %p6522_p7 }
 0x140   : > { %p6525_p11 = pnand %p6524_p9, %p6520_p6 }
 0x142   : > { %6528 = shalt.err (!%p6525_p11)
}
 0x143   : > { %s6529_s6 = scalar_lea.vmem %s992_s0, 128  ;;  %s6838_s5 = smov [#allocation2]  }
 0x144   : > { %p6530_p10 = scmp.ne.s32.totalorder %s992_s0, %s6529_s6  ;;  %s6534_s25 = sshll.u32 %s6838_s5, 4  ;;  %s6535_s25 = int_to_ptr.vmem [resolvable:$false] %s6534_s25 }
 0x145   : > { %s6536_s14 = scalar_lea.vmem %s6535_s25, 256  ;;  %p6537_p1 = scmp.lt.s32.totalorder %s992_s0, %s6535_s25 }
 0x146   : > { %p6532_p8 = pnand %p6530_p10, %p8111_p5  ;;  %p6538_p4 = scmp.lt.s32.totalorder %s6536_s14, %s6529_s6 }
 0x148   : > { %p6533_p13 = pneg %p6532_p8  ;;  %p6539_p2 = por %p6538_p4, %p6537_p1 }
 0x14a   : > { %p6540_p0 = pnand %p6539_p2, %p6533_p13 }
 0x14c   : > { %6543 = shalt.err (!%p6540_p0)
}
 0x14d   : > { %p8112_p12 = scmp.ne.s32.totalorder %s8099_s23, 0  ;;  %s8113_s4 = sld [smem:[#allocation56_spill]] }
 0x14e   : > { %s1020_s17 = scalar_lea.vmem [#allocation7], %s7146_s28  ;;  %s6544_s1 = scalar_lea.hbm %s7262_s13, 128 }
 0x14f   : > { %5916 = dma.hbm_to_vmem [thread:$0]  (!%p8112_p12), %s7249_s9, 128, %s992_s0, %s981_s2  }
 0x150   : > { %s1027_s29 = sshll.u32 %s1020_s17, 4  ;;  %p6545_p6 = scmp.ne.s32.totalorder %s7262_s13, %s6544_s1  ;;  %s1028_s29 = int_to_ptr.vmem [resolvable:$true] %s1027_s29 }
 0x151   : > { %s6549_s15 = scalar_lea.hbm %s8110_s8, 256  ;;  %p6550_p9 = scmp.lt.s32.totalorder %s7262_s13, %s8110_s8 }
 0x152   : > { %p6547_p7 = pnand %p6545_p6, %p8111_p5  ;;  %p6551_p11 = scmp.lt.s32.totalorder %s6549_s15, %s6544_s1 }
 0x153   : > { %s7280_s6 = scalar_lea.hbm %s8113_s4, %s7185_s27 }
 0x154   : > { %p6548_p3 = pneg %p6547_p7  ;;  %p6552_p10 = por %p6551_p11, %p6550_p9 }
 0x156   : > { %p6553_p8 = pnand %p6552_p10, %p6548_p3 }
 0x158   : > { %6556 = shalt.err (!%p6553_p8)
}
 0x159   : > { %s6557_s5 = scalar_lea.vmem %s1028_s29, 128  ;;  %s6839_s28 = smov [#allocation7]  }
 0x15a   : > { %p6558_p13 = scmp.ne.s32.totalorder %s1028_s29, %s6557_s5  ;;  %s6562_s9 = sshll.u32 %s6839_s28, 4  ;;  %s6563_s9 = int_to_ptr.vmem [resolvable:$false] %s6562_s9 }
 0x15b   : > { %s6564_s0 = scalar_lea.vmem %s6563_s9, 256  ;;  %p6565_p2 = scmp.lt.s32.totalorder %s1028_s29, %s6563_s9 }
 0x15c   : > { %p6560_p1 = pnand %p6558_p13, %p8111_p5  ;;  %p6566_p0 = scmp.lt.s32.totalorder %s6564_s0, %s6557_s5 }
 0x15e   : > { %p6561_p4 = pneg %p6560_p1  ;;  %p6567_p6 = por %p6566_p0, %p6565_p2 }
 0x160   : > { %p6568_p7 = pnand %p6567_p6, %p6561_p4 }
 0x162   : > { %6571 = shalt.err (!%p6568_p7)
}
 0x163   : > { %s8114_s2 = scalar_lea.sflag [#allocation6], %s7156_s12  ;;  %s1075_s25 = scalar_lea.vmem [#allocation10], %s7139_s19 }
 0x164   : > { %5922 = dma.hbm_to_vmem [thread:$0]  (!%p8112_p12), %s7262_s13, 128, %s1028_s29, %s8114_s2  }
 0x165   : > { %s1082_s14 = sshll.u32 %s1075_s25, 4  ;;  %s6572_s17 = scalar_lea.hbm %s7280_s6, 16  ;;  %s1083_s14 = int_to_ptr.vmem [resolvable:$true] %s1082_s14 }
 0x166   : > { %p6573_p3 = scmp.ne.s32.totalorder %s7280_s6, %s6572_s17  ;;  %s6577_s1 = scalar_lea.hbm %s8113_s4, 32 }
 0x167   : > { %p6578_p10 = scmp.lt.s32.totalorder %s7280_s6, %s8113_s4  ;;  %p6579_p8 = scmp.lt.s32.totalorder %s6577_s1, %s6572_s17 }
 0x168   : > { %p6575_p9 = pnand %p6573_p3, %p8111_p5 }
 0x169   : > { %p6580_p13 = por %p6579_p8, %p6578_p10 }
 0x16a   : > { %p6576_p11 = pneg %p6575_p9 }
 0x16c   : > { %p6581_p1 = pnand %p6580_p13, %p6576_p11 }
 0x16e   : > { %6584 = shalt.err (!%p6581_p1)
}
 0x16f   : > { %s6585_s15 = scalar_lea.vmem %s1083_s14, 16  ;;  %s6840_s13 = smov [#allocation10]  }
 0x170   : > { %p6586_p4 = scmp.ne.s32.totalorder %s1083_s14, %s6585_s15  ;;  %s6590_s29 = sshll.u32 %s6840_s13, 4  ;;  %s6591_s29 = int_to_ptr.vmem [resolvable:$false] %s6590_s29 }
 0x171   : > { %s6592_s5 = scalar_lea.vmem %s6591_s29, 32  ;;  %p6593_p6 = scmp.lt.s32.totalorder %s1083_s14, %s6591_s29 }
 0x172   : > { %p6588_p2 = pnand %p6586_p4, %p8111_p5  ;;  %p6594_p7 = scmp.lt.s32.totalorder %s6592_s5, %s6585_s15 }
 0x174   : > { %p6589_p0 = pneg %p6588_p2  ;;  %p6595_p3 = por %p6594_p7, %p6593_p6 }
 0x176   : > { %p6596_p9 = pnand %p6595_p3, %p6589_p0 }
 0x178   : > { %6599 = shalt.err (!%p6596_p9)
}
 0x179   : > { %s8115_s28 = scalar_lea.sflag [#allocation9], %s7156_s12  ;;  %s8116_s9 = sld [smem:[#allocation57_spill]] }
 0x17a   : > { %5928 = dma.hbm_to_vmem [thread:$0]  (!%p8112_p12), %s7280_s6, 16, %s1083_s14, %s8115_s28  }
 0x17b   : > { %s1092_s2 = scalar_lea.vmem [#allocation11], %s7139_s19  ;;  %s1090_s17 = scalar_lea.sflag [#allocation12], %s7156_s12 }
 0x17c   : > { %s1099_s25 = sshll.u32 %s1092_s2, 4  ;;  %s1100_s25 = int_to_ptr.vmem [resolvable:$true] %s1099_s25 }
 0x17f   : > { %s7313_s0 = scalar_lea.hbm %s8116_s9, %s7185_s27  ;;  %s6605_s15 = scalar_lea.hbm %s8116_s9, 32 }
 0x180   : > { %s6600_s1 = scalar_lea.hbm %s7313_s0, 16  ;;  %p6606_p13 = scmp.lt.s32.totalorder %s7313_s0, %s8116_s9 }
 0x181   : > { %p6601_p11 = scmp.ne.s32.totalorder %s7313_s0, %s6600_s1  ;;  %p6607_p1 = scmp.lt.s32.totalorder %s6605_s15, %s6600_s1 }
 0x183   : > { %p6603_p10 = pnand %p6601_p11, %p8111_p5  ;;  %p6608_p4 = por %p6607_p1, %p6606_p13 }
 0x185   : > { %p6604_p8 = pneg %p6603_p10 }
 0x187   : > { %p6609_p2 = pnand %p6608_p4, %p6604_p8 }
 0x189   : > { %6612 = shalt.err (!%p6609_p2)
}
 0x18a   : > { %s6613_s27 = scalar_lea.vmem %s1100_s25, 16  ;;  %s6841_s19 = smov [#allocation11]  }
 0x18b   : > { %p6614_p0 = scmp.ne.s32.totalorder %s1100_s25, %s6613_s27  ;;  %s6618_s6 = sshll.u32 %s6841_s19, 4  ;;  %s6619_s6 = int_to_ptr.vmem [resolvable:$false] %s6618_s6 }
 0x18c   : > { %s6620_s12 = scalar_lea.vmem %s6619_s6, 32  ;;  %p6621_p3 = scmp.lt.s32.totalorder %s1100_s25, %s6619_s6 }
 0x18d   : > { %p6616_p6 = pnand %p6614_p0, %p8111_p5  ;;  %p6622_p9 = scmp.lt.s32.totalorder %s6620_s12, %s6613_s27 }
 0x18f   : > { %p6617_p7 = pneg %p6616_p6  ;;  %p6623_p11 = por %p6622_p9, %p6621_p3 }
 0x191   : > { %p6624_p10 = pnand %p6623_p11, %p6617_p7 }
 0x193   : > { %6627 = shalt.err (!%p6624_p10)
}
 0x194   : > { %5931 = dma.hbm_to_vmem [thread:$0]  (!%p8112_p12), %s7313_s0, 16, %s1100_s25, %s1090_s17  }
 0x195   : > { %p8117_p8 = scmp.ne.s32.totalorder %s8082_s22, 0 }
 0x196   : > { %s7332_s10 = sand.u32 (!%p8117_p8), 1, %s6780_s7   ;;  %p8118_p5 = scmp.ne.s32.totalorder (!%p8117_p8), %s8095_s16, 0 }
 0x197   : > { %1108 = sbr.rel (%p8117_p8) target bundleno = 5616 (0x15f0), region = 128  ;;  %s7335_s14 = sshll.u32 (!%p8117_p8), %s7332_s10, 3 }
 0x198   : > { %s1111_s13 = scalar_lea.sflag (!%p8117_p8), [#allocation3], %s7332_s10  ;;  %s1114_s29 = scalar_lea.vmem (!%p8117_p8), [#allocation2], %s7335_s14 }
 0x19c   : > { %6723 = dma.done.wait (%p8118_p5), %s1111_s13, 128  }
 0x19d   : > { %6725 = vsyncadd (%p8118_p5), %s1111_s13, 4294967168  ;;  %s7344_s22 = sand.u32 1, %s7030_s18   ;;  %s1123_s5 = scalar_lea.vmem [#allocation5], %s7335_s14 }
 0x19e   : > { %s1120_s23 = scalar_lea.sflag [#allocation6], %s7344_s22 }
 0x19f   : > { %6727 = dma.done.wait (%p8118_p5), %s1120_s23, 256  }
 0x1a0   : > { %6729 = vsyncadd (%p8118_p5), %s1120_s23, 4294967040  ;;  %s1132_s28 = scalar_lea.vmem [#allocation7], %s7335_s14  ;;  %s1138_s0 = scalar_lea.sflag [#allocation9], %s7344_s22 }
 0x1a1   : > { %s1140_s2 = scalar_lea.vmem [#allocation8], %s7332_s10 }
 0x1a2   : > { %6731 = dma.done.wait (%p8118_p5), %s1138_s0, 32  }
 0x1a3   : > { %6733 = vsyncadd (%p8118_p5), %s1138_s0, 4294967264  ;;  %s1148_s25 = scalar_lea.vmem [#allocation10], %s7332_s10  ;;  %s1154_s17 = scalar_lea.sflag [#allocation12], %s7344_s22 }
 0x1a4   : > { %s1156_s1 = scalar_lea.vmem [#allocation11], %s7332_s10 }
 0x1a5   : > { %6735 = dma.done.wait (%p8118_p5), %s1154_s17, 16  }
 0x1a6   : > { %6737 = vsyncadd (%p8118_p5), %s1154_s17, 4294967280  ;;  %p8119_p12 = scmp.eq.s32.totalorder %s7030_s18, 0 }
 0x1a8   : > { %6739 = dma.done.wait (%p8119_p12), [#allocation12], 16   ;;  %p8120_p13 = pmov %p8119_p12 }
 0x1a9   : > { %p8121_p1 = pmov %p8119_p12 }
 0x1aa   : > { %6741 = vsyncadd (%p8120_p13), [#allocation12], 4294967280 }
 0x1ab   : > { %6743 = dma.done.wait (%p8121_p1), [#allocation15], 1552   ;;  %p8122_p4 = pmov %p8121_p1 }
 0x1ac   : > { %p8123_p2 = pmov %p8121_p1 }
 0x1ad   : > { %6745 = vsyncadd (%p8122_p4), [#allocation15], 4294965744 }
 0x1ae   : > { %6747 = dma.done.wait (%p8123_p2), [#allocation18], 1584   ;;  %p8124_p0 = pmov %p8121_p1 }
 0x1b0   : > { %6749 = vsyncadd (%p8124_p0), [#allocation18], 4294965712  ;;  %p8125_p6 = pmov %p8124_p0 }
 0x1b1   : > { %p8126_p7 = pmov %p8124_p0 }
 0x1b2   : > { %6751 = dma.done.wait (%p8125_p6), [#allocation21], 1584  }
 0x1b3   : > { %6753 = vsyncadd (%p8126_p7), [#allocation21], 4294965712  ;;  %p8127_p3 = pmov %p8124_p0 }
 0x1b4   : > { %p8128_p9 = pmov %p8124_p0 }
 0x1b5   : > { %6755 = dma.done.wait (%p8127_p3), [#allocation24], 80  }
 0x1b6   : > { %6757 = vsyncadd (%p8128_p9), [#allocation24], 4294967216  ;;  %p8129_p11 = pmov %p8124_p0 }
 0x1b7   : > { %p8130_p10 = pmov %p8124_p0 }
 0x1b8   : > { %6759 = dma.done.wait (%p8129_p11), [#allocation27], 544  }
 0x1b9   : > { %6761 = vsyncadd (%p8130_p10), [#allocation27], 4294966752  ;;  %p8131_p8 = pmov %p8124_p0 }
 0x1ba   : > { %p8132_p5 = pmov %p8124_p0 }
 0x1bb   : > { %6763 = dma.done.wait (%p8131_p8), [#allocation30], 528  }
 0x1bc   : > { %6765 = vsyncadd (%p8132_p5), [#allocation30], 4294966768  ;;  %s8133_s16 = sld [smem:[#allocation52_spill]]  ;;  %p1327_p12 = scmp.lt.s32.totalorder %s7030_s18, 1  ;;  %v6842_v0 = vmov 0   ;;  %vm1362_vm0 = vcmask 7168  }
 0x1bd   : > { %s8134_s15 = sld [smem:[#allocation53_spill]]  ;;  %6057 = vset.pattern.permute.xlu1 %v6842_v0  ;;  %6058 = vset.pattern.permute.xlu0 %v6842_v0  ;;  %v6843_v6 = vmov 0.0   ;;  %vm6844_vm1 = vmmov 0   ;;  %v1339_v30 = vld [vmem:[%s1114_s29] sm:$0xff]  ;;  %vm1354_vm2 = vcmask 261120   ;;  %v7435_v32 = vld [vmem:[%s1123_s5] sm:$0xff] }
 0x1be   : > { %s8135_s27 = sld [smem:[#allocation58_spill]]  ;;  %5493 = vmatprep.subr.mxu0 %v6843_v6  ;;  %5504 = vmatprep.subr.mxu1 %v6843_v6  ;;  %v1578_v52 = vld [vmem:[#allocation16 + $0x18] sm:$0xff]  ;;  %v1577_v55 = vld [vmem:[#allocation16 + $0x10] sm:$0xff]  ;;  %v1576_v58 = vld [vmem:[#allocation16 + $0x8] sm:$0xff]  ;;  %v1574_v60 = vmax.f32 %v1339_v30, 0.0  ;;  %vm2371_vm3 = vcmask 64512  }
 0x1bf   : > { %s1328_s19 = scalar_select %p1327_p12, %s7030_s18, 1  ;;  %5501 = vmatprep.mubr.msk.f32.mxu0 %vm6844_vm1, %v6843_v6  ;;  %5512 = vmatprep.mubr.msk.f32.mxu1 %vm6844_vm1, %v6843_v6  ;;  %v1664_v59 = vld [vmem:[#allocation16 + $0x38] sm:$0xff]  ;;  %v1575_v61 = vld [vmem:[#allocation16] sm:$0xff]  ;;  %v1663_v62 = vld [vmem:[#allocation16 + $0x30] sm:$0xff]  ;;  %vm2345_vm4 = vcmask 1040384   ;;  %vm2460_vm7 = vcmask 72704  }
 0x1c0   : > { %s8136_s13 = sld [smem:[#allocation60_spill]]  ;;  %v1662_v63 = vld [vmem:[#allocation16 + $0x28] sm:$0xff]  ;;  %vm3086_vm12 = vcmask 130048   ;;  %vm3088_vm13 = vcmask 195584   ;;  %p8146_p1 = scmp.ne.s32.totalorder %s8096_s30, 0 }
 0x1c1   : > { %s7398_s6 = sshll.u32 %s1328_s19, 3  ;;  %s8139_s19 = sld [smem:[#allocation54_spill]] }
 0x1c2   : > { %s1330_s12 = scalar_lea.vmem %s8133_s16, %s7398_s6  ;;  %s6846_s16 = smov 112  }
 0x1c3   : > { %s1334_s23 = scalar_lea.vmem %s8134_s15, %s7398_s6  ;;  %v1342_v1 = vld [vmem:[%s1330_s12] sm:$0xff]  ;;  %s6847_s15 = smov 104  }
 0x1c4   : > { %v1343_v2 = vld [vmem:[%s1334_s23] sm:$0xff]  ;;  %v1363_v3 = vsel %vm1362_vm0, %v1342_v1, 0.0  ;;  %v1406_v5 = vld [vmem:[%s8135_s27 + $0x18] sm:$0xff]  ;;  %v1405_v7 = vld [vmem:[%s8135_s27 + $0x10] sm:$0xff]  ;;  %s6850_s23 = smov 16  }
 0x1c5   : > { %1378 = vperm.xlu1 %6057, %v1343_v2   ;;  %1364 = vadd.xlane.f32.xlu0 %v1363_v3  ;;  %v1389_v4 = vsel %vm1362_vm0, %v1343_v2, 0.0  ;;  %v1404_v10 = vld [vmem:[%s8135_s27 + $0x8] sm:$0xff]  ;;  %v1403_v11 = vld [vmem:[%s8135_s27] sm:$0xff] }
 0x1c6   : > { %v1491_v8 = vld [vmem:[%s8136_s13 + $0x18] sm:$0xff]  ;;  %v1490_v9 = vld [vmem:[%s8136_s13 + $0x10] sm:$0xff]  ;;  %5494 = vmatpush3.msra.mxu0 %v1406_v5  ;;  %v1489_v12 = vld [vmem:[%s8136_s13 + $0x8] sm:$0xff] }
 0x1c7   : > { %5505 = vmatpush3.msra.mxu1 %v1491_v8  ;;  %5495 = vmatprep.subr.mxu0 %v6843_v6  ;;  %v1488_v13 = vld [vmem:[%s8136_s13] sm:$0xff]  ;;  %v1747_v3 = vld [vmem:[#allocation16 + $0x50] sm:$0xff]  ;;  %v1832_v5 = vld [vmem:[#allocation19 + $0x18] sm:$0xff]  ;;  %s1338_s12 = scalar_lea.vmem %s8139_s19, %s7398_s6  ;;  %s6849_s6 = smov 24  }
 0x1c8   : > { %5506 = vmatprep.subr.mxu1 %v6843_v6  ;;  %5496 = vmatpush3.msra.mxu0 %v1405_v7  ;;  %v1661_v2 = vld [vmem:[#allocation16 + $0x20] sm:$0xff]  ;;  %v1831_v8 = vld [vmem:[#allocation19 + $0x10] sm:$0xff] }
 0x1c9   : > { %1350 = vperm.xlu1 %6057, %v1342_v1   ;;  %1390 = vadd.xlane.f32.xlu0 %v1389_v4  ;;  %v1748_v1 = vld [vmem:[#allocation16 + $0x58] sm:$0xff]  ;;  %v1746_v4 = vld [vmem:[#allocation16 + $0x48] sm:$0xff]  ;;  %v1745_v7 = vld [vmem:[#allocation16 + $0x40] sm:$0xff] }
 0x1ca   : > { %5507 = vmatpush3.msra.mxu1 %v1490_v9  ;;  %5497 = vmatprep.subr.mxu0 %v6843_v6  ;;  %v1830_v9 = vld [vmem:[#allocation19 + $0x8] sm:$0xff] }
 0x1cb   : > { %5498 = vmatpush3.msra.mxu0 %v1404_v10  ;;  %5508 = vmatprep.subr.mxu1 %v6843_v6  ;;  %v1918_v10 = vld [vmem:[#allocation19 + $0x38] sm:$0xff] }
 0x1cc   : > { %5499 = vmatprep.subr.mxu0 %v6843_v6  ;;  %5509 = vmatpush3.msra.mxu1 %v1489_v12  ;;  %v1828_v12 = vmax.f32 %v7435_v32, 0.0 }
 0x1cd   : > { %5500 = vmatpush3.msra.mxu0 %v1403_v11  ;;  %5510 = vmatprep.subr.mxu1 %v6843_v6  ;;  %v1829_v11 = vld [vmem:[#allocation19] sm:$0xff] }
 0x1ce   : > { %5515 = vmatprep.subr.mxu0 %v6843_v6  ;;  %5511 = vmatpush3.msra.mxu1 %v1488_v13  ;;  %v1917_v13 = vld [vmem:[#allocation19 + $0x30] sm:$0xff] }
 0x1cf   : > { %5526 = vmatprep.subr.mxu1 %v6843_v6 }
 0x240   : > { %v7426_v28 = vpop.permute.xlu1 %1378 }
 0x241   : > { %v1381_v33 = vmul.f32 %v7426_v28, %v7435_v32  ;;  %v1492_v32 = vld [vmem:[#allocation14] sm:$0x1] }
 0x243   : > { %v1382_v36 = vsel %vm1354_vm2, %v1381_v33, 0.0 }
 0x244   : > { %v7428_v29 = vpop.permute.xlu1 %1350  ;;  %v1383_v37 = vrot.slane %v1382_v36, 4 }
 0x245   : > { %v1353_v31 = vmul.f32 %v7428_v29, %v1339_v30 }
 0x246   : > { %v1384_v40 = vadd.f32 %v1383_v37, %v1382_v36 }
 0x247   : > { %v1355_v34 = vsel %vm1354_vm2, %v1353_v31, 0.0 }
 0x248   : > { %v1356_v35 = vrot.slane %v1355_v34, 4  ;;  %v1385_v43 = vrot.slane %v1384_v40, 2 }
 0x24a   : > { %v1357_v38 = vadd.f32 %v1356_v35, %v1355_v34  ;;  %v1386_v45 = vadd.f32 %v1385_v43, %v1384_v40 }
 0x24c   : > { %v1358_v41 = vrot.slane %v1357_v38, 2  ;;  %v1387_v48 = vrot.slane %v1386_v45, 1 }
 0x24e   : > { %v1365_v14 = vpop.xlane.xlu0 %1364  ;;  %v1359_v44 = vadd.f32 %v1358_v41, %v1357_v38  ;;  %v1388_v53 = vadd.f32 %v1387_v48, %v1386_v45 }
 0x24f   : > { %v1366_v15 = vrot.slane %v1365_v14, 4 }
 0x250   : > { %v1360_v46 = vrot.slane %v1359_v44, 1 }
 0x251   : > { %v1367_v16 = vadd.f32 %v1366_v15, %v1365_v14  ;;  %v1916_v14 = vld [vmem:[#allocation19 + $0x28] sm:$0xff]  ;;  %v2002_v15 = vld [vmem:[#allocation19 + $0x58] sm:$0xff] }
 0x252   : > { %v1391_v17 = vpop.xlane.xlu0 %1390  ;;  %v1361_v47 = vadd.f32 %v1360_v46, %v1359_v44 }
 0x253   : > { %v1368_v18 = vrot.slane %v1367_v16, 2  ;;  %v1392_v19 = vrot.slane %v1391_v17, 4 }
 0x255   : > { %v1393_v20 = vadd.f32 %v1392_v19, %v1391_v17  ;;  %v1369_v21 = vadd.f32 %v1368_v18, %v1367_v16  ;;  %v1915_v16 = vld [vmem:[#allocation19 + $0x20] sm:$0xff]  ;;  %v2001_v17 = vld [vmem:[#allocation19 + $0x50] sm:$0xff]  ;;  %v2000_v18 = vld [vmem:[#allocation19 + $0x48] sm:$0xff] }
 0x256   : > { %v1999_v19 = vld [vmem:[#allocation19 + $0x40] sm:$0xff] }
 0x257   : > { %v1394_v22 = vrot.slane %v1393_v20, 2  ;;  %v1370_v23 = vrot.slane %v1369_v21, 1 }
 0x259   : > { %v1371_v24 = vadd.f32 %v1370_v23, %v1369_v21  ;;  %v1395_v25 = vadd.f32 %v1394_v22, %v1393_v20  ;;  %v2177_v20 = vld [vmem:[#allocation22 + $0x38] sm:$0xff]  ;;  %v2176_v21 = vld [vmem:[#allocation22 + $0x30] sm:$0xff]  ;;  %v2175_v22 = vld [vmem:[#allocation22 + $0x28] sm:$0xff] }
 0x25a   : > { %v1341_v23 = vld [vmem:[%s1132_s28] sm:$0xff] }
 0x25b   : > { %5799 = vpush %v1371_v24  ;;  %v1396_v26 = vrot.slane %v1395_v25, 1  ;;  %v2174_v24 = vld [vmem:[#allocation22 + $0x20] sm:$0xff] }
 0x25d   : > { %v1397_v27 = vadd.f32 %v1396_v26, %v1395_v25  ;;  %v7494_v25 = vmax.f32 %v1341_v23, 0.0  ;;  %v1407_v26 = vld [vmem:[#allocation13] sm:$0x1] }
 0x25f   : > { %5801 = vpush %v1397_v27 }
 0x28c   : > { %s5800_s0 = spop %5799 }
 0x28d   : > { %v1373_v39 = vstv %s5800_s0  ;;  %s1312_s0 = scalar_lea.vmem [#allocation32], %s7335_s14 }
 0x28e   : > { %6059 = vrcp.f32 %v1373_v39 }
 0x290   : > { %s5802_s17 = spop %5801 }
 0x291   : > { %v1399_v42 = vstv %s5802_s17  ;;  %s7956_s17 = sshll.u32 %s7030_s18, 7 }
 0x292   : > { %6061 = vrcp.f32 %v1399_v42 }
 0x29b   : > { %v6060_v49 = vpop.eup %6059 }
 0x29c   : > { %v1375_v50 = vmul.f32 %v6060_v49, %v1361_v47  ;;  %v2364_v49 = vlaneseq }
 0x29e   : > { %v1402_v51 = vmax.f32 %v1375_v50, 0.0 }
 0x29f   : > { %v6062_v54 = vpop.eup %6061 }
 0x2a0   : > { %5502 = vmatmul.mubr.msk.f32.vlgmr.msra.gmra.mxu0 %vm1354_vm2, %v1402_v51  ;;  %v1401_v56 = vmul.f32 %v6062_v54, %v1388_v53  ;;  %v5275_v53 = vld [vmem:[#allocation17] ss:$0 sm:$0xff]  ;;  %v5281_v54 = vld [vmem:[#allocation20] ss:$0 sm:$0xff] }
 0x2a1   : > { %5516 = vmatpush3.msra.mxu0 %v1578_v52  ;;  %5523 = vmatprep.mubr.msk.f32.mxu0 %vm6844_vm1, %v6843_v6  ;;  %v2365_v52 = vshrl.u32 %v2364_v49, 7 }
 0x2a2   : > { %5517 = vmatprep.subr.mxu0 %v6843_v6  ;;  %v1487_v57 = vmax.f32 %v1401_v56, 0.0 }
 0x2a3   : > { %5518 = vmatpush3.msra.mxu0 %v1577_v55  ;;  %v5283_v55 = vld [vmem:[#allocation20 + $0x1] ss:$0 sm:$0xff] }
 0x2a4   : > { %5519 = vmatprep.subr.mxu0 %v6843_v6  ;;  %5513 = vmatmul.mubr.msk.f32.vlgmr.msra.gmra.mxu1 %vm1354_vm2, %v1487_v57 }
 0x2a5   : > { %5520 = vmatpush3.msra.mxu0 %v1576_v58  ;;  %5527 = vmatpush3.msra.mxu1 %v1664_v59  ;;  %v7504_v59 = vsub.s32 0, %v2365_v52  ;;  %v2258_v52 = vld [vmem:[#allocation22 + $0x40] sm:$0xff] }
 0x2a6   : > { %5521 = vmatprep.subr.mxu0 %v6843_v6  ;;  %5528 = vmatprep.subr.mxu1 %v6843_v6 }
 0x2a7   : > { %5522 = vmatpush3.msra.mxu0 %v1575_v61  ;;  %5529 = vmatpush3.msra.mxu1 %v1663_v62 }
 0x2a8   : > { %5524 = vmatmul.mubr.msk.f32.vlgmr.msra.gmra.mxu0 %vm1354_vm2, %v1574_v60  ;;  %5530 = vmatprep.subr.mxu1 %v6843_v6 }
 0x2a9   : > { %5537 = vmatprep.subr.mxu0 %v6843_v6  ;;  %5531 = vmatpush3.msra.mxu1 %v1662_v63 }
 0x2aa   : > { %5538 = vmatpush3.msra.mxu0 %v1748_v1  ;;  %5532 = vmatprep.subr.mxu1 %v6843_v6 }
 0x2ab   : > { %5539 = vmatprep.subr.mxu0 %v6843_v6  ;;  %5533 = vmatpush3.msra.mxu1 %v1661_v2 }
 0x2ac   : > { %5534 = vmatprep.mubr.msk.f32.mxu1 %vm6844_vm1, %v6843_v6  ;;  %5540 = vmatpush3.msra.mxu0 %v1747_v3 }
 0x2ad   : > { %5535 = vmatmul.mubr.msk.f32.vlgmr.msra.gmra.mxu1 %vm1354_vm2, %v1574_v60  ;;  %5541 = vmatprep.subr.mxu0 %v6843_v6 }
 0x2ae   : > { %5548 = vmatprep.subr.mxu1 %v6843_v6  ;;  %5542 = vmatpush3.msra.mxu0 %v1746_v4 }
 0x2af   : > { %5549 = vmatpush3.msra.mxu1 %v1832_v5  ;;  %5543 = vmatprep.subr.mxu0 %v6843_v6 }
 0x2b0   : > { %5550 = vmatprep.subr.mxu1 %v6843_v6  ;;  %5544 = vmatpush3.msra.mxu0 %v1745_v7 }
 0x2b1   : > { %5545 = vmatprep.mubr.msk.f32.mxu0 %vm6844_vm1, %v6843_v6  ;;  %5551 = vmatpush3.msra.mxu1 %v1831_v8 }
 0x2b2   : > { %5546 = vmatmul.mubr.msk.f32.vlgmr.msra.gmra.mxu0 %vm1354_vm2, %v1574_v60  ;;  %5552 = vmatprep.subr.mxu1 %v6843_v6 }
 0x2b3   : > { %5559 = vmatprep.subr.mxu0 %v6843_v6  ;;  %5553 = vmatpush3.msra.mxu1 %v1830_v9  ;;  %v5279_v9 = vld [vmem:[#allocation17 + $0x2] ss:$0 sm:$0xff] }
 0x2b4   : > { %5560 = vmatpush3.msra.mxu0 %v1918_v10  ;;  %5554 = vmatprep.subr.mxu1 %v6843_v6 }
 0x2b5   : > { %5561 = vmatprep.subr.mxu0 %v6843_v6  ;;  %5555 = vmatpush3.msra.mxu1 %v1829_v11 }
 0x2b6   : > { %5556 = vmatprep.mubr.msk.f32.mxu1 %vm6844_vm1, %v6843_v6  ;;  %5562 = vmatpush3.msra.mxu0 %v1917_v13 }
 0x2b7   : > { %5557 = vmatmul.mubr.msk.f32.vlgmr.msra.gmra.mxu1 %vm1354_vm2, %v1828_v12  ;;  %5563 = vmatprep.subr.mxu0 %v6843_v6 }
 0x2b8   : > { %5570 = vmatprep.subr.mxu1 %v6843_v6  ;;  %5564 = vmatpush3.msra.mxu0 %v1916_v14  ;;  %v5277_v14 = vld [vmem:[#allocation17 + $0x1] ss:$0 sm:$0xff] }
 0x2b9   : > { %5571 = vmatpush3.msra.mxu1 %v2002_v15  ;;  %5565 = vmatprep.subr.mxu0 %v6843_v6 }
 0x2ba   : > { %5572 = vmatprep.subr.mxu1 %v6843_v6  ;;  %5566 = vmatpush3.msra.mxu0 %v1915_v16  ;;  %v2341_v16 = vld [vmem:[#allocation25] sm:$0x1] }
 0x2bb   : > { %5567 = vmatprep.mubr.msk.f32.mxu0 %vm6844_vm1, %v6843_v6  ;;  %5573 = vmatpush3.msra.mxu1 %v2001_v17 }
 0x2bc   : > { %5568 = vmatmul.mubr.msk.f32.vlgmr.msra.gmra.mxu0 %vm1354_vm2, %v1828_v12  ;;  %5574 = vmatprep.subr.mxu1 %v6843_v6 }
 0x2bd   : > { %5575 = vmatpush3.msra.mxu1 %v2000_v18  ;;  %5578 = vmatprep.mubr.msk.f32.mxu1 %vm6844_vm1, %v6843_v6 }
 0x2be   : > { %5576 = vmatprep.subr.mxu1 %v6843_v6  ;;  %5581 = vmatprep.subr.mxu0 %v6843_v6 }
 0x2bf   : > { %5577 = vmatpush3.msra.mxu1 %v1999_v19  ;;  %5589 = vmatprep.mubr.msk.f32.mxu0 %vm6844_vm1, %v6843_v6 }
 0x2c0   : > { %5579 = vmatmul.mubr.msk.f32.vlgmr.msra.gmra.mxu1 %vm1354_vm2, %v1828_v12  ;;  %5592 = vmatprep.subr.mxu1 %v6843_v6 }
 0x2c1   : > { %5600 = vmatprep.mubr.msk.f32.mxu1 %vm6844_vm1, %v6843_v6  ;;  %5593 = vmatpush3.msra.mxu1 %v2177_v20 }
 0x2c2   : > { %5594 = vmatprep.subr.mxu1 %v6843_v6 }
 0x2c3   : > { %5595 = vmatpush3.msra.mxu1 %v2176_v21 }
 0x2c4   : > { %5596 = vmatprep.subr.mxu1 %v6843_v6 }
 0x2c5   : > { %5597 = vmatpush3.msra.mxu1 %v2175_v22 }
 0x2c6   : > { %5598 = vmatprep.subr.mxu1 %v6843_v6 }
 0x2c7   : > { %5599 = vmatpush3.msra.mxu1 %v2174_v24 }
 0x2c8   : > { %5601 = vmatmul.mubr.msk.f32.vlgmr.msra.gmra.mxu1 %vm1354_vm2, %v7494_v25  ;;  %5614 = vmatprep.subr.mxu1 %v6843_v6 }
 0x2c9   : > { %5618 = vmatprep.mubr.msk.f32.mxu1 %vm6844_vm1, %v6843_v6 }
 0x360   : > { %v1477_v27 = vpop.f32.mrf.mxu0 }
 0x361   : > { %v1478_v30 = vadd.f32 %v1477_v27, %v1407_v26  ;;  %v2348_v26 = vld [vmem:[#allocation25 + $0x1] sm:$0x1] }
 0x362   : > { %v5503_v31 = vpop.f32.mrf.mxu0 }
 0x363   : > { %v5272_v33 = vmul.f32 -1.442695, %v1478_v30  ;;  %v1345_v31 = vld [vmem:[%s1140_s2] sm:$0x1]  ;;  %s6845_s2 = smov 120  }
 0x364   : > { %v1562_v34 = vpop.f32.mrf.mxu1  ;;  %vm2451_vm5 = vcmp.gt.f32.partialorder %v1345_v31, 0.0 }
 0x365   : > { %6063 = vpow2.f32 %v5272_v33  ;;  %v1563_v35 = vadd.f32 %v1562_v34, %v1492_v32  ;;  %v2452_v32 = vsel %vm2451_vm5, 1, %v6842_v0 }
 0x366   : > { %v5514_v36 = vpop.f32.mrf.mxu1  ;;  %v2456_v33 = vrot.slane %v2452_v32, %v7504_v59 }
 0x367   : > { %v5274_v37 = vmul.f32 -1.442695, %v1563_v35 }
 0x368   : > { %v1655_v38 = vpop.f32.mrf.mxu0  ;;  %vm7551_vm6 = vcmp.eq.s32.totalorder %v2456_v33, 1 }
 0x369   : > { %6065 = vpow2.f32 %v5274_v37  ;;  %v1656_v58 = vadd.f32 %v5275_v53, %v1655_v38 }
 0x36a   : > { %v5525_v39 = vpop.f32.mrf.mxu0 }
 0x36b   : > { %v1659_v2 = vmul.f32 %v1656_v58, %v7428_v29 }
 0x36d   : > { %v1739_v40 = vpop.f32.mrf.mxu1  ;;  %v2343_v12 = vrot.slane %v1659_v2, 7 }
 0x36e   : > { %v1740_v18 = vadd.f32 %v5277_v14, %v1739_v40  ;;  %v2086_v40 = vld [vmem:[#allocation22 + $0x18] sm:$0xff] }
 0x36f   : > { %v5536_v41 = vpop.f32.mrf.mxu1  ;;  %v2346_v19 = vsel %vm2345_vm4, %v2341_v16, %v2343_v12  ;;  %5582 = vmatpush3.msra.mxu0 %v2086_v40 }
 0x370   : > { %v1743_v22 = vmul.f32 %v1740_v18, %v7428_v29  ;;  %v2085_v41 = vld [vmem:[#allocation22 + $0x10] sm:$0xff]  ;;  %5583 = vmatprep.subr.mxu0 %v6843_v6 }
 0x371   : > { %5584 = vmatpush3.msra.mxu0 %v2085_v41 }
 0x372   : > { %v6064_v42 = vpop.eup %6063  ;;  %v1823_v43 = vpop.f32.mrf.mxu0  ;;  %5585 = vmatprep.subr.mxu0 %v6843_v6 }
 0x373   : > { %v1484_v44 = vadd.f32 1.0, %v6064_v42  ;;  %v1824_v15 = vadd.f32 %v5279_v9, %v1823_v43  ;;  %v2084_v42 = vld [vmem:[#allocation22 + $0x8] sm:$0xff]  ;;  %v2083_v43 = vld [vmem:[#allocation22] sm:$0xff] }
 0x374   : > { %v5547_v45 = vpop.f32.mrf.mxu0  ;;  %5586 = vmatpush3.msra.mxu0 %v2084_v42 }
 0x375   : > { %6067 = vrcp.f32 %v1484_v44  ;;  %v1827_v20 = vmul.f32 %v1824_v15, %v7428_v29  ;;  %5587 = vmatprep.subr.mxu0 %v6843_v6  ;;  %v2261_v44 = vld [vmem:[#allocation22 + $0x58] sm:$0xff]  ;;  %v2260_v45 = vld [vmem:[#allocation22 + $0x50] sm:$0xff] }
 0x376   : > { %v6066_v46 = vpop.eup %6065  ;;  %5588 = vmatpush3.msra.mxu0 %v2083_v43 }
 0x377   : > { %v1569_v47 = vadd.f32 1.0, %v6066_v46  ;;  %v1909_v48 = vpop.f32.mrf.mxu1  ;;  %v7529_v24 = vrot.slane %v1827_v20, 7  ;;  %5603 = vmatprep.subr.mxu0 %v6843_v6  ;;  %5590 = vmatmul.mubr.msk.f32.vlgmr.msra.gmra.mxu0 %vm1354_vm2, %v7494_v25 }
 0x378   : > { %v1910_v60 = vadd.f32 %v5281_v54, %v1909_v48  ;;  %5604 = vmatpush3.msra.mxu0 %v2261_v44  ;;  %5611 = vmatprep.mubr.msk.f32.mxu0 %vm6844_vm1, %v6843_v6 }
 0x379   : > { %6069 = vrcp.f32 %v1569_v47  ;;  %v5558_v50 = vpop.f32.mrf.mxu1  ;;  %v7541_v29 = vsel %vm2345_vm4, %v2348_v26, %v7529_v24  ;;  %5605 = vmatprep.subr.mxu0 %v6843_v6 }
 0x37a   : > { %v1913_v3 = vmul.f32 %v1910_v60, %v7426_v28  ;;  %5606 = vmatpush3.msra.mxu0 %v2260_v45 }
 0x37b   : > { %5607 = vmatprep.subr.mxu0 %v6843_v6 }
 0x37c   : > { %v1993_v51 = vpop.f32.mrf.mxu0 }
 0x37d   : > { %v1994_v61 = vadd.f32 %v5283_v55, %v1993_v51  ;;  %v2259_v51 = vld [vmem:[#allocation22 + $0x48] sm:$0xff] }
 0x37e   : > { %v5569_v56 = vpop.f32.mrf.mxu0  ;;  %5608 = vmatpush3.msra.mxu0 %v2259_v51 }
 0x37f   : > { %v1997_v5 = vmul.f32 %v1994_v61, %v7426_v28  ;;  %5609 = vmatprep.subr.mxu0 %v6843_v6 }
 0x380   : > { %v7502_v57 = vpop.f32.mrf.mxu1  ;;  %5610 = vmatpush3.msra.mxu0 %v2258_v52 }
 0x381   : > { %5635 = vmatprep.subr.mxu0 %v6843_v6  ;;  %5612 = vmatmul.mubr.msk.f32.vlgmr.msra.gmra.mxu0 %vm1354_vm2, %v7494_v25 }
 0x382   : > { %v6068_v62 = vpop.eup %6067  ;;  %v5580_v63 = vpop.f32.mrf.mxu1  ;;  %5639 = vmatprep.mubr.msk.f32.mxu0 %vm6844_vm1, %v6843_v6 }
 0x383   : > { %v1573_v1 = vadd.f32 1.0, %v6068_v62 }
 0x385   : > { %v3093_v4 = vrot.slane %v1573_v1, %v7504_v59 }
 0x386   : > { %v6070_v7 = vpop.eup %6069 }
 0x387   : > { %v1572_v8 = vadd.f32 1.0, %v6070_v7  ;;  %v7510_v10 = vmul.f32 %v3093_v4, %v1913_v3  ;;  %v7512_v11 = vmul.f32 %v3093_v4, %v1997_v5 }
 0x388   : > { %v7545_v27 = vpop.f32.mrf.mxu1 }
 0x389   : > { %v2367_v13 = vrot.slane %v1572_v8, %v7504_v59 }
 0x38a   : > { %v5602_v30 = vpop.f32.mrf.mxu1 }
 0x38b   : > { %v7515_v17 = vmul.f32 %v2367_v13, %v2343_v12  ;;  %v7522_v21 = vmul.f32 %v2367_v13, %v2346_v19  ;;  %v7527_v23 = vmul.f32 %v2367_v13, %v1743_v22 }
 0x38d   : > { %5615 = vmatpush3.xpose.msk.msra.mxu1 %vm2371_vm3, %v7515_v17 }
 0x38e   : > { %5616 = vmatprep.subr.mxu1 %v6843_v6 }
 0x391   : > { %5617 = vmatpush3.xpose.msk.msra.mxu1 %vm2371_vm3, %v7522_v21 }
 0x392   : > { %5621 = vmatprep.subr.mxu1 %v6843_v6 }
 0x394   : > { %5619 = vmatmul.mubr.msk.f32.vlgmr.msra.gmra.mxu1 %vm2371_vm3, %v7527_v23 }
 0x395   : > { %5622 = vmatpush3.msk.msra.mxu1 %vm2345_vm4, %v7529_v24  ;;  %5625 = vmatprep.mubr.msk.f32.mxu1 %vm6844_vm1, %v6843_v6 }
 0x396   : > { %5623 = vmatprep.subr.mxu1 %v6843_v6 }
 0x397   : > { %5624 = vmatpush3.msra.mxu1 %v7541_v29 }
 0x398   : > { %5628 = vmatprep.subr.mxu1 %v6843_v6 }
 0x437   : > { %v7610_v14 = vpop.f32.mrf.mxu0 }
 0x439   : > { %v5591_v15 = vpop.f32.mrf.mxu0 }
 0x43a   : > { %v5287_v15 = vld [vmem:[#allocation23] ss:$0 sm:$0xff] }
 0x441   : > { %v7612_v16 = vpop.f32.mrf.mxu0 }
 0x443   : > { %v5613_v18 = vpop.f32.mrf.mxu0 }
 0x454   : > { %v2447_v35 = vpop.f32.mrf.mxu1 }
 0x455   : > { %v2458_v36 = vsel %vm7551_vm6, %v2447_v35, -1e+09 }
 0x456   : > { %v2459_v37 = vmul.f32 0.35355338, %v2458_v36  ;;  %v5620_v38 = vpop.f32.mrf.mxu1 }
 0x458   : > { %v2461_v39 = vsel %vm2460_vm7, %v2459_v37, -inf }
 0x459   : > { %2462 = vmax.xlane.f32.xlu0 %v2461_v39 }
 0x46f   : > { %2551 = vrot.lane.b32.xlu0 %v7515_v17, %s6845_s2 }
 0x473   : > { %2549 = vrot.lane.b32.xlu0 %v7522_v21, %s6845_s2 }
 0x477   : > { %2547 = vrot.lane.b32.xlu0 %v7527_v23, %s6845_s2 }
 0x4e2   : > { %v2463_v46 = vpop.xlane.xlu0 %2462 }
 0x4e3   : > { %v2464_v47 = vsub.f32 %v2459_v37, %v2463_v46 }
 0x4e5   : > { %v2465_v48 = vmul.f32 1.442695, %v2464_v47 }
 0x4e6   : > { %v2552_v55 = vpop.permute.xlu0 %2551 }
 0x4e7   : > { %6071 = vpow2.f32 %v2465_v48  ;;  %v5285_v48 = vld [vmem:[#allocation20 + $0x2] ss:$0 sm:$0xff] }
 0x4ea   : > { %v2550_v60 = vpop.permute.xlu0 %2549 }
 0x4ee   : > { %v2548_v61 = vpop.permute.xlu0 %2547 }
 0x4f4   : > { %v6072_v49 = vpop.eup %6071 }
 0x4f5   : > { %v2467_v50 = vsel %vm2460_vm7, %v6072_v49, 0.0 }
 0x4f6   : > { %2468 = vadd.xlane.f32.xlu1 %v2467_v50  ;;  %v2078_v50 = vadd.f32 %v5285_v48, %v7502_v57 }
 0x4f8   : > { %v7652_v51 = vmul.f32 %v2078_v50, %v7426_v28 }
 0x507   : > { %2645 = vrot.lane.b32.xlu1 %v7529_v24, %s6845_s2 }
 0x50b   : > { %2643 = vrot.lane.b32.xlu1 %v7541_v29, %s6845_s2 }
 0x50f   : > { %2727 = vrot.lane.b32.xlu1 %v7515_v17, %s6846_s16 }
 0x57f   : > { %v2469_v53 = vpop.xlane.xlu1 %2468 }
 0x580   : > { %6073 = vrcp.f32 %v2469_v53 }
 0x583   : > { %v2646_v54 = vpop.permute.xlu1 %2645 }
 0x584   : > { %5636 = vmatpush3.msk.msra.mxu0 %vm2345_vm4, %v2646_v54 }
 0x585   : > { %5637 = vmatprep.subr.mxu0 %v6843_v6 }
 0x587   : > { %v2644_v25 = vpop.permute.xlu1 %2643 }
 0x588   : > { %5638 = vmatpush3.msra.mxu0 %v2644_v25 }
 0x589   : > { %5642 = vmatprep.subr.mxu0 %v6843_v6 }
 0x58b   : > { %v2728_v19 = vpop.permute.xlu1 %2727 }
 0x58d   : > { %v6074_v56 = vpop.eup %6073 }
 0x58e   : > { %v2471_v58 = vmul.f32 %v6074_v56, %v6072_v49 }
 0x590   : > { %5626 = vmatmul.mubr.msk.f32.vlgmr.msra.gmra.mxu1 %vm2460_vm7, %v2471_v58  ;;  %v1344_v58 = vld [vmem:[%s1338_s12] sm:$0xff]  ;;  %s6851_s12 = smov [#allocation33]  }
 0x591   : > { %5629 = vmatpush3.xpose.msk.msra.mxu1 %vm2371_vm3, %v2552_v55  ;;  %5632 = vmatprep.mubr.msk.f32.mxu1 %vm6844_vm1, %v6843_v6 }
 0x592   : > { %5630 = vmatprep.subr.mxu1 %v6843_v6 }
 0x595   : > { %5631 = vmatpush3.xpose.msk.msra.mxu1 %vm2371_vm3, %v2550_v60 }
 0x596   : > { %5649 = vmatprep.subr.mxu1 %v6843_v6 }
 0x598   : > { %5633 = vmatmul.mubr.msk.f32.vlgmr.msra.gmra.mxu1 %vm2371_vm3, %v2548_v61 }
 0x599   : > { %5653 = vmatprep.mubr.msk.f32.mxu1 %vm6844_vm1, %v6843_v6 }
 0x650   : > { %v7600_v62 = vpop.f32.mrf.mxu1 }
 0x652   : > { %v5627_v63 = vpop.f32.mrf.mxu1 }
 0x658   : > { %v2625_v1 = vpop.f32.mrf.mxu1 }
 0x659   : > { %v2629_v2 = vsel %vm7551_vm6, %v2625_v1, -1e+09 }
 0x65a   : > { %v2630_v3 = vmul.f32 0.35355338, %v2629_v2  ;;  %v5634_v4 = vpop.f32.mrf.mxu1 }
 0x65c   : > { %v2631_v5 = vsel %vm2460_vm7, %v2630_v3, -inf }
 0x65d   : > { %2632 = vmax.xlane.f32.xlu0 %v2631_v5 }
 0x673   : > { %2725 = vrot.lane.b32.xlu0 %v7522_v21, %s6846_s16 }
 0x6e6   : > { %v2633_v7 = vpop.xlane.xlu0 %2632 }
 0x6e7   : > { %v2634_v8 = vsub.f32 %v2630_v3, %v2633_v7 }
 0x6e9   : > { %v2635_v9 = vmul.f32 1.442695, %v2634_v8 }
 0x6ea   : > { %v2726_v30 = vpop.permute.xlu0 %2725 }
 0x6eb   : > { %6075 = vpow2.f32 %v2635_v9 }
 0x6f8   : > { %v6076_v12 = vpop.eup %6075 }
 0x6f9   : > { %v2637_v13 = vsel %vm2460_vm7, %v6076_v12, 0.0 }
 0x6fa   : > { %2638 = vadd.xlane.f32.xlu1 %v2637_v13 }
 0x70b   : > { %2723 = vrot.lane.b32.xlu1 %v7527_v23, %s6846_s16 }
 0x783   : > { %v2639_v20 = vpop.xlane.xlu1 %2638 }
 0x784   : > { %6077 = vrcp.f32 %v2639_v20 }
 0x787   : > { %v2724_v31 = vpop.permute.xlu1 %2723 }
 0x791   : > { %v6078_v22 = vpop.eup %6077 }
 0x792   : > { %v2641_v26 = vmul.f32 %v6078_v22, %v6076_v12  ;;  %v5289_v22 = vld [vmem:[#allocation23 + $0x1] ss:$0 sm:$0xff] }
 0x794   : > { %5640 = vmatmul.mubr.msk.f32.vlgmr.msra.gmra.mxu0 %vm2460_vm7, %v2641_v26  ;;  %v2353_v26 = vld [vmem:[#allocation26] sm:$0x1] }
 0x795   : > { %5643 = vmatpush3.xpose.msk.msra.mxu0 %vm2371_vm3, %v2728_v19  ;;  %5646 = vmatprep.mubr.msk.f32.mxu0 %vm6844_vm1, %v6843_v6 }
 0x796   : > { %5644 = vmatprep.subr.mxu0 %v6843_v6 }
 0x799   : > { %5645 = vmatpush3.xpose.msk.msra.mxu0 %vm2371_vm3, %v2726_v30  ;;  %v2253_v30 = vadd.f32 %v5289_v22, %v7545_v27  ;;  %v1346_v27 = vld [vmem:[%s1148_s25] sm:$0x1]  ;;  %s8144_s25 = sld [smem:[#allocation69_spill]] }
 0x79a   : > { %5663 = vmatprep.subr.mxu0 %v6843_v6  ;;  %vm3172_vm8 = vcmp.gt.f32.partialorder %v1346_v27, 0.0 }
 0x79c   : > { %5647 = vmatmul.mubr.msk.f32.vlgmr.msra.gmra.mxu0 %vm2371_vm3, %v2724_v31 }
 0x79d   : > { %5667 = vmatprep.mubr.msk.f32.mxu0 %vm6844_vm1, %v6843_v6 }
 0x854   : > { %v7624_v32 = vpop.f32.mrf.mxu0 }
 0x856   : > { %v5641_v33 = vpop.f32.mrf.mxu0 }
 0x85c   : > { %v2801_v35 = vpop.f32.mrf.mxu0 }
 0x85d   : > { %v2805_v36 = vsel %vm7551_vm6, %v2801_v35, -1e+09  ;;  %v3173_v35 = vsel %vm3172_vm8, 1, %v6842_v0 }
 0x85e   : > { %v2806_v37 = vmul.f32 0.35355338, %v2805_v36  ;;  %v5648_v38 = vpop.f32.mrf.mxu0  ;;  %v3177_v36 = vrot.slane %v3173_v35, %v7504_v59 }
 0x860   : > { %v2807_v39 = vsel %vm2460_vm7, %v2806_v37, -inf  ;;  %vm7740_vm9 = vcmp.eq.s32.totalorder %v3177_v36, 1 }
 0x861   : > { %2808 = vmax.xlane.f32.xlu1 %v2807_v39 }
 0x872   : > { %2820 = vrot.lane.b32.xlu1 %v7529_v24, %s6846_s16 }
 0x876   : > { %2902 = vrot.lane.b32.xlu1 %v7515_v17, %s6847_s15 }
 0x87a   : > { %2900 = vrot.lane.b32.xlu1 %v7522_v21, %s6847_s15 }
 0x87e   : > { %2898 = vrot.lane.b32.xlu1 %v7527_v23, %s6847_s15 }
 0x8ea   : > { %v2809_v40 = vpop.xlane.xlu1 %2808 }
 0x8eb   : > { %v2810_v41 = vsub.f32 %v2806_v37, %v2809_v40 }
 0x8ed   : > { %v2811_v42 = vmul.f32 1.442695, %v2810_v41 }
 0x8ee   : > { %v2821_v43 = vpop.permute.xlu1 %2820 }
 0x8ef   : > { %6079 = vpow2.f32 %v2811_v42  ;;  %5650 = vmatpush3.msk.msra.mxu1 %vm2345_vm4, %v2821_v43 }
 0x8f0   : > { %5651 = vmatprep.subr.mxu1 %v6843_v6 }
 0x8f2   : > { %v2903_v23 = vpop.permute.xlu1 %2902 }
 0x8f6   : > { %v2901_v49 = vpop.permute.xlu1 %2900 }
 0x8fa   : > { %v2899_v52 = vpop.permute.xlu1 %2898 }
 0x8fc   : > { %v6080_v44 = vpop.eup %6079 }
 0x8fd   : > { %v2813_v45 = vsel %vm2460_vm7, %v6080_v44, 0.0 }
 0x8fe   : > { %2814 = vadd.xlane.f32.xlu0 %v2813_v45 }
 0x914   : > { %2818 = vrot.lane.b32.xlu0 %v7541_v29, %s6846_s16 }
 0x987   : > { %v2815_v17 = vpop.xlane.xlu0 %2814 }
 0x988   : > { %6081 = vrcp.f32 %v2815_v17 }
 0x98b   : > { %v2819_v21 = vpop.permute.xlu0 %2818 }
 0x98c   : > { %5652 = vmatpush3.msra.mxu1 %v2819_v21  ;;  %v1347_v21 = vld [vmem:[%s1156_s1] sm:$0x1]  ;;  %s6848_s1 = smov 8  }
 0x98d   : > { %5656 = vmatprep.subr.mxu1 %v6843_v6  ;;  %vm3860_vm10 = vcmp.gt.f32.partialorder %v1347_v21, 0.0 }
 0x995   : > { %v6082_v46 = vpop.eup %6081 }
 0x996   : > { %v2817_v47 = vmul.f32 %v6082_v46, %v6080_v44 }
 0x998   : > { %5654 = vmatmul.mubr.msk.f32.vlgmr.msra.gmra.mxu1 %vm2460_vm7, %v2817_v47 }
 0x999   : > { %5657 = vmatpush3.xpose.msk.msra.mxu1 %vm2371_vm3, %v2903_v23  ;;  %5660 = vmatprep.mubr.msk.f32.mxu1 %vm6844_vm1, %v6843_v6 }
 0x99a   : > { %5658 = vmatprep.subr.mxu1 %v6843_v6 }
 0x99d   : > { %5659 = vmatpush3.xpose.msk.msra.mxu1 %vm2371_vm3, %v2901_v49 }
 0x99e   : > { %5675 = vmatprep.subr.mxu1 %v6843_v6 }
 0x9a0   : > { %5661 = vmatmul.mubr.msk.f32.vlgmr.msra.gmra.mxu1 %vm2371_vm3, %v2899_v52 }
 0x9a1   : > { %5676 = vmatpush3.msra.mxu1 %v7652_v51  ;;  %5677 = vmatprep.mubr.msk.f32.mxu1 %vm6844_vm1, %v6843_v6 }
 0x9a2   : > { %5685 = vmatprep.subr.mxu1 %v6843_v6 }
 0xa58   : > { %v7659_v57 = vpop.f32.mrf.mxu1 }
 0xa5a   : > { %v5655_v53 = vpop.f32.mrf.mxu1 }
 0xa5b   : > { %v3861_v53 = vsel %vm3860_vm10, 1, %v6842_v0 }
 0xa60   : > { %v2976_v54 = vpop.f32.mrf.mxu1 }
 0xa61   : > { %v2980_v25 = vsel %vm7551_vm6, %v2976_v54, -1e+09 }
 0xa62   : > { %v2981_v55 = vmul.f32 0.35355338, %v2980_v25  ;;  %v5662_v28 = vpop.f32.mrf.mxu1 }
 0xa64   : > { %v2982_v56 = vsel %vm2460_vm7, %v2981_v55, -inf }
 0xa65   : > { %2983 = vmax.xlane.f32.xlu1 %v2982_v56 }
 0xa76   : > { %2995 = vrot.lane.b32.xlu1 %v7529_v24, %s6847_s15  ;;  %v5291_v24 = vld [vmem:[#allocation23 + $0x2] ss:$0 sm:$0xff] }
 0xa77   : > { %v2337_v2 = vadd.f32 %v5291_v24, %v7612_v16 }
 0xa7a   : > { %3267 = vrot.lane.b32.xlu1 %v7510_v10, %s6845_s2 }
 0xa7e   : > { %2169 = vperm.xlu1 %6057, %v1344_v58   ;;  %v3865_v58 = vrot.slane %v3861_v53, %v7504_v59  ;;  %v2359_v53 = vld [vmem:[#allocation26 + $0x1] sm:$0x1] }
 0xa80   : > { %vm7760_vm11 = vcmp.eq.s32.totalorder %v3865_v58, 1 }
 0xa82   : > { %3435 = vrot.lane.b32.xlu1 %v7510_v10, %s6846_s16 }
 0xa86   : > { %3602 = vrot.lane.b32.xlu1 %v7510_v10, %s6847_s15 }
 0xaee   : > { %v2984_v34 = vpop.xlane.xlu1 %2983 }
 0xaef   : > { %v2985_v60 = vsub.f32 %v2981_v55, %v2984_v34 }
 0xaf1   : > { %v2986_v61 = vmul.f32 1.442695, %v2985_v60 }
 0xaf2   : > { %v2996_v63 = vpop.permute.xlu1 %2995 }
 0xaf3   : > { %6083 = vpow2.f32 %v2986_v61  ;;  %5664 = vmatpush3.msk.msra.mxu0 %vm2345_vm4, %v2996_v63 }
 0xaf4   : > { %5665 = vmatprep.subr.mxu0 %v6843_v6 }
 0xaf6   : > { %v3268_v1 = vpop.permute.xlu1 %3267 }
 0xafa   : > { %v2170_v3 = vpop.permute.xlu1 %2169 }
 0xafb   : > { %v7677_v4 = vmul.f32 %v2337_v2, %v2170_v3  ;;  %v7727_v33 = vmul.f32 %v2253_v30, %v2170_v3 }
 0xafe   : > { %v3436_v16 = vpop.permute.xlu1 %3435 }
 0xb00   : > { %v6084_v5 = vpop.eup %6083 }
 0xb01   : > { %v2988_v7 = vsel %vm2460_vm7, %v6084_v5, 0.0 }
 0xb02   : > { %2989 = vadd.xlane.f32.xlu0 %v2988_v7  ;;  %v3603_v19 = vpop.permute.xlu1 %3602 }
 0xb18   : > { %2993 = vrot.lane.b32.xlu0 %v7541_v29, %s6847_s15 }
 0xb1c   : > { %3265 = vrot.lane.b32.xlu0 %v7512_v11, %s6845_s2 }
 0xb20   : > { %3433 = vrot.lane.b32.xlu0 %v7512_v11, %s6846_s16 }
 0xb24   : > { %3600 = vrot.lane.b32.xlu0 %v7512_v11, %s6847_s15 }
 0xb8b   : > { %v2990_v8 = vpop.xlane.xlu0 %2989 }
 0xb8c   : > { %6085 = vrcp.f32 %v2990_v8 }
 0xb8f   : > { %v2994_v9 = vpop.permute.xlu0 %2993 }
 0xb90   : > { %5666 = vmatpush3.msra.mxu0 %v2994_v9 }
 0xb91   : > { %5670 = vmatprep.subr.mxu0 %v6843_v6 }
 0xb93   : > { %v3266_v29 = vpop.permute.xlu0 %3265 }
 0xb97   : > { %v3434_v18 = vpop.permute.xlu0 %3433 }
 0xb99   : > { %v6086_v12 = vpop.eup %6085 }
 0xb9a   : > { %v2992_v13 = vmul.f32 %v6086_v12, %v6084_v5 }
 0xb9b   : > { %v3601_v20 = vpop.permute.xlu0 %3600 }
 0xb9c   : > { %5668 = vmatmul.mubr.msk.f32.vlgmr.msra.gmra.mxu0 %vm2460_vm7, %v2992_v13 }
 0xb9d   : > { %5671 = vmatpush3.xpose.msk.msra.mxu0 %vm2371_vm3, %v7510_v10  ;;  %5672 = vmatprep.mubr.msk.f32.mxu0 %vm6844_vm1, %v6843_v6  ;;  %v2164_v10 = vadd.f32 %v5287_v15, %v7610_v14 }
 0xb9e   : > { %5680 = vmatprep.subr.mxu0 %v6843_v6 }
 0xba0   : > { %5673 = vmatmul.mubr.msk.f32.vlgmr.msra.gmra.mxu0 %vm2371_vm3, %v7512_v11  ;;  %v2172_v11 = vmul.f32 %v2170_v3, %v2164_v10 }
 0xba1   : > { %5681 = vmatpush3.xpose.msk.msra.mxu0 %vm2371_vm3, %v3268_v1  ;;  %5682 = vmatprep.mubr.msk.f32.mxu0 %vm6844_vm1, %v6843_v6 }
 0xba2   : > { %5690 = vmatprep.subr.mxu0 %v6843_v6  ;;  %v7712_v14 = vrot.slane %v2172_v11, 7 }
 0xba4   : > { %5683 = vmatmul.mubr.msk.f32.vlgmr.msra.gmra.mxu0 %vm2371_vm3, %v3266_v29  ;;  %v7723_v31 = vsel %vm2345_vm4, %v2353_v26, %v7712_v14 }
 0xba5   : > { %5691 = vmatpush3.xpose.msk.msra.mxu0 %vm2371_vm3, %v3436_v16  ;;  %5692 = vmatprep.mubr.msk.f32.mxu0 %vm6844_vm1, %v6843_v6 }
 0xba6   : > { %5700 = vmatprep.subr.mxu0 %v6843_v6 }
 0xba8   : > { %5693 = vmatmul.mubr.msk.f32.vlgmr.msra.gmra.mxu0 %vm2371_vm3, %v3434_v18 }
 0xba9   : > { %5701 = vmatpush3.xpose.msk.msra.mxu0 %vm2371_vm3, %v3603_v19  ;;  %5702 = vmatprep.mubr.msk.f32.mxu0 %vm6844_vm1, %v6843_v6 }
 0xbaa   : > { %5710 = vmatprep.subr.mxu0 %v6843_v6 }
 0xbac   : > { %5703 = vmatmul.mubr.msk.f32.vlgmr.msra.gmra.mxu0 %vm2371_vm3, %v3601_v20 }
 0xbad   : > { %5711 = vmatpush3.xpose.msk.msra.mxu0 %vm2371_vm3, %v7712_v14  ;;  %5714 = vmatprep.mubr.msk.f32.mxu0 %vm6844_vm1, %v6843_v6 }
 0xbae   : > { %5712 = vmatprep.subr.mxu0 %v6843_v6 }
 0xbb1   : > { %5713 = vmatpush3.xpose.msk.msra.mxu0 %vm2371_vm3, %v7723_v31 }
 0xbb2   : > { %5731 = vmatprep.subr.mxu0 %v6843_v6 }
 0xbb4   : > { %5715 = vmatmul.mubr.msk.f32.vlgmr.msra.gmra.mxu0 %vm2371_vm3, %v7727_v33 }
 0xbb5   : > { %5735 = vmatprep.mubr.msk.f32.mxu0 %vm6844_vm1, %v6843_v6 }
 0xc5c   : > { %v7738_v37 = vpop.f32.mrf.mxu0 }
 0xc5e   : > { %v5669_v38 = vpop.f32.mrf.mxu0 }
 0xc60   : > { %v3168_v40 = vpop.f32.mrf.mxu0 }
 0xc61   : > { %v3179_v41 = vsel %vm7740_vm9, %v3168_v40, -1e+09 }
 0xc62   : > { %v3180_v42 = vmul.f32 0.35355338, %v3179_v41  ;;  %v5674_v43 = vpop.f32.mrf.mxu0 }
 0xc64   : > { %v3339_v44 = vpop.f32.mrf.mxu0  ;;  %v3181_v45 = vsel %vm2371_vm3, %v3180_v42, -inf }
 0xc65   : > { %v3343_v17 = vsel %vm7740_vm9, %v3339_v44, -1e+09  ;;  %3182 = vmax.xlane.f32.xlu1 %v3181_v45 }
 0xc66   : > { %v3344_v23 = vmul.f32 0.35355338, %v3343_v17  ;;  %v5684_v46 = vpop.f32.mrf.mxu0 }
 0xc68   : > { %v3507_v47 = vpop.f32.mrf.mxu0  ;;  %v3345_v48 = vsel %vm2371_vm3, %v3344_v23, -inf }
 0xc69   : > { %v3511_v49 = vsel %vm7740_vm9, %v3507_v47, -1e+09  ;;  %3346 = vmax.xlane.f32.xlu0 %v3345_v48 }
 0xc6a   : > { %v3512_v50 = vmul.f32 0.35355338, %v3511_v49  ;;  %v5694_v52 = vpop.f32.mrf.mxu0 }
 0xc6c   : > { %v3674_v54 = vpop.f32.mrf.mxu0  ;;  %v3513_v25 = vsel %vm2371_vm3, %v3512_v50, -inf }
 0xc6d   : > { %v3678_v55 = vsel %vm7740_vm9, %v3674_v54, -1e+09  ;;  %3514 = vmax.xlane.f32.xlu0 %v3513_v25 }
 0xc6e   : > { %v3679_v28 = vmul.f32 0.35355338, %v3678_v55  ;;  %v5704_v56 = vpop.f32.mrf.mxu0 }
 0xc70   : > { %v3680_v34 = vsel %vm2371_vm3, %v3679_v28, -inf }
 0xc71   : > { %3681 = vmax.xlane.f32.xlu1 %v3680_v34 }
 0xc74   : > { %v3856_v61 = vpop.f32.mrf.mxu0 }
 0xc75   : > { %v3867_v0 = vsel %vm7760_vm11, %v3856_v61, -1e+09 }
 0xc76   : > { %v3868_v63 = vmul.f32 0.35355338, %v3867_v0  ;;  %v5716_v24 = vpop.f32.mrf.mxu0 }
 0xc78   : > { %v3869_v1 = vsel %vm2460_vm7, %v3868_v63, -inf }
 0xc79   : > { %3870 = vmax.xlane.f32.xlu0 %v3869_v1 }
 0xcee   : > { %v3183_v2 = vpop.xlane.xlu1 %3182 }
 0xcef   : > { %v3184_v3 = vsub.f32 %v3180_v42, %v3183_v2 }
 0xcf1   : > { %v3185_v5 = vmul.f32 1.442695, %v3184_v3 }
 0xcf2   : > { %v3347_v59 = vpop.xlane.xlu0 %3346 }
 0xcf3   : > { %6087 = vpow2.f32 %v3185_v5  ;;  %v3348_v7 = vsub.f32 %v3344_v23, %v3347_v59 }
 0xcf5   : > { %v3349_v8 = vmul.f32 1.442695, %v3348_v7 }
 0xcf6   : > { %v3515_v9 = vpop.xlane.xlu0 %3514 }
 0xcf7   : > { %6089 = vpow2.f32 %v3349_v8  ;;  %v3516_v12 = vsub.f32 %v3512_v50, %v3515_v9  ;;  %v7796_v50 = vrot.slane %v7677_v4, 7 }
 0xcf9   : > { %v3517_v13 = vmul.f32 1.442695, %v3516_v12  ;;  %v7807_v54 = vsel %vm2345_vm4, %v2359_v53, %v7796_v50 }
 0xcfa   : > { %v3682_v29 = vpop.xlane.xlu1 %3681 }
 0xcfb   : > { %6091 = vpow2.f32 %v3517_v13  ;;  %v3683_v15 = vsub.f32 %v3679_v28, %v3682_v29 }
 0xcfd   : > { %v3684_v16 = vmul.f32 1.442695, %v3683_v15 }
 0xcff   : > { %6093 = vpow2.f32 %v3684_v16 }
 0xd00   : > { %v6088_v10 = vpop.eup %6087 }
 0xd01   : > { %v3187_v18 = vsel %vm2371_vm3, %v6088_v10, 0.0 }
 0xd02   : > { %3188 = vadd.xlane.f32.xlu1 %v3187_v18  ;;  %v3871_v27 = vpop.xlane.xlu0 %3870 }
 0xd03   : > { %v3872_v35 = vsub.f32 %v3868_v63, %v3871_v27 }
 0xd04   : > { %v6090_v11 = vpop.eup %6089 }
 0xd05   : > { %v3351_v19 = vsel %vm2371_vm3, %v6090_v11, 0.0  ;;  %v3873_v36 = vmul.f32 1.442695, %v3872_v35 }
 0xd06   : > { %3352 = vadd.xlane.f32.xlu0 %v3351_v19 }
 0xd07   : > { %6095 = vpow2.f32 %v3873_v36 }
 0xd08   : > { %v6092_v20 = vpop.eup %6091 }
 0xd09   : > { %v3519_v22 = vsel %vm2371_vm3, %v6092_v20, 0.0 }
 0xd0a   : > { %3520 = vadd.xlane.f32.xlu1 %v3519_v22 }
 0xd0c   : > { %v6094_v26 = vpop.eup %6093 }
 0xd0d   : > { %v3686_v30 = vsel %vm2371_vm3, %v6094_v26, 0.0 }
 0xd0e   : > { %3687 = vadd.xlane.f32.xlu0 %v3686_v30 }
 0xd14   : > { %v6096_v38 = vpop.eup %6095 }
 0xd15   : > { %v3875_v39 = vsel %vm2460_vm7, %v6096_v38, 0.0 }
 0xd1b   : > { %3524 = vrot.lane.b32.xlu1 %v7652_v51, %s6846_s16 }
 0xd1f   : > { %3691 = vrot.lane.b32.xlu1 %v7652_v51, %s6847_s15 }
 0xd24   : > { %3357 = vrot.lane.b32.xlu0 %v7652_v51, %s6845_s2 }
 0xd28   : > { %3959 = vrot.lane.b32.xlu0 %v7712_v14, %s6845_s2 }
 0xd2c   : > { %3955 = vrot.lane.b32.xlu0 %v7727_v33, %s6845_s2 }
 0xd43   : > { %3876 = vadd.xlane.f32.xlu1 %v3875_v39 }
 0xd54   : > { %3957 = vrot.lane.b32.xlu1 %v7723_v31, %s6845_s2 }
 0xd8b   : > { %v3189_v40 = vpop.xlane.xlu1 %3188 }
 0xd8c   : > { %6097 = vrcp.f32 %v3189_v40 }
 0xd8f   : > { %v3353_v51 = vpop.xlane.xlu0 %3352 }
 0xd90   : > { %6099 = vrcp.f32 %v3353_v51 }
 0xd93   : > { %v3521_v41 = vpop.xlane.xlu1 %3520 }
 0xd94   : > { %6101 = vrcp.f32 %v3521_v41 }
 0xd97   : > { %v3688_v42 = vpop.xlane.xlu0 %3687  ;;  %v3525_v21 = vpop.permute.xlu1 %3524 }
 0xd98   : > { %6103 = vrcp.f32 %v3688_v42 }
 0xd99   : > { %v6098_v43 = vpop.eup %6097 }
 0xd9a   : > { %v3191_v44 = vmul.f32 %v6098_v43, %v6088_v10 }
 0xd9b   : > { %v3358_v45 = vpop.permute.xlu0 %3357  ;;  %v3692_v48 = vpop.permute.xlu1 %3691 }
 0xd9c   : > { %5678 = vmatmul.mubr.msk.f32.vlgmr.msra.gmra.mxu1 %vm2371_vm3, %v3191_v44 }
 0xd9d   : > { %v6100_v17 = vpop.eup %6099  ;;  %5686 = vmatpush3.msra.mxu1 %v3358_v45  ;;  %5687 = vmatprep.mubr.msk.f32.mxu1 %vm6844_vm1, %v6843_v6 }
 0xd9e   : > { %5695 = vmatprep.subr.mxu1 %v6843_v6  ;;  %v3355_v23 = vmul.f32 %v6100_v17, %v6090_v11 }
 0xd9f   : > { %v3960_v28 = vpop.permute.xlu0 %3959 }
 0xda0   : > { %5688 = vmatmul.mubr.msk.f32.vlgmr.msra.gmra.mxu1 %vm2371_vm3, %v3355_v23 }
 0xda1   : > { %v6102_v46 = vpop.eup %6101  ;;  %5696 = vmatpush3.msra.mxu1 %v3525_v21  ;;  %5697 = vmatprep.mubr.msk.f32.mxu1 %vm6844_vm1, %v6843_v6 }
 0xda2   : > { %5705 = vmatprep.subr.mxu1 %v6843_v6  ;;  %v3523_v47 = vmul.f32 %v6102_v46, %v6092_v20 }
 0xda3   : > { %v3956_v58 = vpop.permute.xlu0 %3955 }
 0xda4   : > { %5698 = vmatmul.mubr.msk.f32.vlgmr.msra.gmra.mxu1 %vm2371_vm3, %v3523_v47 }
 0xda5   : > { %v6104_v49 = vpop.eup %6103  ;;  %5706 = vmatpush3.msra.mxu1 %v3692_v48  ;;  %5707 = vmatprep.mubr.msk.f32.mxu1 %vm6844_vm1, %v6843_v6 }
 0xda6   : > { %5717 = vmatprep.subr.mxu1 %v6843_v6  ;;  %v3690_v52 = vmul.f32 %v6104_v49, %v6094_v26 }
 0xda8   : > { %5708 = vmatmul.mubr.msk.f32.vlgmr.msra.gmra.mxu1 %vm2371_vm3, %v3690_v52 }
 0xda9   : > { %5718 = vmatpush3.msk.msra.mxu1 %vm2345_vm4, %v7796_v50  ;;  %5721 = vmatprep.mubr.msk.f32.mxu1 %vm6844_vm1, %v6843_v6 }
 0xdaa   : > { %5719 = vmatprep.subr.mxu1 %v6843_v6 }
 0xdab   : > { %5720 = vmatpush3.msra.mxu1 %v7807_v54 }
 0xdac   : > { %5724 = vmatprep.subr.mxu1 %v6843_v6 }
 0xdcc   : > { %v3877_v4 = vpop.xlane.xlu1 %3876 }
 0xdcd   : > { %6105 = vrcp.f32 %v3877_v4 }
 0xdd0   : > { %v3958_v56 = vpop.permute.xlu1 %3957 }
 0xdda   : > { %v6106_v25 = vpop.eup %6105 }
 0xddb   : > { %v3879_v55 = vmul.f32 %v6106_v25, %v6096_v38 }
 0xddd   : > { %5722 = vmatmul.mubr.msk.f32.vlgmr.msra.gmra.mxu1 %vm2460_vm7, %v3879_v55 }
 0xdde   : > { %5725 = vmatpush3.xpose.msk.msra.mxu1 %vm2371_vm3, %v3960_v28  ;;  %5728 = vmatprep.mubr.msk.f32.mxu1 %vm6844_vm1, %v6843_v6 }
 0xddf   : > { %5726 = vmatprep.subr.mxu1 %v6843_v6 }
 0xde2   : > { %5727 = vmatpush3.xpose.msk.msra.mxu1 %vm2371_vm3, %v3958_v56 }
 0xde3   : > { %5745 = vmatprep.subr.mxu1 %v6843_v6 }
 0xde5   : > { %5729 = vmatmul.mubr.msk.f32.vlgmr.msra.gmra.mxu1 %vm2371_vm3, %v3956_v58 }
 0xde6   : > { %5749 = vmatprep.mubr.msk.f32.mxu1 %vm6844_vm1, %v6843_v6 }
 0xe5c   : > { %v7821_v34 = vpop.f32.mrf.mxu1 }
 0xe5e   : > { %v5679_v61 = vpop.f32.mrf.mxu1 }
 0xe60   : > { %v7823_v0 = vpop.f32.mrf.mxu1 }
 0xe62   : > { %v5689_v63 = vpop.f32.mrf.mxu1 }
 0xe63   : > { %v4586_v63 = vld [vmem:[%s8144_s25 + $0x18] sm:$0xff] }
 0xe64   : > { %v7825_v24 = vpop.f32.mrf.mxu1 }
 0xe66   : > { %v5699_v1 = vpop.f32.mrf.mxu1 }
 0xe67   : > { %v4583_v1 = vld [vmem:[%s8144_s25] sm:$0xff] }
 0xe68   : > { %v7827_v2 = vpop.f32.mrf.mxu1 }
 0xe6a   : > { %v5709_v3 = vpop.f32.mrf.mxu1 }
 0xe9d   : > { %v7829_v5 = vpop.f32.mrf.mxu1 }
 0xe9f   : > { %v5723_v59 = vpop.f32.mrf.mxu1 }
 0xea5   : > { %v4033_v7 = vpop.f32.mrf.mxu1 }
 0xea6   : > { %v4037_v8 = vsel %vm7760_vm11, %v4033_v7, -1e+09 }
 0xea7   : > { %v4038_v9 = vmul.f32 0.35355338, %v4037_v8  ;;  %v5730_v12 = vpop.f32.mrf.mxu1 }
 0xea9   : > { %v4039_v13 = vsel %vm2460_vm7, %v4038_v9, -inf }
 0xeaa   : > { %4040 = vmax.xlane.f32.xlu1 %v4039_v13 }
 0xebb   : > { %4051 = vrot.lane.b32.xlu1 %v7807_v54, %s6845_s2 }
 0xebf   : > { %4135 = vrot.lane.b32.xlu1 %v7712_v14, %s6846_s16 }
 0xec3   : > { %4131 = vrot.lane.b32.xlu1 %v7727_v33, %s6846_s16 }
 0xec7   : > { %4226 = vrot.lane.b32.xlu1 %v7807_v54, %s6846_s16 }
 0xf33   : > { %v4041_v29 = vpop.xlane.xlu1 %4040 }
 0xf34   : > { %v4042_v15 = vsub.f32 %v4038_v9, %v4041_v29 }
 0xf36   : > { %v4043_v16 = vmul.f32 1.442695, %v4042_v15 }
 0xf37   : > { %v4052_v20 = vpop.permute.xlu1 %4051 }
 0xf38   : > { %6107 = vpow2.f32 %v4043_v16 }
 0xf3b   : > { %v4136_v30 = vpop.permute.xlu1 %4135 }
 0xf3f   : > { %v4132_v35 = vpop.permute.xlu1 %4131 }
 0xf43   : > { %v4227_v21 = vpop.permute.xlu1 %4226 }
 0xf45   : > { %v6108_v10 = vpop.eup %6107 }
 0xf46   : > { %v4045_v18 = vsel %vm2460_vm7, %v6108_v10, 0.0 }
 0xf47   : > { %4046 = vadd.xlane.f32.xlu0 %v4045_v18 }
 0xf5d   : > { %4053 = vrot.lane.b32.xlu0 %v7796_v50, %s6845_s2  ;;  %s4789_s2 = scalar_lea.hbm %s7002_s3, %s7956_s17 }
 0xf61   : > { %4133 = vrot.lane.b32.xlu0 %v7723_v31, %s6846_s16 }
 0xfd0   : > { %v4047_v11 = vpop.xlane.xlu0 %4046 }
 0xfd1   : > { %6109 = vrcp.f32 %v4047_v11  ;;  %v6119_v11 = vld [vmem:[%s1123_s5] sm:$0xff]  ;;  %s8145_s5 = sld [smem:[#allocation70_spill]] }
 0xfd4   : > { %v4054_v19 = vpop.permute.xlu0 %4053 }
 0xfd5   : > { %5732 = vmatpush3.msk.msra.mxu0 %vm2345_vm4, %v4054_v19 }
 0xfd6   : > { %5733 = vmatprep.subr.mxu0 %v6843_v6 }
 0xfd7   : > { %5734 = vmatpush3.msra.mxu0 %v4052_v20 }
 0xfd8   : > { %5738 = vmatprep.subr.mxu0 %v6843_v6  ;;  %v4134_v27 = vpop.permute.xlu0 %4133 }
 0xfde   : > { %v6110_v22 = vpop.eup %6109 }
 0xfdf   : > { %v4049_v26 = vmul.f32 %v6110_v22, %v6108_v10  ;;  %v4500_v10 = vld [vmem:[#allocation28 + $0x18] sm:$0xff]  ;;  %v4498_v22 = vld [vmem:[#allocation28 + $0x8] sm:$0xff] }
 0xfe1   : > { %5736 = vmatmul.mubr.msk.f32.vlgmr.msra.gmra.mxu0 %vm2460_vm7, %v4049_v26  ;;  %v4497_v26 = vld [vmem:[#allocation28] sm:$0xff] }
 0xfe2   : > { %5739 = vmatpush3.xpose.msk.msra.mxu0 %vm2371_vm3, %v4136_v30  ;;  %5742 = vmatprep.mubr.msk.f32.mxu0 %vm6844_vm1, %v6843_v6  ;;  %v6120_v30 = vld [vmem:[%s1114_s29] sm:$0xff]  ;;  %s1319_s29 = scalar_lea.vmem [#allocation33], %s7335_s14 }
 0xfe3   : > { %5740 = vmatprep.subr.mxu0 %v6843_v6 }
 0xfe6   : > { %5741 = vmatpush3.xpose.msk.msra.mxu0 %vm2371_vm3, %v4134_v27 }
 0xfe7   : > { %5759 = vmatprep.subr.mxu0 %v6843_v6 }
 0xfe9   : > { %5743 = vmatmul.mubr.msk.f32.vlgmr.msra.gmra.mxu0 %vm2371_vm3, %v4132_v35  ;;  %v4672_v35 = vld [vmem:[#allocation31 + $0x18] sm:$0xff] }
 0xfea   : > { %5763 = vmatprep.mubr.msk.f32.mxu0 %vm6844_vm1, %v6843_v6 }
0x10a1   : > { %v7860_v36 = vpop.f32.mrf.mxu0 }
0x10a3   : > { %v5737_v38 = vpop.f32.mrf.mxu0 }
0x10a4   : > { %v4670_v38 = vld [vmem:[#allocation31 + $0x8] sm:$0xff] }
0x10a9   : > { %v4209_v39 = vpop.f32.mrf.mxu0 }
0x10aa   : > { %v4213_v40 = vsel %vm7760_vm11, %v4209_v39, -1e+09  ;;  %v4669_v39 = vld [vmem:[#allocation31] sm:$0xff] }
0x10ab   : > { %v4214_v51 = vmul.f32 0.35355338, %v4213_v40  ;;  %v5744_v41 = vpop.f32.mrf.mxu0  ;;  %v5347_v40 = vld [vmem:[%s8145_s5] ss:$0 sm:$0xff] }
0x10ad   : > { %v4215_v42 = vsel %vm2460_vm7, %v4214_v51, -inf }
0x10ae   : > { %4216 = vmax.xlane.f32.xlu0 %v4215_v42 }
0x10c4   : > { %4228 = vrot.lane.b32.xlu0 %v7796_v50, %s6846_s16  ;;  %s4791_s16 = sshll.u32 %s1319_s29, 4  ;;  %s4792_s16 = int_to_ptr.vmem [resolvable:$true] %s4791_s16 }
0x10c5   : > { %s6628_s19 = scalar_lea.vmem %s4792_s16, 128 }
0x10c6   : > { %p6629_p13 = scmp.ne.s32.totalorder %s4792_s16, %s6628_s19 }
0x10c8   : > { %4310 = vrot.lane.b32.xlu0 %v7712_v14, %s6847_s15  ;;  %p6630_p4 = pnand %p6629_p13, %p8146_p1 }
0x10ca   : > { %p6631_p2 = pneg %p6630_p4 }
0x10cc   : > { %4306 = vrot.lane.b32.xlu0 %v7727_v33, %s6847_s15 }
0x1137   : > { %v4217_v43 = vpop.xlane.xlu0 %4216 }
0x1138   : > { %v4218_v44 = vsub.f32 %v4214_v51, %v4217_v43 }
0x113a   : > { %v4219_v45 = vmul.f32 1.442695, %v4218_v44 }
0x113b   : > { %v4229_v17 = vpop.permute.xlu0 %4228 }
0x113c   : > { %6111 = vpow2.f32 %v4219_v45  ;;  %5746 = vmatpush3.msk.msra.mxu1 %vm2345_vm4, %v4229_v17  ;;  %v5345_v45 = vld [vmem:[#allocation29] ss:$0 sm:$0xff] }
0x113d   : > { %5747 = vmatprep.subr.mxu1 %v6843_v6 }
0x113e   : > { %5748 = vmatpush3.msra.mxu1 %v4227_v21 }
0x113f   : > { %5752 = vmatprep.subr.mxu1 %v6843_v6  ;;  %v4311_v48 = vpop.permute.xlu0 %4310 }
0x1149   : > { %v6112_v23 = vpop.eup %6111 }
0x114a   : > { %v4221_v46 = vsel %vm2460_vm7, %v6112_v23, 0.0 }
0x114b   : > { %4222 = vadd.xlane.f32.xlu1 %v4221_v46 }
0x115c   : > { %4308 = vrot.lane.b32.xlu1 %v7723_v31, %s6847_s15  ;;  %v4307_v31 = vpop.permute.xlu0 %4306 }
0x11d4   : > { %v4223_v14 = vpop.xlane.xlu1 %4222 }
0x11d5   : > { %6113 = vrcp.f32 %v4223_v14 }
0x11d8   : > { %v4309_v49 = vpop.permute.xlu1 %4308 }
0x11e2   : > { %v6114_v33 = vpop.eup %6113 }
0x11e3   : > { %v4225_v47 = vmul.f32 %v6114_v33, %v6112_v23 }
0x11e5   : > { %5750 = vmatmul.mubr.msk.f32.vlgmr.msra.gmra.mxu1 %vm2460_vm7, %v4225_v47 }
0x11e6   : > { %5753 = vmatpush3.xpose.msk.msra.mxu1 %vm2371_vm3, %v4311_v48  ;;  %5756 = vmatprep.mubr.msk.f32.mxu1 %vm6844_vm1, %v6843_v6 }
0x11e7   : > { %5754 = vmatprep.subr.mxu1 %v6843_v6 }
0x11ea   : > { %5755 = vmatpush3.xpose.msk.msra.mxu1 %vm2371_vm3, %v4309_v49  ;;  %v6121_v49 = vld [vmem:[%s1132_s28] sm:$0xff] }
0x11eb   : > { %5777 = vmatprep.subr.mxu1 %v6843_v6 }
0x11ed   : > { %5757 = vmatmul.mubr.msk.f32.vlgmr.msra.gmra.mxu1 %vm2371_vm3, %v4307_v31 }
0x11ee   : > { %5785 = vmatprep.mubr.msk.f32.mxu1 %vm6844_vm1, %v6843_v6  ;;  %5778 = vmatpush3.msra.mxu1 %v4586_v63 }
0x11ef   : > { %5779 = vmatprep.subr.mxu1 %v6843_v6 }
0x12a5   : > { %v4302_v52 = vpop.f32.mrf.mxu1 }
0x12a7   : > { %v5751_v53 = vpop.f32.mrf.mxu1 }
0x12ad   : > { %v4384_v4 = vpop.f32.mrf.mxu1 }
0x12ae   : > { %v4388_v25 = vsel %vm7760_vm11, %v4384_v4, -1e+09 }
0x12af   : > { %v4389_v55 = vmul.f32 0.35355338, %v4388_v25  ;;  %v5758_v28 = vpop.f32.mrf.mxu1 }
0x12b1   : > { %v4390_v56 = vsel %vm2460_vm7, %v4389_v55, -inf }
0x12b2   : > { %4391 = vmax.xlane.f32.xlu1 %v4390_v56 }
0x12c3   : > { %4401 = vrot.lane.b32.xlu1 %v7807_v54, %s6847_s15 }
0x12c7   : > { %3074 = vrot.lane.b32.xlu1 %v7624_v32, %s6848_s1 }
0x12cb   : > { %3082 = vrot.lane.b32.xlu1 %v7738_v37, %s6849_s6  ;;  %v4585_v37 = vld [vmem:[%s8144_s25 + $0x10] sm:$0xff] }
0x12cc   : > { %5780 = vmatpush3.msra.mxu1 %v4585_v37 }
0x12cd   : > { %5781 = vmatprep.subr.mxu1 %v6843_v6 }
0x12cf   : > { %3772 = vrot.lane.b32.xlu1 %v7825_v24, %s6850_s23  ;;  %v4584_v24 = vld [vmem:[%s8144_s25 + $0x8] sm:$0xff] }
0x12d0   : > { %5782 = vmatpush3.msra.mxu1 %v4584_v24 }
0x12d1   : > { %5783 = vmatprep.subr.mxu1 %v6843_v6 }
0x12d2   : > { %5784 = vmatpush3.msra.mxu1 %v4583_v1 }
0x12d3   : > { %3776 = vrot.lane.b32.xlu1 %v7827_v2, %s6849_s6 }
0x133b   : > { %v4392_v60 = vpop.xlane.xlu1 %4391 }
0x133c   : > { %v4393_v58 = vsub.f32 %v4389_v55, %v4392_v60 }
0x133e   : > { %v4394_v61 = vmul.f32 1.442695, %v4393_v58 }
0x133f   : > { %v4402_v2 = vpop.permute.xlu1 %4401 }
0x1340   : > { %6115 = vpow2.f32 %v4394_v61 }
0x1343   : > { %v3075_v3 = vpop.permute.xlu1 %3074 }
0x1344   : > { %v3085_v18 = vsel %vm2371_vm3, %v7600_v62, %v3075_v3 }
0x134d   : > { %v6116_v54 = vpop.eup %6115 }
0x134e   : > { %v4396_v32 = vsel %vm2460_vm7, %v6116_v54, 0.0 }
0x134f   : > { %4397 = vadd.xlane.f32.xlu0 %v4396_v32 }
0x1365   : > { %4403 = vrot.lane.b32.xlu0 %v7796_v50, %s6847_s15  ;;  %v3083_v50 = vpop.permute.xlu1 %3082  ;;  %s4760_s15 = scalar_lea.sflag [#allocation34], %s7344_s22 }
0x1369   : > { %3078 = vrot.lane.b32.xlu0 %v7659_v57, %s6850_s23  ;;  %v3773_v57 = vpop.permute.xlu1 %3772 }
0x136d   : > { %3768 = vrot.lane.b32.xlu0 %v7823_v0, %s6848_s1  ;;  %v3777_v13 = vpop.permute.xlu1 %3776 }
0x1371   : > { %4482 = vrot.lane.b32.xlu0 %v7860_v36, %s6848_s1  ;;  %v4671_v36 = vld [vmem:[#allocation31 + $0x10] sm:$0xff]  ;;  %s6632_s1 = sshll.u32 %s6851_s12, 4  ;;  %s6633_s1 = int_to_ptr.vmem [resolvable:$false] %s6632_s1 }
0x1372   : > { %p6635_p0 = scmp.lt.s32.totalorder %s4792_s16, %s6633_s1 }
0x1375   : > { %4486 = vrot.lane.b32.xlu0 %v4302_v52, %s6850_s23 }
0x13d8   : > { %v4398_v59 = vpop.xlane.xlu0 %4397 }
0x13d9   : > { %6117 = vrcp.f32 %v4398_v59 }
0x13dc   : > { %v4404_v7 = vpop.permute.xlu0 %4403 }
0x13dd   : > { %5760 = vmatpush3.msk.msra.mxu0 %vm2345_vm4, %v4404_v7 }
0x13de   : > { %5761 = vmatprep.subr.mxu0 %v6843_v6 }
0x13df   : > { %5762 = vmatpush3.msra.mxu0 %v4402_v2 }
0x13e0   : > { %v3079_v8 = vpop.permute.xlu0 %3078  ;;  %5766 = vmatprep.subr.mxu0 %v6843_v6 }
0x13e1   : > { %v3087_v20 = vsel %vm3086_vm12, %v3085_v18, %v3079_v8 }
0x13e2   : > { %v3089_v62 = vsel %vm3088_vm13, %v3087_v20, %v3083_v50 }
0x13e3   : > { %v4496_v27 = vadd.f32 %v6120_v30, %v3089_v62 }
0x13e4   : > { %v3769_v0 = vpop.permute.xlu0 %3768 }
0x13e5   : > { %v3779_v9 = vsel %vm2371_vm3, %v7821_v34, %v3769_v0  ;;  %v4499_v34 = vld [vmem:[#allocation28 + $0x10] sm:$0xff] }
0x13e6   : > { %v6118_v12 = vpop.eup %6117  ;;  %v3780_v29 = vsel %vm3086_vm12, %v3779_v9, %v3773_v57 }
0x13e7   : > { %v3781_v15 = vsel %vm3088_vm13, %v3780_v29, %v3777_v13  ;;  %v4400_v16 = vmul.f32 %v6118_v12, %v6116_v54 }
0x13e8   : > { %v4582_v19 = vadd.f32 %v6119_v11, %v3781_v15  ;;  %v4483_v23 = vpop.permute.xlu0 %4482 }
0x13e9   : > { %5764 = vmatmul.mubr.msk.f32.vlgmr.msra.gmra.mxu0 %vm2460_vm7, %v4400_v16  ;;  %v4493_v14 = vsel %vm2371_vm3, %v7829_v5, %v4483_v23 }
0x13ea   : > { %5767 = vmatpush3.msra.mxu0 %v4500_v10  ;;  %5786 = vmatmul.mubr.msk.f32.vlgmr.msra.gmra.mxu1 %vm1354_vm2, %v4582_v19 }
0x13eb   : > { %5768 = vmatprep.subr.mxu0 %v6843_v6  ;;  %5774 = vmatprep.mubr.msk.f32.mxu0 %vm6844_vm1, %v6843_v6 }
0x13ec   : > { %5769 = vmatpush3.msra.mxu0 %v4499_v34  ;;  %v4487_v46 = vpop.permute.xlu0 %4486 }
0x13ed   : > { %5770 = vmatprep.subr.mxu0 %v6843_v6  ;;  %v4494_v33 = vsel %vm3086_vm12, %v4493_v14, %v4487_v46 }
0x13ee   : > { %5771 = vmatpush3.msra.mxu0 %v4498_v22 }
0x13ef   : > { %5772 = vmatprep.subr.mxu0 %v6843_v6 }
0x13f0   : > { %5773 = vmatpush3.msra.mxu0 %v4497_v26 }
0x13f1   : > { %5775 = vmatmul.mubr.msk.f32.vlgmr.msra.gmra.mxu0 %vm1354_vm2, %v4496_v27  ;;  %5788 = vmatprep.subr.mxu0 %v6843_v6 }
0x13f2   : > { %5796 = vmatprep.mubr.msk.f32.mxu0 %vm6844_vm1, %v6843_v6  ;;  %5789 = vmatpush3.msra.mxu0 %v4672_v35 }
0x13f3   : > { %5790 = vmatprep.subr.mxu0 %v6843_v6 }
0x13f4   : > { %5791 = vmatpush3.msra.mxu0 %v4671_v36 }
0x13f5   : > { %5792 = vmatprep.subr.mxu0 %v6843_v6 }
0x13f6   : > { %5793 = vmatpush3.msra.mxu0 %v4670_v38 }
0x13f7   : > { %5794 = vmatprep.subr.mxu0 %v6843_v6 }
0x13f8   : > { %5795 = vmatpush3.msra.mxu0 %v4669_v39 }
0x14a9   : > { %v4477_v51 = vpop.f32.mrf.mxu0 }
0x14aa   : > { %v4663_v41 = vpop.f32.mrf.mxu1  ;;  %4490 = vrot.lane.b32.xlu1 %v4477_v51, %s6849_s6  ;;  %s6634_s6 = scalar_lea.vmem %s6633_s1, 256 }
0x14ab   : > { %v4664_v42 = vadd.f32 %v5347_v40, %v4663_v41  ;;  %v5765_v43 = vpop.f32.mrf.mxu0  ;;  %p6636_p6 = scmp.lt.s32.totalorder %s6634_s6, %s6628_s19 }
0x14ac   : > { %v5787_v44 = vpop.f32.mrf.mxu1 }
0x14ad   : > { %4667 = vst.msk [vmem:[%s1319_s29] sm:$0xff] %vm1354_vm2, %v4664_v42  ;;  %p6637_p7 = por %p6636_p6, %p6635_p0 }
0x14af   : > { %p6638_p3 = pnand %p6637_p7, %p6631_p2 }
0x14b1   : > { %v4577_v17 = vpop.f32.mrf.mxu0 }
0x14b2   : > { %v4578_v21 = vadd.f32 %v5345_v45, %v4577_v17 }
0x14b3   : > { %v5776_v6 = vpop.f32.mrf.mxu0 }
0x14b4   : > { %4581 = vst.msk [vmem:[%s1312_s0] sm:$0xff] %vm1354_vm2, %v4578_v21 }
0x151c   : > { %v4491_v47 = vpop.permute.xlu1 %4490 }
0x151d   : > { %v4495_v48 = vsel %vm3088_vm13, %v4494_v33, %v4491_v47 }
0x151e   : > { %v4668_v31 = vadd.f32 %v6121_v49, %v4495_v48 }
0x1520   : > { %5797 = vmatmul.mubr.msk.f32.vlgmr.msra.gmra.mxu0 %vm1354_vm2, %v4668_v31 }
0x1521   : > { %6641 = shalt.err (!%p6638_p3)
}
0x1522   : > { %s6642_s18 = scalar_lea.hbm %s4789_s2, 128  ;;  %s6646_s28 = scalar_lea.hbm %s7002_s3, 256 }
0x1523   : > { %p6643_p9 = scmp.ne.s32.totalorder %s4789_s2, %s6642_s18  ;;  %p6647_p8 = scmp.lt.s32.totalorder %s4789_s2, %s7002_s3 }
0x1524   : > { %p6648_p5 = scmp.lt.s32.totalorder %s6646_s28, %s6642_s18 }
0x1525   : > { %p6644_p11 = pnand %p6643_p9, %p8146_p1 }
0x1526   : > { %p6649_p12 = por %p6648_p5, %p6647_p8 }
0x1527   : > { %p6645_p10 = pneg %p6644_p11 }
0x1529   : > { %p6650_p13 = pnand %p6649_p12, %p6645_p10 }
0x152b   : > { %6653 = shalt.err (!%p6650_p13)
}
0x152c   : > { %s8147_s23 = sld [smem:[#allocation73_spill]]  ;;  %s4778_s29 = sshll.u32 %s1312_s0, 4  ;;  %s4779_s29 = int_to_ptr.vmem [resolvable:$true] %s4778_s29 }
0x152d   : > { %5868 = dma.vmem_to_hbm [thread:$0]  (%p8146_p1), %s4792_s16, 128, %s4789_s2, %s4760_s15  }
0x152e   : > { %s4755_s19 = scalar_lea.sflag [#allocation4], %s7332_s10  ;;  %s6654_s12 = scalar_lea.vmem %s4779_s29, 128 }
0x152f   : > { %p6655_p4 = scmp.ne.s32.totalorder %s4779_s29, %s6654_s12  ;;  %s6852_s1 = smov [#allocation32]  }
0x1530   : > { %s6658_s6 = sshll.u32 %s6852_s1, 4  ;;  %s6659_s6 = int_to_ptr.vmem [resolvable:$false] %s6658_s6 }
0x1531   : > { %p6656_p2 = pnand %p6655_p4, %p8146_p1  ;;  %s6660_s18 = scalar_lea.vmem %s6659_s6, 256 }
0x1532   : > { %s4776_s5 = scalar_lea.hbm %s8147_s23, %s7956_s17  ;;  %p6661_p6 = scmp.lt.s32.totalorder %s4779_s29, %s6659_s6 }
0x1533   : > { %p6657_p0 = pneg %p6656_p2  ;;  %p6662_p7 = scmp.lt.s32.totalorder %s6660_s18, %s6654_s12 }
0x1535   : > { %p6663_p3 = por %p6662_p7, %p6661_p6 }
0x1537   : > { %p6664_p9 = pnand %p6663_p3, %p6657_p0 }
0x1539   : > { %6667 = shalt.err (!%p6664_p9)
}
0x153a   : > { %s6668_s2 = scalar_lea.hbm %s4776_s5, 128  ;;  %s6672_s10 = scalar_lea.hbm %s8147_s23, 256 }
0x153b   : > { %p6669_p11 = scmp.ne.s32.totalorder %s4776_s5, %s6668_s2  ;;  %p6673_p5 = scmp.lt.s32.totalorder %s4776_s5, %s8147_s23 }
0x153c   : > { %p6674_p12 = scmp.lt.s32.totalorder %s6672_s10, %s6668_s2 }
0x153d   : > { %p6670_p10 = pnand %p6669_p11, %p8146_p1 }
0x153e   : > { %p6675_p13 = por %p6674_p12, %p6673_p5 }
0x153f   : > { %p6671_p8 = pneg %p6670_p10 }
0x1541   : > { %p6676_p4 = pnand %p6675_p13, %p6671_p8 }
0x1543   : > { %6679 = shalt.err (!%p6676_p4)
}
0x1544   : > { %s8148_s0 = sld [smem:[#allocation72_spill]]  ;;  %s1326_s28 = scalar_lea.vmem [#allocation35], %s7335_s14 }
0x1545   : > { %s8149_s16 = sld [smem:[#allocation74_spill]]  ;;  %s4804_s12 = sshll.u32 %s1326_s28, 4  ;;  %s4805_s12 = int_to_ptr.vmem [resolvable:$true] %s4804_s12 }
0x1546   : > { %5867 = dma.vmem_to_hbm [thread:$0]  (%p8146_p1), %s4779_s29, 128, %s4776_s5, %s4755_s19  }
0x1547   : > { %s6680_s6 = scalar_lea.vmem %s4805_s12, 128  ;;  %s6853_s18 = smov [#allocation35]  }
0x1548   : > { %p6681_p2 = scmp.ne.s32.totalorder %s4805_s12, %s6680_s6  ;;  %s6684_s2 = sshll.u32 %s6853_s18, 4  ;;  %s6685_s2 = int_to_ptr.vmem [resolvable:$false] %s6684_s2 }
0x1549   : > { %s6686_s10 = scalar_lea.vmem %s6685_s2, 256  ;;  %p6687_p7 = scmp.lt.s32.totalorder %s4805_s12, %s6685_s2 }
0x154a   : > { %v5349_v5 = vld [vmem:[%s8148_s0] ss:$0 sm:$0xff]  ;;  %p6682_p0 = pnand %p6681_p2, %p8146_p1  ;;  %p6688_p3 = scmp.lt.s32.totalorder %s6686_s10, %s6680_s6 }
0x154b   : > { %s4802_s1 = scalar_lea.hbm %s8149_s16, %s7956_s17 }
0x154c   : > { %p6683_p6 = pneg %p6682_p0  ;;  %p6689_p9 = por %p6688_p3, %p6687_p7 }
0x154e   : > { %p6690_p11 = pnand %p6689_p9, %p6683_p6 }
0x15e0   : > { %v4749_v52 = vpop.f32.mrf.mxu0 }
0x15e1   : > { %v4750_v53 = vadd.f32 %v5349_v5, %v4749_v52 }
0x15e2   : > { %v5798_v4 = vpop.f32.mrf.mxu0 }
0x15e3   : > { %4753 = vst.msk [vmem:[%s1326_s28] sm:$0xff] %vm1354_vm2, %v4750_v53 }
0x15e4   : > { %6693 = shalt.err (!%p6690_p11)
}
0x15e5   : > { %s6694_s14 = scalar_lea.hbm %s4802_s1, 128  ;;  %s6698_s17 = scalar_lea.hbm %s8149_s16, 256 }
0x15e6   : > { %p6695_p10 = scmp.ne.s32.totalorder %s4802_s1, %s6694_s14  ;;  %p6699_p12 = scmp.lt.s32.totalorder %s4802_s1, %s8149_s16 }
0x15e7   : > { %p6700_p13 = scmp.lt.s32.totalorder %s6698_s17, %s6694_s14 }
0x15e8   : > { %p6696_p8 = pnand %p6695_p10, %p8146_p1 }
0x15e9   : > { %p6701_p4 = por %p6700_p13, %p6699_p12 }
0x15ea   : > { %p6697_p5 = pneg %p6696_p8 }
0x15ec   : > { %p6702_p2 = pnand %p6701_p4, %p6697_p5 }
0x15ee   : > { %6705 = shalt.err (!%p6702_p2)
}
0x15ef   : > { %5869 = dma.vmem_to_hbm [thread:$0]  (%p8146_p1), %s4805_s12, 128, %s4802_s1, %s4760_s15  }
0x15f0 PF: > { %s8150_s5 = sld [smem:[#allocation75_spill]]  ;;  %p8153_p6 = scmp.ge.s32.totalorder %s6788_s11, 2 }
0x15f1   : > { %s8151_s29 = sld [smem:[#allocation79_spill]] }
0x15f6   : > { %s4816_s19 = sand.u32 1, %s8150_s5  }
0x15f7   : > { %p8152_p0 = scmp.ne.s32.totalorder %s8151_s29, 0  ;;  %s4817_s0 = scalar_lea.sflag [#allocation4], %s4816_s19 }
0x15f9   : > { %p5933_p7 = pnand %p8153_p6, %p8152_p0 }
0x15fb   : > { %p5934_p3 = pneg %p5933_p7 }
0x15fd   : > { %6767 = dma.done.wait (%p5934_p3), %s4817_s0, 128  }
0x15fe   : > { %6769 = vsyncadd (%p5934_p3), %s4817_s0, 4294967168  ;;  %s8154_s28 = sadd.s32 4294967294, %s6788_s11  }
0x15ff   : > { %s4825_s6 = sand.u32 1, %s8154_s28  }
0x1600   : > { %s4826_s18 = scalar_lea.sflag [#allocation34], %s4825_s6 }
0x1601   : > { %6771 = dma.done.wait (%p5934_p3), %s4826_s18, 256  }
0x1602   : > { %6773 = vsyncadd (%p5934_p3), %s4826_s18, 4294967040  ;;  %s8155_s11 = sld [smem:[#allocation77_spill]]  ;;  %s8158_s0 = smov %s6780_s7 }
0x1603   : > { %s8156_s30 = sld [smem:[#allocation76_spill]] }
0x1604   : > { %s8157_s10 = sld [smem:[#allocation78_spill]] }
0x1608   : > { %p91_p1 = scmp.ge.s32.totalorder %s8155_s11, 4  }
0x1609   : > { %s8159_s7 = smov %s8156_s30 }
0x160a   :  { %93 = sbr.rel (!%p91_p1) target bundleno = 80 (0x50), region = 370 }
0x160f   :  { %4840 = vsyncpa [#allocation3], 1 }
0x1610   :  { %4842 = vsyncpa [#allocation3 + $0x1], 1 }
0x1611   :  { %4843 = vsyncpa [#allocation6], 1 }
0x1612   :  { %4845 = vsyncpa [#allocation6 + $0x1], 1 }
0x1613   :  { %4846 = vsyncpa [#allocation9], 1 }
0x1614   :  { %4848 = vsyncpa [#allocation9 + $0x1], 1 }
0x1615   :  { %4849 = vsyncpa [#allocation12], 1 }
0x1616   :  { %4851 = vsyncpa [#allocation12 + $0x1], 1 }
0x1617   :  { %4852 = vsyncpa [#allocation15], 1 }
0x1618   :  { %4853 = vsyncpa [#allocation18], 1 }
0x1619   :  { %4854 = vsyncpa [#allocation21], 1 }
0x161a   :  { %4855 = vsyncpa [#allocation24], 1 }
0x161b   :  { %4856 = vsyncpa [#allocation27], 1 }
0x161c   :  { %4857 = vsyncpa [#allocation30], 1 }
0x161d   :  { %4858 = vsyncpa [#allocation4], 1 }
0x161e   :  { %4860 = vsyncpa [#allocation4 + $0x1], 1 }
0x161f   :  { %4861 = vsyncpa [#allocation34], 1 }
0x1620   :  { %4863 = vsyncpa [#allocation34 + $0x1], 1 }

</bundles_post_ra>
